<compile_context>
chip_gen: v7x
topology: tpu7x:2x2x1
jax: 0.10.0
libtpu: 0.0.40
codegen_flags: <defaults>
</compile_context>

<pallas_src>
import jax
import jax.numpy as jnp
from jax.experimental import pallas as pl
from jax.experimental.pallas import tpu as pltpu

N_POINTS = 16   # points in the input point cloud
N_QUERY = 8     # SDF query points
HIDDEN = 32     # hidden width
LATENT = 16     # VAE latent size

_W_ORDER = ("ew1", "ew2", "muw", "dw1", "dw2", "fw", "swq", "swf", "sw2")
_B_ORDER = ("eb1", "eb2", "mub", "db1", "db2", "fb", "sb1", "sb2")

_LANE = 128
_SLOT = 128          # each packed output component gets one lane-aligned slot
_OUT_W = 4 * _SLOT   # [sdf | z | latent_pc | x_recon_flat], each <= 128 wide


def _round_up(x, m):
    return (x + m - 1) // m * m


def _choose_block_b(B):
    """Batch-block size: large blocks, >=2 grid steps when B allows, 8-aligned."""
    tb = -(-B // 2)              # aim for >= 2 parallel grid steps (v7x megacore)
    tb = _round_up(tb, 8)        # sublane alignment for the 2-D output block
    return max(8, min(256, tb))  # cap so double-buffered VMEM stays small


def _pack_params(params):
    """Consolidate 9 weight matrices and 8 biases into two padded slabs."""
    w_blocks, w_off, row = [], {}, 0
    for name in _W_ORDER:
        w = params[name].astype(jnp.float32)
        fi, fo = w.shape
        fi_p = _round_up(fi, 8)
        blk = jnp.zeros((fi_p, _LANE), jnp.float32).at[:fi, :fo].set(w)
        w_blocks.append(blk)
        w_off[name] = (row, fi, fo)
        row += fi_p
    w_slab = jnp.concatenate(w_blocks, axis=0)          # (row, 128)

    b_blocks, b_off = [], {}
    for i, name in enumerate(_B_ORDER):
        b = params[name].astype(jnp.float32).reshape(1, -1)
        fo = b.shape[-1]
        b_blocks.append(jnp.zeros((1, _LANE), jnp.float32).at[:, :fo].set(b))
        b_off[name] = (i, fo)
    while len(b_blocks) % 8:
        b_blocks.append(jnp.zeros((1, _LANE), jnp.float32))
    b_slab = jnp.concatenate(b_blocks, axis=0)           # (8, 128)
    return w_slab, b_slab, w_off, b_off


def modulation_forward(point_cloud, query_points, params, *, block_b=None):
    B, N, _ = point_cloud.shape
    _, M, _ = query_points.shape
    H = params["eb1"].shape[-1]
    Z = params["mub"].shape[-1]
    NR = N * 3
    assert max(M, Z, H, NR) <= _SLOT, "packed output slots assume <=128 lanes"

    w_slab, b_slab, w_off, b_off = _pack_params(params)

    if block_b is None:
        block_b = _choose_block_b(B)
    grid_b = -(-B // block_b)
    b_pad = grid_b * block_b
    if b_pad != B:
        point_cloud = jnp.pad(point_cloud, ((0, b_pad - B), (0, 0), (0, 0)))
        query_points = jnp.pad(query_points, ((0, b_pad - B), (0, 0), (0, 0)))

    def kernel(pc_ref, qp_ref, w_ref, b_ref, out_ref):
        tb = pc_ref.shape[0]

        def wmat(name):
            r, fi, fo = w_off[name]
            return w_ref[r:r + fi, 0:fo]

        def wrow(name, i):
            r, _, fo = w_off[name]
            return w_ref[r + i:r + i + 1, 0:fo]

        def bias(name):
            i, fo = b_off[name]
            return b_ref[i:i + 1, 0:fo]

        # ---- VAE encoder: per-point MLP (K=3 contraction as 3 VPU FMAs) ----
        pcf = pc_ref[...].reshape(tb * N, 3)                       # (tb*N, 3)
        h1 = jnp.maximum(
            pcf[:, 0:1] * wrow("ew1", 0)
            + pcf[:, 1:2] * wrow("ew1", 1)
            + pcf[:, 2:3] * wrow("ew1", 2)
            + bias("eb1"), 0.0)                                    # (tb*N, H)
        h2 = jnp.maximum(
            jnp.dot(h1, wmat("ew2"), preferred_element_type=jnp.float32)
            + bias("eb2"), 0.0)                                    # (tb*N, H)
        # Segmented max-pool: reshape back so pooling never mixes batch rows.
        latent_pc = jnp.max(h2.reshape(tb, N, H), axis=1)          # (tb, H)
        z = (jnp.dot(latent_pc, wmat("muw"),
                     preferred_element_type=jnp.float32)
             + bias("mub"))                                        # (tb, Z)

        # ---- VAE decoder -> flat reconstruction ----
        d1 = jnp.maximum(
            jnp.dot(z, wmat("dw1"), preferred_element_type=jnp.float32)
            + bias("db1"), 0.0)                                    # (tb, H)
        xrec = (jnp.dot(d1, wmat("dw2"), preferred_element_type=jnp.float32)
                + bias("db2"))                                     # (tb, N*3)

        # ---- SDF network: global recon feature + per-query conditional MLP ----
        feat = jnp.maximum(
            jnp.dot(xrec, wmat("fw"), preferred_element_type=jnp.float32)
            + bias("fb"), 0.0)                                     # (tb, H)
        featw = jnp.dot(feat, wmat("swf"),
                        preferred_element_type=jnp.float32)        # (tb, H)
        qpf = qp_ref[...].reshape(tb * M, 3)                       # (tb*M, 3)
        hq0 = (qpf[:, 0:1] * wrow("swq", 0)
               + qpf[:, 1:2] * wrow("swq", 1)
               + qpf[:, 2:3] * wrow("swq", 2)
               + bias("sb1"))                                      # (tb*M, H)
        hq = jnp.maximum(hq0.reshape(tb, M, H) + featw[:, None, :], 0.0)
        sdf = (jnp.dot(hq.reshape(tb * M, H), wmat("sw2"),
                       preferred_element_type=jnp.float32)
               + bias("sb2")).reshape(tb, M)                       # (tb, M)

        # ---- lane-dense packed output slab (one dense writeback per block) ----
        out_ref[...] = jnp.zeros_like(out_ref)
        out_ref[:, 0:M] = sdf
        out_ref[:, _SLOT:_SLOT + Z] = z
        out_ref[:, 2 * _SLOT:2 * _SLOT + H] = latent_pc
        out_ref[:, 3 * _SLOT:3 * _SLOT + NR] = xrec

    packed = pl.pallas_call(
        kernel,
        grid=(grid_b,),
        in_specs=[
            pl.BlockSpec((block_b, N, 3), lambda b: (b, 0, 0)),   # point cloud
            pl.BlockSpec((block_b, M, 3), lambda b: (b, 0, 0)),   # query points
            pl.BlockSpec(w_slab.shape, lambda b: (0, 0)),         # weight slab
            pl.BlockSpec(b_slab.shape, lambda b: (0, 0)),         # bias slab
        ],
        out_specs=pl.BlockSpec((block_b, _OUT_W), lambda b: (b, 0)),
        out_shape=jax.ShapeDtypeStruct((b_pad, _OUT_W), jnp.float32),
        compiler_params=pltpu.CompilerParams(
            dimension_semantics=("parallel",)),
    )(point_cloud, query_points, w_slab, b_slab)

    sdf_values = packed[:B, 0:M].reshape(B, M, 1)
    z = packed[:B, _SLOT:_SLOT + Z]
    latent_pc = packed[:B, 2 * _SLOT:2 * _SLOT + H]
    x_recon = packed[:B, 3 * _SLOT:3 * _SLOT + NR].reshape(B, N, 3)
    return sdf_values, z, latent_pc, x_recon


def init_params(key, n_points=N_POINTS, hidden=HIDDEN, latent=LATENT):
    """Deterministic synthetic parameter init (no checkpoint load)."""
    def dense(k, fan_in, fan_out):
        kw, kb = jax.random.split(k)
        w = jax.random.normal(kw, (fan_in, fan_out), jnp.float32) / jnp.sqrt(
            jnp.float32(fan_in))
        b = 0.01 * jax.random.normal(kb, (1, fan_out), jnp.float32)
        return w, b

    ks = jax.random.split(key, 9)
    p = {}
    p["ew1"], p["eb1"] = dense(ks[0], 3, hidden)
    p["ew2"], p["eb2"] = dense(ks[1], hidden, hidden)
    p["muw"], p["mub"] = dense(ks[2], hidden, latent)
    p["dw1"], p["db1"] = dense(ks[3], latent, hidden)
    p["dw2"], p["db2"] = dense(ks[4], hidden, n_points * 3)
    p["fw"], p["fb"] = dense(ks[5], n_points * 3, hidden)
    p["swq"], p["sb1"] = dense(ks[6], 3, hidden)
    p["swf"], _ = dense(ks[7], hidden, hidden)
    p["sw2"], p["sb2"] = dense(ks[8], hidden, 1)
    return p


def reference_forward(point_cloud, query_points, p):
    """Pure-jnp reference (highest precision) with identical semantics."""
    hp = jax.lax.Precision.HIGHEST
    h1 = jax.nn.relu(
        jnp.einsum("bnk,kh->bnh", point_cloud, p["ew1"], precision=hp)
        + p["eb1"])
    h2 = jax.nn.relu(
        jnp.einsum("bnh,hg->bng", h1, p["ew2"], precision=hp) + p["eb2"])
    latent_pc = h2.max(axis=1)                                        # (B, H)
    z = jnp.matmul(latent_pc, p["muw"], precision=hp) + p["mub"]      # (B, Z)
    d1 = jax.nn.relu(jnp.matmul(z, p["dw1"], precision=hp) + p["db1"])
    xrec_flat = jnp.matmul(d1, p["dw2"], precision=hp) + p["db2"]     # (B, N*3)
    feat = jax.nn.relu(jnp.matmul(xrec_flat, p["fw"], precision=hp) + p["fb"])
    hq = jax.nn.relu(
        jnp.einsum("bmk,kh->bmh", query_points, p["swq"], precision=hp)
        + jnp.matmul(feat, p["swf"], precision=hp)[:, None, :] + p["sb1"])
    sdf = jnp.einsum("bmh,ho->bmo", hq, p["sw2"], precision=hp) + p["sb2"]
    x_recon = xrec_flat.reshape(point_cloud.shape)
    return sdf, z, latent_pc, x_recon


if __name__ == "__main__":
    B = 64
    key = jax.random.PRNGKey(0)
    k_pc, k_qp = jax.random.split(key)
    point_cloud = jax.random.normal(k_pc, (B, N_POINTS, 3), jnp.float32)
    query_points = jax.random.normal(k_qp, (B, N_QUERY, 3), jnp.float32)
    params = init_params(jax.random.PRNGKey(42))

    outs = modulation_forward(point_cloud, query_points, params)
    jax.block_until_ready(outs)
    sdf, z, latent_pc, x_recon = outs

    sdf_r, z_r, lat_r, xrec_r = reference_forward(
        point_cloud, query_points, params)

    assert sdf.shape == (B, N_QUERY, 1)
    assert z.shape == (B, LATENT)
    assert latent_pc.shape == (B, HIDDEN)
    assert x_recon.shape == (B, N_POINTS, 3)
    for name, got, ref in (("sdf", sdf, sdf_r), ("z", z, z_r),
                           ("latent_pc", latent_pc, lat_r),
                           ("x_recon", x_recon, xrec_r)):
        assert jnp.allclose(got, ref, atol=1e-3, rtol=1e-3), name

    print("KERNEL_OK")
</pallas_src>

<mosaic_0001>
module attributes {stable_mosaic.version = 11 : i64} {
  func.func @kernel(%arg0: i32, %arg1: memref<32x16x3xf32, #tpu.memory_space<vmem>>, %arg2: memref<32x8x3xf32, #tpu.memory_space<vmem>>, %arg3: memref<240x128xf32, #tpu.memory_space<vmem>>, %arg4: memref<8x128xf32, #tpu.memory_space<vmem>>, %arg5: memref<32x512xf32, #tpu.memory_space<vmem>>) attributes {dimension_semantics = [#tpu.dimension_semantics<parallel>], iteration_bounds = array<i64: 2>, scalar_prefetch = 0 : i64, scratch_operands = 0 : i64, tpu.core_type = #tpu.core_type<tc>, window_params = [{transform_indices = @transform_0, window_bounds = array<i64: 32, 16, 3>}, {transform_indices = @transform_1, window_bounds = array<i64: 32, 8, 3>}, {pipeline_mode = #tpu.pipeline_mode<synchronous>, transform_indices = @transform_2, window_bounds = array<i64: 240, 128>}, {pipeline_mode = #tpu.pipeline_mode<synchronous>, transform_indices = @transform_3, window_bounds = array<i64: 8, 128>}, {transform_indices = @transform_4, window_bounds = array<i64: 32, 512>}]} {
    %c0 = arith.constant 0 : index
    %c0_0 = arith.constant 0 : index
    %c0_1 = arith.constant 0 : index
    %0 = vector.load %arg1[%c0, %c0_0, %c0_1] : memref<32x16x3xf32, #tpu.memory_space<vmem>>, vector<32x16x3xf32>
    %1 = vector.shape_cast %0 : vector<32x16x3xf32> to vector<512x3xf32>
    %2 = vector.extract_strided_slice %1 {offsets = [0, 0], sizes = [512, 1], strides = [1, 1]} : vector<512x3xf32> to vector<512x1xf32>
    %c0_2 = arith.constant 0 : index
    %c0_3 = arith.constant 0 : index
    %3 = vector.load %arg3[%c0_2, %c0_3] : memref<240x128xf32, #tpu.memory_space<vmem>>, vector<1x32xf32>
    %4 = vector.broadcast %2 : vector<512x1xf32> to vector<512x32xf32>
    %5 = vector.broadcast %3 : vector<1x32xf32> to vector<512x32xf32>
    %6 = arith.mulf %4, %5 : vector<512x32xf32>
    %7 = vector.extract_strided_slice %1 {offsets = [0, 1], sizes = [512, 1], strides = [1, 1]} : vector<512x3xf32> to vector<512x1xf32>
    %c1 = arith.constant 1 : index
    %c0_4 = arith.constant 0 : index
    %8 = vector.load %arg3[%c1, %c0_4] : memref<240x128xf32, #tpu.memory_space<vmem>>, vector<1x32xf32>
    %9 = vector.broadcast %7 : vector<512x1xf32> to vector<512x32xf32>
    %10 = vector.broadcast %8 : vector<1x32xf32> to vector<512x32xf32>
    %11 = arith.mulf %9, %10 : vector<512x32xf32>
    %12 = arith.addf %6, %11 : vector<512x32xf32>
    %13 = vector.extract_strided_slice %1 {offsets = [0, 2], sizes = [512, 1], strides = [1, 1]} : vector<512x3xf32> to vector<512x1xf32>
    %c2 = arith.constant 2 : index
    %c0_5 = arith.constant 0 : index
    %14 = vector.load %arg3[%c2, %c0_5] : memref<240x128xf32, #tpu.memory_space<vmem>>, vector<1x32xf32>
    %15 = vector.broadcast %13 : vector<512x1xf32> to vector<512x32xf32>
    %16 = vector.broadcast %14 : vector<1x32xf32> to vector<512x32xf32>
    %17 = arith.mulf %15, %16 : vector<512x32xf32>
    %18 = arith.addf %12, %17 : vector<512x32xf32>
    %c0_6 = arith.constant 0 : index
    %c0_7 = arith.constant 0 : index
    %19 = vector.load %arg4[%c0_6, %c0_7] : memref<8x128xf32, #tpu.memory_space<vmem>>, vector<1x32xf32>
    %20 = vector.broadcast %19 : vector<1x32xf32> to vector<512x32xf32>
    %21 = arith.addf %18, %20 : vector<512x32xf32>
    %cst = arith.constant 0.000000e+00 : f32
    %22 = vector.broadcast %cst : f32 to vector<512x32xf32>
    %23 = arith.maximumf %21, %22 : vector<512x32xf32>
    %c8 = arith.constant 8 : index
    %c0_8 = arith.constant 0 : index
    %24 = vector.load %arg3[%c8, %c0_8] : memref<240x128xf32, #tpu.memory_space<vmem>>, vector<32x32xf32>
    %cst_9 = arith.constant dense<0.000000e+00> : vector<512x32xf32>
    %25 = tpu.matmul %23, %24, %cst_9 {dimension_numbers = #tpu.dot_dimension_numbers<[1], [0], [0], [1], [0, 0, 1, 1], [], []>} : vector<512x32xf32>, vector<32x32xf32>, vector<512x32xf32> -> vector<512x32xf32>
    %c1_10 = arith.constant 1 : index
    %c0_11 = arith.constant 0 : index
    %26 = vector.load %arg4[%c1_10, %c0_11] : memref<8x128xf32, #tpu.memory_space<vmem>>, vector<1x32xf32>
    %27 = vector.broadcast %26 : vector<1x32xf32> to vector<512x32xf32>
    %28 = arith.addf %25, %27 : vector<512x32xf32>
    %cst_12 = arith.constant 0.000000e+00 : f32
    %29 = vector.broadcast %cst_12 : f32 to vector<512x32xf32>
    %30 = arith.maximumf %28, %29 : vector<512x32xf32>
    %31 = vector.shape_cast %30 : vector<512x32xf32> to vector<32x16x32xf32>
    %cst_13 = arith.constant dense<0xFF800000> : vector<32x32xf32>
    %32 = vector.multi_reduction <maximumf>, %31, %cst_13 [1] : vector<32x16x32xf32> to vector<32x32xf32>
    %c40 = arith.constant 40 : index
    %c0_14 = arith.constant 0 : index
    %33 = vector.load %arg3[%c40, %c0_14] : memref<240x128xf32, #tpu.memory_space<vmem>>, vector<32x16xf32>
    %cst_15 = arith.constant dense<0.000000e+00> : vector<32x16xf32>
    %34 = tpu.matmul %32, %33, %cst_15 {dimension_numbers = #tpu.dot_dimension_numbers<[1], [0], [0], [1], [0, 0, 1, 1], [], []>} : vector<32x32xf32>, vector<32x16xf32>, vector<32x16xf32> -> vector<32x16xf32>
    %c2_16 = arith.constant 2 : index
    %c0_17 = arith.constant 0 : index
    %35 = vector.load %arg4[%c2_16, %c0_17] : memref<8x128xf32, #tpu.memory_space<vmem>>, vector<1x16xf32>
    %36 = vector.broadcast %35 : vector<1x16xf32> to vector<32x16xf32>
    %37 = arith.addf %34, %36 : vector<32x16xf32>
    %c72 = arith.constant 72 : index
    %c0_18 = arith.constant 0 : index
    %38 = vector.load %arg3[%c72, %c0_18] : memref<240x128xf32, #tpu.memory_space<vmem>>, vector<16x32xf32>
    %cst_19 = arith.constant dense<0.000000e+00> : vector<32x32xf32>
    %39 = tpu.matmul %37, %38, %cst_19 {dimension_numbers = #tpu.dot_dimension_numbers<[1], [0], [0], [1], [0, 0, 1, 1], [], []>} : vector<32x16xf32>, vector<16x32xf32>, vector<32x32xf32> -> vector<32x32xf32>
    %c3 = arith.constant 3 : index
    %c0_20 = arith.constant 0 : index
    %40 = vector.load %arg4[%c3, %c0_20] : memref<8x128xf32, #tpu.memory_space<vmem>>, vector<1x32xf32>
    %41 = vector.broadcast %40 : vector<1x32xf32> to vector<32x32xf32>
    %42 = arith.addf %39, %41 : vector<32x32xf32>
    %cst_21 = arith.constant 0.000000e+00 : f32
    %43 = vector.broadcast %cst_21 : f32 to vector<32x32xf32>
    %44 = arith.maximumf %42, %43 : vector<32x32xf32>
    %c88 = arith.constant 88 : index
    %c0_22 = arith.constant 0 : index
    %45 = vector.load %arg3[%c88, %c0_22] : memref<240x128xf32, #tpu.memory_space<vmem>>, vector<32x48xf32>
    %cst_23 = arith.constant dense<0.000000e+00> : vector<32x48xf32>
    %46 = tpu.matmul %44, %45, %cst_23 {dimension_numbers = #tpu.dot_dimension_numbers<[1], [0], [0], [1], [0, 0, 1, 1], [], []>} : vector<32x32xf32>, vector<32x48xf32>, vector<32x48xf32> -> vector<32x48xf32>
    %c4 = arith.constant 4 : index
    %c0_24 = arith.constant 0 : index
    %47 = vector.load %arg4[%c4, %c0_24] : memref<8x128xf32, #tpu.memory_space<vmem>>, vector<1x48xf32>
    %48 = vector.broadcast %47 : vector<1x48xf32> to vector<32x48xf32>
    %49 = arith.addf %46, %48 : vector<32x48xf32>
    %c120 = arith.constant 120 : index
    %c0_25 = arith.constant 0 : index
    %50 = vector.load %arg3[%c120, %c0_25] : memref<240x128xf32, #tpu.memory_space<vmem>>, vector<48x32xf32>
    %cst_26 = arith.constant dense<0.000000e+00> : vector<32x32xf32>
    %51 = tpu.matmul %49, %50, %cst_26 {dimension_numbers = #tpu.dot_dimension_numbers<[1], [0], [0], [1], [0, 0, 1, 1], [], []>} : vector<32x48xf32>, vector<48x32xf32>, vector<32x32xf32> -> vector<32x32xf32>
    %c5 = arith.constant 5 : index
    %c0_27 = arith.constant 0 : index
    %52 = vector.load %arg4[%c5, %c0_27] : memref<8x128xf32, #tpu.memory_space<vmem>>, vector<1x32xf32>
    %53 = vector.broadcast %52 : vector<1x32xf32> to vector<32x32xf32>
    %54 = arith.addf %51, %53 : vector<32x32xf32>
    %cst_28 = arith.constant 0.000000e+00 : f32
    %55 = vector.broadcast %cst_28 : f32 to vector<32x32xf32>
    %56 = arith.maximumf %54, %55 : vector<32x32xf32>
    %c176 = arith.constant 176 : index
    %c0_29 = arith.constant 0 : index
    %57 = vector.load %arg3[%c176, %c0_29] : memref<240x128xf32, #tpu.memory_space<vmem>>, vector<32x32xf32>
    %cst_30 = arith.constant dense<0.000000e+00> : vector<32x32xf32>
    %58 = tpu.matmul %56, %57, %cst_30 {dimension_numbers = #tpu.dot_dimension_numbers<[1], [0], [0], [1], [0, 0, 1, 1], [], []>} : vector<32x32xf32>, vector<32x32xf32>, vector<32x32xf32> -> vector<32x32xf32>
    %c0_31 = arith.constant 0 : index
    %c0_32 = arith.constant 0 : index
    %c0_33 = arith.constant 0 : index
    %59 = vector.load %arg2[%c0_31, %c0_32, %c0_33] : memref<32x8x3xf32, #tpu.memory_space<vmem>>, vector<32x8x3xf32>
    %60 = vector.shape_cast %59 : vector<32x8x3xf32> to vector<256x3xf32>
    %61 = vector.extract_strided_slice %60 {offsets = [0, 0], sizes = [256, 1], strides = [1, 1]} : vector<256x3xf32> to vector<256x1xf32>
    %c168 = arith.constant 168 : index
    %c0_34 = arith.constant 0 : index
    %62 = vector.load %arg3[%c168, %c0_34] : memref<240x128xf32, #tpu.memory_space<vmem>>, vector<1x32xf32>
    %63 = vector.broadcast %61 : vector<256x1xf32> to vector<256x32xf32>
    %64 = vector.broadcast %62 : vector<1x32xf32> to vector<256x32xf32>
    %65 = arith.mulf %63, %64 : vector<256x32xf32>
    %66 = vector.extract_strided_slice %60 {offsets = [0, 1], sizes = [256, 1], strides = [1, 1]} : vector<256x3xf32> to vector<256x1xf32>
    %c169 = arith.constant 169 : index
    %c0_35 = arith.constant 0 : index
    %67 = vector.load %arg3[%c169, %c0_35] : memref<240x128xf32, #tpu.memory_space<vmem>>, vector<1x32xf32>
    %68 = vector.broadcast %66 : vector<256x1xf32> to vector<256x32xf32>
    %69 = vector.broadcast %67 : vector<1x32xf32> to vector<256x32xf32>
    %70 = arith.mulf %68, %69 : vector<256x32xf32>
    %71 = arith.addf %65, %70 : vector<256x32xf32>
    %72 = vector.extract_strided_slice %60 {offsets = [0, 2], sizes = [256, 1], strides = [1, 1]} : vector<256x3xf32> to vector<256x1xf32>
    %c170 = arith.constant 170 : index
    %c0_36 = arith.constant 0 : index
    %73 = vector.load %arg3[%c170, %c0_36] : memref<240x128xf32, #tpu.memory_space<vmem>>, vector<1x32xf32>
    %74 = vector.broadcast %72 : vector<256x1xf32> to vector<256x32xf32>
    %75 = vector.broadcast %73 : vector<1x32xf32> to vector<256x32xf32>
    %76 = arith.mulf %74, %75 : vector<256x32xf32>
    %77 = arith.addf %71, %76 : vector<256x32xf32>
    %c6 = arith.constant 6 : index
    %c0_37 = arith.constant 0 : index
    %78 = vector.load %arg4[%c6, %c0_37] : memref<8x128xf32, #tpu.memory_space<vmem>>, vector<1x32xf32>
    %79 = vector.broadcast %78 : vector<1x32xf32> to vector<256x32xf32>
    %80 = arith.addf %77, %79 : vector<256x32xf32>
    %81 = vector.shape_cast %80 : vector<256x32xf32> to vector<32x8x32xf32>
    %82 = vector.shape_cast %58 : vector<32x32xf32> to vector<32x1x32xf32>
    %83 = vector.broadcast %82 : vector<32x1x32xf32> to vector<32x8x32xf32>
    %84 = arith.addf %81, %83 : vector<32x8x32xf32>
    %cst_38 = arith.constant 0.000000e+00 : f32
    %85 = vector.broadcast %cst_38 : f32 to vector<32x8x32xf32>
    %86 = arith.maximumf %84, %85 : vector<32x8x32xf32>
    %87 = vector.shape_cast %86 : vector<32x8x32xf32> to vector<256x32xf32>
    %c208 = arith.constant 208 : index
    %c0_39 = arith.constant 0 : index
    %88 = vector.load %arg3[%c208, %c0_39] : memref<240x128xf32, #tpu.memory_space<vmem>>, vector<32x1xf32>
    %cst_40 = arith.constant dense<0.000000e+00> : vector<256x1xf32>
    %89 = tpu.matmul %87, %88, %cst_40 {dimension_numbers = #tpu.dot_dimension_numbers<[1], [0], [0], [1], [0, 0, 1, 1], [], []>} : vector<256x32xf32>, vector<32x1xf32>, vector<256x1xf32> -> vector<256x1xf32>
    %c7 = arith.constant 7 : index
    %c0_41 = arith.constant 0 : index
    %90 = vector.load %arg4[%c7, %c0_41] : memref<8x128xf32, #tpu.memory_space<vmem>>, vector<1x1xf32>
    %91 = vector.broadcast %90 : vector<1x1xf32> to vector<256x1xf32>
    %92 = arith.addf %89, %91 : vector<256x1xf32>
    %93 = vector.shape_cast %92 : vector<256x1xf32> to vector<32x8xf32>
    %cst_42 = arith.constant 0.000000e+00 : f32
    %94 = vector.broadcast %cst_42 : f32 to vector<32x512xf32>
    %c0_43 = arith.constant 0 : index
    %c0_44 = arith.constant 0 : index
    %95 = vector.load %arg5[%c0_43, %c0_44] : memref<32x512xf32, #tpu.memory_space<vmem>>, vector<32x512xf32>
    tpu.vector_store %arg5[%c0_43, %c0_44], %94 {strides = array<i32>} : memref<32x512xf32, #tpu.memory_space<vmem>>, vector<32x512xf32>,
    %c0_45 = arith.constant 0 : index
    %c0_46 = arith.constant 0 : index
    %96 = vector.load %arg5[%c0_45, %c0_46] : memref<32x512xf32, #tpu.memory_space<vmem>>, vector<32x8xf32>
    tpu.vector_store %arg5[%c0_45, %c0_46], %93 {strides = array<i32>} : memref<32x512xf32, #tpu.memory_space<vmem>>, vector<32x8xf32>,
    %c0_47 = arith.constant 0 : index
    %c128 = arith.constant 128 : index
    %97 = vector.load %arg5[%c0_47, %c128] : memref<32x512xf32, #tpu.memory_space<vmem>>, vector<32x16xf32>
    tpu.vector_store %arg5[%c0_47, %c128], %37 {strides = array<i32>} : memref<32x512xf32, #tpu.memory_space<vmem>>, vector<32x16xf32>,
    %c0_48 = arith.constant 0 : index
    %c256 = arith.constant 256 : index
    %98 = vector.load %arg5[%c0_48, %c256] : memref<32x512xf32, #tpu.memory_space<vmem>>, vector<32x32xf32>
    tpu.vector_store %arg5[%c0_48, %c256], %32 {strides = array<i32>} : memref<32x512xf32, #tpu.memory_space<vmem>>, vector<32x32xf32>,
    %c0_49 = arith.constant 0 : index
    %c384 = arith.constant 384 : index
    %99 = vector.load %arg5[%c0_49, %c384] : memref<32x512xf32, #tpu.memory_space<vmem>>, vector<32x48xf32>
    tpu.vector_store %arg5[%c0_49, %c384], %49 {strides = array<i32>} : memref<32x512xf32, #tpu.memory_space<vmem>>, vector<32x48xf32>,
    return
  }
  func.func @transform_0(%arg0: i32) -> (i32, i32, i32) {
    %c0_i32 = arith.constant 0 : i32
    %c0_i32_0 = arith.constant 0 : i32
    %c0_i32_1 = arith.constant 0 : i32
    return %arg0, %c0_i32, %c0_i32_0 : i32, i32, i32
  }
  func.func @transform_1(%arg0: i32) -> (i32, i32, i32) {
    %c0_i32 = arith.constant 0 : i32
    %c0_i32_0 = arith.constant 0 : i32
    %c0_i32_1 = arith.constant 0 : i32
    return %arg0, %c0_i32, %c0_i32_0 : i32, i32, i32
  }
  func.func @transform_2(%arg0: i32) -> (i32, i32) {
    %c0_i32 = arith.constant 0 : i32
    %c0_i32_0 = arith.constant 0 : i32
    %c0_i32_1 = arith.constant 0 : i32
    return %c0_i32, %c0_i32_0 : i32, i32
  }
  func.func @transform_3(%arg0: i32) -> (i32, i32) {
    %c0_i32 = arith.constant 0 : i32
    %c0_i32_0 = arith.constant 0 : i32
    %c0_i32_1 = arith.constant 0 : i32
    return %c0_i32, %c0_i32_0 : i32, i32
  }
  func.func @transform_4(%arg0: i32) -> (i32, i32) {
    %c0_i32 = arith.constant 0 : i32
    %c0_i32_0 = arith.constant 0 : i32
    return %arg0, %c0_i32 : i32, i32
  }
}

</mosaic_0001>

<bundles_post_ra>
// kernel: tpu_custom_call.1
= control target key start
LH: loop header
LB: loop body
LE: loop exit
PB: predicated region body
PF: predicated region fallthrough
CT: control target
= control target key end

     0   :  { %9 = vsyncpa [#allocation3], 0  ;;  %s7987_s0 = inlined_call_operand.vmem [shape: f32[64,16,3], index: 0, kind: input, shape index: {}]   ;;  %s7988_s1 = inlined_call_operand.vmem [shape: f32[64,8,3], index: 1, kind: input, shape index: {}]   ;;  %s7989_s2 = inlined_call_operand.vmem [shape: f32[240,128], index: 2, kind: input, shape index: {}]   ;;  %s7990_s3 = inlined_call_operand.vmem [shape: f32[8,128], index: 3, kind: input, shape index: {}]   ;;  %s7991_s4 = inlined_call_operand.hbm [shape: f32[64,512], index: 4, kind: output, shape index: {}]  }
   0x1   :  { %11 = vsyncpa [#allocation3 + $0x1], 0  ;;  %s5848_s15 = smov 0   ;;  %s5850_s16 = smov 0  }
   0x2   :  { %s5852_s17 = smov 0   ;;  %s5854_s18 = smov 0  }
   0x3 LB: > { %s5869_s19 = sadd.s32 4294967295, %s5813_s18   ;;  %s4955_s20 = sadd.s32 4294967294, %s5813_s18   ;;  %s5813_s18 = sphi %s5854_s18, %s8079_s18   ;;  %s5809_s17 = sphi %s5852_s17, %s8078_s17   ;;  %s5805_s16 = sphi %s5850_s16, %s8077_s16   ;;  %s5801_s15 = sphi %s5848_s15, %s8076_s15  }
   0x4   : > { %s5873_s21 = sadd.s32 1, %s5813_s18   ;;  %s118_s22 = sadd.s32 1, %s5809_s17 }
   0x5   : > { %s115_s23 = ssub.s32 %s5813_s18, %s5873_s21  ;;  %p128_p0 = scmp.ne.s32.totalorder %s5809_s17, %s5805_s16 }
   0x6   : > { %p116_p1 = scmp.eq.s32.totalorder %s115_s23, 0  ;;  %p129_p2 = scmp.eq.s32.totalorder %s5869_s19, 1 }
   0x7   : > { %p134_p3 = scmp.ne.s32.totalorder %s5805_s16, %s5801_s15  ;;  %p135_p4 = scmp.eq.s32.totalorder %s4955_s20, 1 }
   0x8   : > { %s5884_s24 = scalar_select %p116_p1, %s5809_s17, %s118_s22  }
   0x9   : > { %p5886_p5 = por %p129_p2, %p128_p0  ;;  %p5890_p6 = por %p135_p4, %p134_p3 }
   0xa   : > { %p4958_p7 = scmp.ge.s32.totalorder %s5813_s18, 1  ;;  %p178_p8 = scmp.lt.s32.totalorder %s5813_s18, 3 }
   0xc   : > { %p179_p9 = pnand %p4958_p7, %p178_p8 }
   0xe   : > { %182 = sbr.rel (%p179_p9) target bundleno = 2484 (0x9b4), region = 36 }
  0x15   : > { %s4960_s27 = sshll.u32 %s5869_s19, 5  ;;  %v7994_v0 = vmov 0   ;;  %v7996_v4 = vmov 1   ;;  %v7992_v6 = vmov 2   ;;  %v1588_v52 = vld [vmem:[%s7989_s2 + $0x8] sm:$0xff]  ;;  %v1589_v53 = vld [vmem:[%s7989_s2 + $0x10] sm:$0xff] }
  0x16   : > { %5585 = vset.pattern.permute.xlu1 %v7994_v0  ;;  %5584 = vset.pattern.permute.xlu0 %v7994_v0  ;;  %p211_p10 = scmp.lt.s32.totalorder %s4960_s27, 63  ;;  %v5478_v54 = vpack.c.bf16 %v1589_v53, %v1588_v52  ;;  %v1590_v57 = vld [vmem:[%s7989_s2 + $0x18] sm:$0xff]  ;;  %v1591_v58 = vld [vmem:[%s7989_s2 + $0x20] sm:$0xff]  ;;  %vm1597_vm0 = vcmask 261120   ;;  %s207_s7 = sand.u32 1, %s5805_s16   ;;  %vm2568_vm1 = vcmask 1041409  }
  0x17   : > { %v5482_v59 = vpack.c.bf16 %v1591_v58, %v1590_v57  ;;  %s4959_s8 = sshll.u32 %s207_s7, 7  ;;  %vm2570_vm2 = vcmask 1042434   ;;  %vm2572_vm3 = vcmask 1043459   ;;  %vm2574_vm4 = vcmask 1044484   ;;  %s5103_s14 = sshll.u32 %s5869_s19, 11 }
  0x18   : > { %s8081_s27 = smov (!%p211_p10, %s4960_s27), 63  ;;  %5479 = vmatprep.subr.bf16.mxu0 %v5478_v54  ;;  %5534 = vmatprep.subr.bf16.mxu1 %v5478_v54  ;;  %s6553_s9 = scalar_lea.vmem [#allocation2], %s4959_s8  ;;  %vm2576_vm5 = vcmask 1045509   ;;  %vm2578_vm6 = vcmask 1046534   ;;  %vm2580_vm7 = vcmask 1047559   ;;  %vm2703_vm8 = vcmask 130048  }
  0x19   : > { %s5101_s28 = sshll.u32 %s8081_s27, 4  ;;  %5481 = vmatpush3.bf16.msra.mxu0 %v5478_v54  ;;  %5536 = vmatpush3.bf16.msra.mxu1 %v5478_v54  ;;  %s4964_s10 = sshll.u32 %s8081_s27, 3  ;;  %vm2922_vm9 = vcmask 392192   ;;  %vm4845_vm10 = vcmask 64512  }
  0x1a   : > { %s5905_s5 = scalar_lea.vmem %s7987_s0, %s5101_s28  ;;  %5483 = vmatprep.subr.bf16.mxu0 %v5482_v59  ;;  %5535 = vmatprep.subr.bf16.mxu1 %v5482_v59  ;;  %s7134_s13 = scalar_lea.vmem %s7988_s1, %s4964_s10 }
  0x1b   : > { %v5908_v1 = vld [vmem:[%s5905_s5 + $0x8] sm:$0xff]  ;;  %v5911_v2 = vld [vmem:[%s5905_s5] sm:$0xff]  ;;  %v5916_v3 = vld [vmem:[%s5905_s5 + $0x18] sm:$0xff]  ;;  %s4881_s20 = sshll.u32 %s6553_s9, 4  ;;  %s7937_s19 = scalar_lea.hbm %s7991_s4, %s5103_s14  ;;  %s7939_s20 = int_to_ptr.vmem [resolvable:$true] %s4881_s20 }
  0x1c   : > { %296 = vperm.xlu1 %5585, %v5908_v1   ;;  %291 = vperm.xlu0 %5584, %v5911_v2   ;;  %v5922_v5 = vld [vmem:[%s5905_s5 + $0x28] sm:$0xff]  ;;  %v5927_v7 = vld [vmem:[%s5905_s5 + $0x38] sm:$0xff]  ;;  %v226_v8 = vld [vmem:[%s5905_s5 + $0x10] sm:$0xff]  ;;  %s7946_s28 = scalar_lea.sflag [#allocation3], %s207_s7  ;;  %s5751_s29 = scalar_lea.vmem %s7939_s20, 2048 }
  0x1d   : > { %v5933_v9 = vld [vmem:[%s5905_s5 + $0x48] sm:$0xff]  ;;  %v5938_v10 = vld [vmem:[%s5905_s5 + $0x58] sm:$0xff]  ;;  %v228_v14 = vld [vmem:[%s5905_s5 + $0x20] sm:$0xff]  ;;  %5485 = vmatpush3.bf16.msra.mxu0 %v5482_v59  ;;  %5537 = vmatpush3.bf16.msra.mxu1 %v5482_v59  ;;  %p5752_p11 = scmp.ne.s32.totalorder %s7939_s20, %s5751_s29 }
  0x1e   : > { %v5943_v11 = vld [vmem:[%s5905_s5 + $0x68] sm:$0xff]  ;;  %v5948_v12 = vld [vmem:[%s5905_s5 + $0x78] sm:$0xff]  ;;  %v230_v20 = vld [vmem:[%s5905_s5 + $0x30] sm:$0xff] }
  0x1f   : > { %v5953_v13 = vld [vmem:[%s5905_s5 + $0x88] sm:$0xff]  ;;  %v5959_v15 = vld [vmem:[%s5905_s5 + $0x98] sm:$0xff]  ;;  %v232_v25 = vld [vmem:[%s5905_s5 + $0x40] sm:$0xff]  ;;  %p5753_p12 = pnand %p5752_p11, %p5886_p5 }
  0x20   : > { %5586 = vset.pattern.permute.xlu1 %v7996_v4  ;;  %306 = vperm.xlu0 %5584, %v5916_v3   ;;  %v5963_v16 = vld [vmem:[%s5905_s5 + $0xa8] sm:$0xff]  ;;  %v5968_v17 = vld [vmem:[%s5905_s5 + $0xb8] sm:$0xff]  ;;  %v234_v31 = vld [vmem:[%s5905_s5 + $0x50] sm:$0xff] }
  0x21   : > { %683 = vperm.xlu1 %5586, %v5908_v1   ;;  %v5973_v18 = vld [vmem:[%s5905_s5 + $0xc8] sm:$0xff]  ;;  %v5978_v19 = vld [vmem:[%s5905_s5 + $0xd8] sm:$0xff]  ;;  %v236_v37 = vld [vmem:[%s5905_s5 + $0x60] sm:$0xff]  ;;  %p5754_p13 = pneg %p5753_p12 }
  0x22   : > { %v5984_v21 = vld [vmem:[%s5905_s5 + $0xe8] sm:$0xff]  ;;  %v5989_v22 = vld [vmem:[%s5905_s5 + $0xf8] sm:$0xff]  ;;  %v6056_v39 = vld [vmem:[%s5905_s5 + $0x1d0] sm:$0xff] }
  0x23   : > { %v5993_v23 = vld [vmem:[%s5905_s5 + $0x108] sm:$0xff]  ;;  %v5998_v24 = vld [vmem:[%s5905_s5 + $0x118] sm:$0xff]  ;;  %v238_v41 = vld [vmem:[%s5905_s5 + $0x70] sm:$0xff] }
  0x24   : > { %316 = vperm.xlu0 %5584, %v5922_v5   ;;  %v6004_v26 = vld [vmem:[%s5905_s5 + $0x128] sm:$0xff]  ;;  %v6009_v27 = vld [vmem:[%s5905_s5 + $0x138] sm:$0xff]  ;;  %v284_v42 = vld [vmem:[%s5905_s5 + $0x1e0] sm:$0xff] }
  0x25   : > { %5587 = vset.pattern.permute.xlu1 %v7992_v6  ;;  %v6014_v28 = vld [vmem:[%s5905_s5 + $0x148] sm:$0xff]  ;;  %v6019_v29 = vld [vmem:[%s5905_s5 + $0x158] sm:$0xff]  ;;  %v240_v60 = vld [vmem:[%s5905_s5 + $0x80] sm:$0xff] }
  0x26   : > { %1068 = vperm.xlu1 %5587, %v5911_v2   ;;  %v6024_v30 = vld [vmem:[%s5905_s5 + $0x168] sm:$0xff]  ;;  %v6029_v32 = vld [vmem:[%s5905_s5 + $0x178] sm:$0xff]  ;;  %v246_v58 = vld [vmem:[%s5905_s5 + $0xb0] sm:$0xff] }
  0x27   : > { %v6034_v33 = vld [vmem:[%s5905_s5 + $0x188] sm:$0xff]  ;;  %v6039_v34 = vld [vmem:[%s5905_s5 + $0x198] sm:$0xff] }
  0x28   : > { %326 = vperm.xlu0 %5584, %v5927_v7   ;;  %v6044_v35 = vld [vmem:[%s5905_s5 + $0x1a8] sm:$0xff]  ;;  %v6049_v36 = vld [vmem:[%s5905_s5 + $0x1b8] sm:$0xff] }
  0x29   : > { %v281_v38 = vld [vmem:[%s5905_s5 + $0x1c8] sm:$0xff]  ;;  %v283_v40 = vld [vmem:[%s5905_s5 + $0x1d8] sm:$0xff] }
  0x2a   : > { %5588 = vset.pattern.permute.xlu1 %v7994_v0  ;;  %v6073_v45 = vld [vmem:[%s5905_s5 + $0x1e8] sm:$0xff]  ;;  %v6082_v48 = vld [vmem:[%s5905_s5 + $0x1f8] sm:$0xff] }
  0x2b   : > { %301 = vperm.xlu1 %5588, %v226_v8  }
  0x2c   : > { %336 = vperm.xlu0 %5584, %v5933_v9  }
  0x2f   : > { %5589 = vset.pattern.permute.xlu1 %v7996_v4 }
  0x30   : > { %687 = vperm.xlu1 %5589, %v226_v8   ;;  %346 = vperm.xlu0 %5584, %v5938_v10  }
  0x34   : > { %691 = vperm.xlu1 %5589, %v5916_v3   ;;  %356 = vperm.xlu0 %5584, %v5943_v11  }
  0x38   : > { %5590 = vset.pattern.permute.xlu1 %v7992_v6  ;;  %366 = vperm.xlu0 %5584, %v5948_v12  }
  0x39   : > { %1076 = vperm.xlu1 %5590, %v226_v8  }
  0x3c   : > { %376 = vperm.xlu0 %5584, %v5953_v13  }
  0x3d   : > { %5591 = vset.pattern.permute.xlu1 %v7994_v0 }
  0x3e   : > { %311 = vperm.xlu1 %5591, %v228_v14  }
  0x40   : > { %386 = vperm.xlu0 %5584, %v5959_v15  }
  0x42   : > { %5592 = vset.pattern.permute.xlu1 %v7996_v4 }
  0x43   : > { %695 = vperm.xlu1 %5592, %v228_v14  }
  0x44   : > { %396 = vperm.xlu0 %5584, %v5963_v16  }
  0x47   : > { %699 = vperm.xlu1 %5592, %v5922_v5  }
  0x48   : > { %406 = vperm.xlu0 %5584, %v5968_v17  }
  0x4b   : > { %5593 = vset.pattern.permute.xlu1 %v7992_v6 }
  0x4c   : > { %1084 = vperm.xlu1 %5593, %v228_v14   ;;  %416 = vperm.xlu0 %5584, %v5973_v18  }
  0x50   : > { %5594 = vset.pattern.permute.xlu1 %v7994_v0  ;;  %426 = vperm.xlu0 %5584, %v5978_v19  }
  0x51   : > { %321 = vperm.xlu1 %5594, %v230_v20  }
  0x54   : > { %436 = vperm.xlu0 %5584, %v5984_v21  }
  0x55   : > { %5595 = vset.pattern.permute.xlu1 %v7996_v4 }
  0x56   : > { %703 = vperm.xlu1 %5595, %v230_v20  }
  0x58   : > { %446 = vperm.xlu0 %5584, %v5989_v22  }
  0x5a   : > { %707 = vperm.xlu1 %5595, %v5927_v7  }
  0x5c   : > { %456 = vperm.xlu0 %5584, %v5993_v23  }
  0x5e   : > { %5596 = vset.pattern.permute.xlu1 %v7992_v6 }
  0x5f   : > { %1092 = vperm.xlu1 %5596, %v230_v20  }
  0x60   : > { %466 = vperm.xlu0 %5584, %v5998_v24  }
  0x63   : > { %5597 = vset.pattern.permute.xlu1 %v7994_v0 }
  0x64   : > { %331 = vperm.xlu1 %5597, %v232_v25   ;;  %476 = vperm.xlu0 %5584, %v6004_v26  }
  0x68   : > { %5598 = vset.pattern.permute.xlu1 %v7996_v4  ;;  %486 = vperm.xlu0 %5584, %v6009_v27  }
  0x69   : > { %711 = vperm.xlu1 %5598, %v232_v25  }
  0x6c   : > { %496 = vperm.xlu0 %5584, %v6014_v28  }
  0x6d   : > { %715 = vperm.xlu1 %5598, %v5933_v9  }
  0x70   : > { %506 = vperm.xlu0 %5584, %v6019_v29  }
  0x71   : > { %5599 = vset.pattern.permute.xlu1 %v7992_v6 }
  0x72   : > { %1100 = vperm.xlu1 %5599, %v232_v25  }
  0x74   : > { %516 = vperm.xlu0 %5584, %v6024_v30  }
  0x76   : > { %5600 = vset.pattern.permute.xlu1 %v7994_v0 }
  0x77   : > { %341 = vperm.xlu1 %5600, %v234_v31  }
  0x78   : > { %526 = vperm.xlu0 %5584, %v6029_v32  }
  0x7b   : > { %5601 = vset.pattern.permute.xlu1 %v7996_v4 }
  0x7c   : > { %719 = vperm.xlu1 %5601, %v234_v31   ;;  %536 = vperm.xlu0 %5584, %v6034_v33  }
  0x80   : > { %723 = vperm.xlu1 %5601, %v5938_v10   ;;  %546 = vperm.xlu0 %5584, %v6039_v34  }
  0x84   : > { %5602 = vset.pattern.permute.xlu1 %v7992_v6  ;;  %556 = vperm.xlu0 %5584, %v6044_v35  }
  0x85   : > { %1108 = vperm.xlu1 %5602, %v234_v31  }
  0x88   : > { %566 = vperm.xlu0 %5584, %v6049_v36  }
  0x89   : > { %5603 = vset.pattern.permute.xlu1 %v7994_v0 }
  0x8a   : > { %351 = vperm.xlu1 %5603, %v236_v37  }
  0x8c   : > { %576 = vperm.xlu0 %5584, %v281_v38  }
  0x8e   : > { %5604 = vset.pattern.permute.xlu1 %v7996_v4 }
  0x8f   : > { %727 = vperm.xlu1 %5604, %v236_v37  }
  0x90   : > { %581 = vperm.xlu0 %5584, %v6056_v39  }
  0x93   : > { %731 = vperm.xlu1 %5604, %v5943_v11  }
  0x94   : > { %586 = vperm.xlu0 %5584, %v283_v40  }
  0x97   : > { %5605 = vset.pattern.permute.xlu1 %v7992_v6 }
  0x98   : > { %1116 = vperm.xlu1 %5605, %v236_v37   ;;  %5677 = vset.pattern.permute.xlu0 %v7996_v4 }
  0x99   : > { %679 = vperm.xlu0 %5677, %v5911_v2  }
  0x9b   : > { %v6067_v43 = vpop.permute.xlu1 %296  ;;  %v6069_v44 = vpop.permute.xlu0 %291 }
  0x9c   : > { %5606 = vset.pattern.permute.xlu1 %v7994_v0 }
  0x9d   : > { %361 = vperm.xlu1 %5606, %v238_v41   ;;  %919 = vperm.xlu0 %5677, %v284_v42  }
  0x9f   : > { %v6075_v46 = vpop.permute.xlu0 %306 }
  0xa0   : > { %v6077_v47 = vpop.permute.xlu1 %683 }
  0xa1   : > { %5607 = vset.pattern.permute.xlu1 %v7996_v4  ;;  %923 = vperm.xlu0 %5677, %v6073_v45  }
  0xa2   : > { %735 = vperm.xlu1 %5607, %v238_v41  }
  0xa3   : > { %v6084_v49 = vpop.permute.xlu0 %316 }
  0xa5   : > { %v6086_v50 = vpop.permute.xlu1 %1068  ;;  %931 = vperm.xlu0 %5677, %v6082_v48  }
  0xa6   : > { %739 = vperm.xlu1 %5607, %v5948_v12  }
  0xa7   : > { %v6090_v51 = vpop.permute.xlu0 %326 }
  0xa9   : > { %5682 = vset.pattern.permute.xlu0 %v7992_v6 }
  0xaa   : > { %5608 = vset.pattern.permute.xlu1 %v7992_v6  ;;  %v6100_v55 = vpop.permute.xlu1 %301  ;;  %1072 = vperm.xlu0 %5682, %v5908_v1  }
  0xab   : > { %1124 = vperm.xlu1 %5608, %v238_v41   ;;  %v6103_v56 = vpop.permute.xlu0 %336 }
  0xae   : > { %1080 = vperm.xlu0 %5682, %v5916_v3  }
  0xaf   : > { %5609 = vset.pattern.permute.xlu1 %v7994_v0  ;;  %v6114_v61 = vpop.permute.xlu1 %687  ;;  %v6116_v62 = vpop.permute.xlu0 %346 }
  0xb0   : > { %371 = vperm.xlu1 %5609, %v240_v60  }
  0xb2   : > { %1088 = vperm.xlu0 %5682, %v5922_v5  }
  0xb3   : > { %v6119_v63 = vpop.permute.xlu1 %691  ;;  %v6121_v1 = vpop.permute.xlu0 %356 }
  0xb4   : > { %5610 = vset.pattern.permute.xlu1 %v7996_v4 }
  0xb5   : > { %743 = vperm.xlu1 %5610, %v240_v60  }
  0xb6   : > { %1096 = vperm.xlu0 %5682, %v5927_v7   ;;  %v242_v7 = vld [vmem:[%s5905_s5 + $0x90] sm:$0xff] }
  0xb7   : > { %v6125_v2 = vpop.permute.xlu0 %366 }
  0xb8   : > { %v6127_v3 = vpop.permute.xlu1 %1076 }
  0xb9   : > { %747 = vperm.xlu1 %5610, %v5953_v13  }
  0xba   : > { %1104 = vperm.xlu0 %5682, %v5933_v9  }
  0xbb   : > { %v6131_v8 = vpop.permute.xlu0 %376 }
  0xbd   : > { %5611 = vset.pattern.permute.xlu1 %v7992_v6  ;;  %v6134_v5 = vpop.permute.xlu1 %311 }
  0xbe   : > { %1132 = vperm.xlu1 %5611, %v240_v60   ;;  %1112 = vperm.xlu0 %5682, %v5938_v10  }
  0xbf   : > { %v6137_v14 = vpop.permute.xlu0 %386 }
  0xc2   : > { %5612 = vset.pattern.permute.xlu1 %v7994_v0  ;;  %v6141_v20 = vpop.permute.xlu1 %695  ;;  %1120 = vperm.xlu0 %5682, %v5943_v11  }
  0xc3   : > { %381 = vperm.xlu1 %5612, %v242_v7   ;;  %v6144_v9 = vpop.permute.xlu0 %396 }
  0xc6   : > { %v6146_v25 = vpop.permute.xlu1 %699  ;;  %1128 = vperm.xlu0 %5682, %v5948_v12  }
  0xc7   : > { %5613 = vset.pattern.permute.xlu1 %v7996_v4  ;;  %v6150_v10 = vpop.permute.xlu0 %406 }
  0xc8   : > { %751 = vperm.xlu1 %5613, %v242_v7  }
  0xca   : > { %1136 = vperm.xlu0 %5682, %v5953_v13   ;;  %v244_v13 = vld [vmem:[%s5905_s5 + $0xa0] sm:$0xff] }
  0xcb   : > { %v6153_v31 = vpop.permute.xlu1 %1084  ;;  %v6155_v37 = vpop.permute.xlu0 %416 }
  0xcc   : > { %755 = vperm.xlu1 %5613, %v5959_v15  }
  0xce   : > { %1144 = vperm.xlu0 %5682, %v5959_v15  }
  0xcf   : > { %v6159_v11 = vpop.permute.xlu0 %426 }
  0xd0   : > { %8001 = vst [vmem:[#allocation5_spill] sm:$0xff] %v6159_v11  ;;  %5614 = vset.pattern.permute.xlu1 %v7992_v6  ;;  %v6162_v12 = vpop.permute.xlu1 %321 }
  0xd1   : > { %1140 = vperm.xlu1 %5614, %v242_v7  }
  0xd2   : > { %1152 = vperm.xlu0 %5682, %v5963_v16  }
  0xd3   : > { %v6165_v38 = vpop.permute.xlu0 %436 }
  0xd4   : > { %8002 = vst [vmem:[#allocation6_spill] sm:$0xff] %v6165_v38 }
  0xd5   : > { %5615 = vset.pattern.permute.xlu1 %v7994_v0  ;;  %v6169_v40 = vpop.permute.xlu1 %703 }
  0xd6   : > { %391 = vperm.xlu1 %5615, %v244_v13   ;;  %1160 = vperm.xlu0 %5682, %v5968_v17  }
  0xd7   : > { %v6172_v15 = vpop.permute.xlu0 %446 }
  0xd8   : > { %8003 = vst [vmem:[#allocation7_spill] sm:$0xff] %v6172_v15 }
  0xd9   : > { %v6174_v41 = vpop.permute.xlu1 %707 }
  0xda   : > { %5616 = vset.pattern.permute.xlu1 %v7996_v4  ;;  %1168 = vperm.xlu0 %5682, %v5973_v18  }
  0xdb   : > { %759 = vperm.xlu1 %5616, %v244_v13   ;;  %v6178_v42 = vpop.permute.xlu0 %456 }
  0xdc   : > { %8004 = vst [vmem:[#allocation8_spill] sm:$0xff] %v6178_v42 }
  0xde   : > { %v6180_v52 = vpop.permute.xlu1 %1092  ;;  %1176 = vperm.xlu0 %5682, %v5978_v19  }
  0xdf   : > { %763 = vperm.xlu1 %5616, %v5963_v16   ;;  %v6184_v53 = vpop.permute.xlu0 %466 }
  0xe0   : > { %8005 = vst [vmem:[#allocation9_spill] sm:$0xff] %v6184_v53 }
  0xe2   : > { %1184 = vperm.xlu0 %5682, %v5984_v21  }
  0xe3   : > { %5617 = vset.pattern.permute.xlu1 %v7992_v6  ;;  %v6188_v54 = vpop.permute.xlu1 %331  ;;  %v6190_v57 = vpop.permute.xlu0 %476 }
  0xe4   : > { %8006 = vst [vmem:[#allocation10_spill] sm:$0xff] %v6190_v57  ;;  %1148 = vperm.xlu1 %5617, %v244_v13   ;;  %v248_v57 = vld [vmem:[%s5905_s5 + $0xc0] sm:$0xff] }
  0xe6   : > { %1192 = vperm.xlu0 %5682, %v5989_v22  }
  0xe7   : > { %v6194_v59 = vpop.permute.xlu0 %486 }
  0xe8   : > { %8007 = vst [vmem:[#allocation11_spill] sm:$0xff] %v6194_v59  ;;  %5618 = vset.pattern.permute.xlu1 %v7994_v0  ;;  %v6197_v60 = vpop.permute.xlu1 %711  ;;  %v8011_v59 = vmov 2  }
  0xe9   : > { %401 = vperm.xlu1 %5618, %v246_v58  }
  0xea   : > { %1200 = vperm.xlu0 %5682, %v5993_v23  }
  0xeb   : > { %v6200_v16 = vpop.permute.xlu0 %496 }
  0xec   : > { %8008 = vst [vmem:[#allocation12_spill] sm:$0xff] %v6200_v16  ;;  %v6202_v7 = vpop.permute.xlu1 %715 }
  0xed   : > { %5619 = vset.pattern.permute.xlu1 %v7996_v4 }
  0xee   : > { %767 = vperm.xlu1 %5619, %v246_v58   ;;  %1208 = vperm.xlu0 %5682, %v5998_v24  }
  0xef   : > { %v6206_v13 = vpop.permute.xlu0 %506 }
  0xf0   : > { %8009 = vst [vmem:[#allocation13_spill] sm:$0xff] %v6206_v13  ;;  %v8013_v13 = vmov 0  }
  0xf1   : > { %v6208_v6 = vpop.permute.xlu1 %1100 }
  0xf2   : > { %771 = vperm.xlu1 %5619, %v5968_v17   ;;  %1216 = vperm.xlu0 %5682, %v6004_v26  }
  0xf3   : > { %v6212_v0 = vpop.permute.xlu0 %516 }
  0xf4   : > { %8010 = vst [vmem:[#allocation14_spill] sm:$0xff] %v6212_v0 }
  0xf6   : > { %5620 = vset.pattern.permute.xlu1 %v8011_v59  ;;  %v6215_v16 = vpop.permute.xlu1 %341  ;;  %1224 = vperm.xlu0 %5682, %v6009_v27  }
  0xf7   : > { %1156 = vperm.xlu1 %5620, %v246_v58   ;;  %v6218_v4 = vpop.permute.xlu0 %526  ;;  %v8016_v58 = vmov 1  }
  0xf8   : > { %8012 = vst [vmem:[#allocation15_spill] sm:$0xff] %v6218_v4 }
  0xfa   : > { %1232 = vperm.xlu0 %5682, %v6014_v28  }
  0xfb   : > { %5621 = vset.pattern.permute.xlu1 %v8013_v13  ;;  %v6223_v53 = vpop.permute.xlu1 %719  ;;  %v6225_v17 = vpop.permute.xlu0 %536 }
  0xfc   : > { %8014 = vst [vmem:[#allocation16_spill] sm:$0xff] %v6225_v17  ;;  %411 = vperm.xlu1 %5621, %v248_v57  }
  0xfe   : > { %1240 = vperm.xlu0 %5682, %v6019_v29  }
  0xff   : > { %v6228_v0 = vpop.permute.xlu1 %723  ;;  %v6230_v42 = vpop.permute.xlu0 %546 }
 0x100   : > { %8015 = vst [vmem:[#allocation17_spill] sm:$0xff] %v6230_v42  ;;  %5622 = vset.pattern.permute.xlu1 %v8016_v58 }
 0x101   : > { %775 = vperm.xlu1 %5622, %v248_v57  }
 0x102   : > { %1248 = vperm.xlu0 %5682, %v6024_v30   ;;  %v250_v30 = vld [vmem:[%s5905_s5 + $0xd0] sm:$0xff] }
 0x103   : > { %v6234_v28 = vpop.permute.xlu0 %556 }
 0x104   : > { %8017 = vst [vmem:[#allocation18_spill] sm:$0xff] %v6234_v28  ;;  %v6236_v4 = vpop.permute.xlu1 %1108 }
 0x105   : > { %779 = vperm.xlu1 %5622, %v5973_v18  }
 0x106   : > { %1256 = vperm.xlu0 %5682, %v6029_v32  }
 0x107   : > { %v6240_v17 = vpop.permute.xlu0 %566 }
 0x108   : > { %8018 = vst [vmem:[#allocation19_spill] sm:$0xff] %v6240_v17 }
 0x109   : > { %5623 = vset.pattern.permute.xlu1 %v8011_v59  ;;  %v6243_v29 = vpop.permute.xlu1 %351 }
 0x10a   : > { %1164 = vperm.xlu1 %5623, %v248_v57   ;;  %1264 = vperm.xlu0 %5682, %v6034_v33   ;;  %v6264_v33 = vld [vmem:[%s7989_s2] ss:$0 sm:$0xff] }
 0x10b   : > { %v6246_v42 = vpop.permute.xlu0 %576 }
 0x10c   : > { %8019 = vst [vmem:[#allocation20_spill] sm:$0xff] %v6246_v42 }
 0x10e   : > { %5624 = vset.pattern.permute.xlu1 %v8013_v13  ;;  %v6250_v28 = vpop.permute.xlu1 %727  ;;  %1272 = vperm.xlu0 %5682, %v6039_v34   ;;  %v613_v34 = vmul.f32 %v6264_v33, %v6069_v44 }
 0x10f   : > { %421 = vperm.xlu1 %5624, %v250_v30   ;;  %v6253_v18 = vpop.permute.xlu0 %581 }
 0x110   : > { %8020 = vst [vmem:[#allocation21_spill] sm:$0xff] %v6253_v18 }
 0x112   : > { %v6255_v32 = vpop.permute.xlu1 %731  ;;  %1280 = vperm.xlu0 %5682, %v6044_v35   ;;  %v6274_v35 = vld [vmem:[%s7989_s2 + $0x1] ss:$0 sm:$0xff] }
 0x113   : > { %5625 = vset.pattern.permute.xlu1 %v8016_v58  ;;  %v6259_v57 = vpop.permute.xlu0 %586 }
 0x114   : > { %8021 = vst [vmem:[#allocation22_spill] sm:$0xff] %v6259_v57  ;;  %783 = vperm.xlu1 %5625, %v250_v30   ;;  %v6279_v57 = vld [vmem:[%s7989_s2 + $0x2] ss:$0 sm:$0xff] }
 0x115   : > { %v1327_v44 = vmul.f32 %v6279_v57, %v6086_v50 }
 0x116   : > { %1288 = vperm.xlu0 %5682, %v6049_v36  }
 0x117   : > { %v6269_v18 = vpop.permute.xlu1 %1116 }
 0x118   : > { %787 = vperm.xlu1 %5625, %v5978_v19   ;;  %v680_v42 = vpop.permute.xlu0 %679  ;;  %v6294_v19 = vld [vmem:[%s7990_s3] ss:$0 sm:$0xff] }
 0x119   : > { %v938_v36 = vmul.f32 %v6274_v35, %v680_v42 }
 0x11a   : > { %1312 = vperm.xlu0 %5682, %v6073_v45   ;;  %v252_v45 = vld [vmem:[%s5905_s5 + $0xe0] sm:$0xff] }
 0x11b   : > { %v1002_v17 = vadd.f32 %v938_v36, %v613_v34 }
 0x11c   : > { %5626 = vset.pattern.permute.xlu1 %v8011_v59  ;;  %v6287_v15 = vpop.permute.xlu1 %361  ;;  %v6289_v38 = vpop.permute.xlu0 %919 }
 0x11d   : > { %8022 = vst [vmem:[#allocation23_spill] sm:$0xff] %v6289_v38  ;;  %1172 = vperm.xlu1 %5626, %v250_v30   ;;  %v1391_v11 = vadd.f32 %v1327_v44, %v1002_v17  ;;  %v940_v17 = vmul.f32 %v6274_v35, %v6114_v61 }
 0x11e   : > { %1300 = vperm.xlu0 %5682, %v6056_v39   ;;  %v615_v39 = vmul.f32 %v6264_v33, %v6100_v55  ;;  %v614_v55 = vmul.f32 %v6264_v33, %v6067_v43 }
 0x11f   : > { %v1460_v42 = vadd.f32 %v6294_v19, %v1391_v11  ;;  %v1329_v11 = vmul.f32 %v6279_v57, %v6127_v3  ;;  %v617_v3 = vmul.f32 %v6264_v33, %v6134_v5  ;;  %v619_v5 = vmul.f32 %v6264_v33, %v6162_v12 }
 0x120   : > { %v6299_v50 = vpop.permute.xlu0 %923  ;;  %v1004_v38 = vadd.f32 %v940_v17, %v615_v39 }
 0x121   : > { %8023 = vst [vmem:[#allocation24_spill] sm:$0xff] %v6299_v50  ;;  %5627 = vset.pattern.permute.xlu1 %v8013_v13  ;;  %v6302_v34 = vpop.permute.xlu1 %735  ;;  %v1524_v36 = vmax.f32 %v1460_v42, 0.0  ;;  %v939_v42 = vmul.f32 %v6274_v35, %v6077_v47  ;;  %v944_v47 = vmul.f32 %v6274_v35, %v6169_v40 }
 0x122   : > { %431 = vperm.xlu1 %5627, %v252_v45   ;;  %1320 = vperm.xlu0 %5682, %v6082_v48   ;;  %v942_v48 = vmul.f32 %v6274_v35, %v6141_v20  ;;  %v1393_v61 = vadd.f32 %v1329_v11, %v1004_v38  ;;  %v941_v20 = vmul.f32 %v6274_v35, %v6119_v63 }
 0x123   : > { %5256 = vmatprep.mubr.msk.f32.mxu0 %vm1597_vm0, %v1524_v36  ;;  %v1331_v36 = vmul.f32 %v6279_v57, %v6153_v31  ;;  %v1003_v39 = vadd.f32 %v939_v42, %v614_v55  ;;  %v1333_v31 = vmul.f32 %v6279_v57, %v6180_v52  ;;  %v943_v63 = vmul.f32 %v6274_v35, %v6146_v25 }
 0x124   : > { %v6312_v30 = vpop.permute.xlu0 %931  ;;  %v1006_v11 = vadd.f32 %v942_v48, %v617_v3  ;;  %v1462_v40 = vadd.f32 %v6294_v19, %v1393_v61 }
 0x125   : > { %8024 = vst [vmem:[#allocation25_spill] sm:$0xff] %v6312_v30  ;;  %v6314_v44 = vpop.permute.xlu1 %739  ;;  %v616_v30 = vmul.f32 %v6264_v33, %v6075_v46  ;;  %v618_v46 = vmul.f32 %v6264_v33, %v6084_v49  ;;  %v620_v49 = vmul.f32 %v6264_v33, %v6090_v51  ;;  %v948_v51 = vmul.f32 %v6274_v35, %v6223_v53 }
 0x126   : > { %5628 = vset.pattern.permute.xlu1 %v8016_v58  ;;  %5685 = vset.pattern.permute.xlu0 %v8016_v58  ;;  %v1395_v55 = vadd.f32 %v1331_v36, %v1006_v11  ;;  %v1526_v25 = vmax.f32 %v1462_v40, 0.0  ;;  %v945_v11 = vmul.f32 %v6274_v35, %v6174_v41  ;;  %v1337_v41 = vmul.f32 %v6279_v57, %v6236_v4 }
 0x127   : > { %791 = vperm.xlu1 %5628, %v252_v45   ;;  %v1005_v3 = vadd.f32 %v941_v20, %v616_v30  ;;  %v1007_v30 = vadd.f32 %v943_v63, %v618_v46  ;;  %v621_v20 = vmul.f32 %v6264_v33, %v6188_v54  ;;  %v622_v46 = vmul.f32 %v6264_v33, %v6103_v56 }
 0x128   : > { %v950_v56 = vmul.f32 %v6274_v35, %v6250_v28  ;;  %v949_v28 = vmul.f32 %v6274_v35, %v6228_v0  ;;  %v951_v0 = vmul.f32 %v6274_v35, %v6255_v32  ;;  %v628_v32 = vmul.f32 %v6264_v33, %v6125_v2 }
 0x129   : > { %v1073_v17 = vpop.permute.xlu0 %1072  ;;  %v953_v2 = vmul.f32 %v6274_v35, %v6314_v44  ;;  %v630_v44 = vmul.f32 %v6264_v33, %v6131_v8 }
 0x12a   : > { %v1328_v43 = vmul.f32 %v6279_v57, %v1073_v17  ;;  %v6335_v38 = vpop.permute.xlu1 %1124  ;;  %v1008_v17 = vadd.f32 %v944_v47, %v619_v5 }
 0x12b   : > { %795 = vperm.xlu1 %5628, %v5984_v21   ;;  %v946_v21 = vmul.f32 %v6274_v35, %v6197_v60  ;;  %v1335_v60 = vmul.f32 %v6279_v57, %v6208_v6  ;;  %v623_v6 = vmul.f32 %v6264_v33, %v6215_v16  ;;  %v1009_v16 = vadd.f32 %v945_v11, %v620_v49 }
 0x12c   : > { %v1392_v42 = vadd.f32 %v1328_v43, %v1003_v39  ;;  %v1397_v52 = vadd.f32 %v1333_v31, %v1008_v17  ;;  %v1464_v39 = vadd.f32 %v6294_v19, %v1395_v55  ;;  %v947_v55 = vmul.f32 %v6274_v35, %v6202_v7 }
 0x12d   : > { %v1081_v48 = vpop.permute.xlu0 %1080  ;;  %v1010_v31 = vadd.f32 %v946_v21, %v621_v20  ;;  %v1339_v20 = vmul.f32 %v6279_v57, %v6269_v18  ;;  %v952_v18 = vmul.f32 %v6274_v35, %v6302_v34 }
 0x12e   : > { %v1461_v12 = vadd.f32 %v6294_v19, %v1392_v42  ;;  %v1330_v50 = vmul.f32 %v6279_v57, %v1081_v48  ;;  %v1466_v54 = vadd.f32 %v6294_v19, %v1397_v52  ;;  %v1528_v63 = vmax.f32 %v1464_v39, 0.0 }
 0x12f   : > { %5629 = vset.pattern.permute.xlu1 %v8011_v59  ;;  %v6352_v61 = vpop.permute.xlu1 %371  ;;  %v1399_v17 = vadd.f32 %v1335_v60, %v1010_v31  ;;  %v624_v52 = vmul.f32 %v6264_v33, %v6116_v62  ;;  %v625_v39 = vmul.f32 %v6264_v33, %v6243_v29  ;;  %v626_v29 = vmul.f32 %v6264_v33, %v6121_v1 }
 0x130   : > { %v1525_v36 = vmax.f32 %v1461_v12, 0.0  ;;  %v1394_v47 = vadd.f32 %v1330_v50, %v1005_v3  ;;  %1180 = vperm.xlu1 %5629, %v252_v45   ;;  %v6369_v50 = vld [vmem:[%s5905_s5 + $0xf0] sm:$0xff]  ;;  %v1012_v3 = vadd.f32 %v948_v51, %v623_v6  ;;  %v1530_v7 = vmax.f32 %v1466_v54, 0.0 }
 0x131   : > { %v1089_v43 = vpop.permute.xlu0 %1088  ;;  %v1014_v11 = vadd.f32 %v950_v56, %v625_v39  ;;  %v627_v6 = vmul.f32 %v6264_v33, %v6287_v15  ;;  %v1341_v1 = vmul.f32 %v6279_v57, %v6335_v38  ;;  %v1013_v34 = vadd.f32 %v949_v28, %v624_v52  ;;  %v256_v39 = vld [vmem:[%s5905_s5 + $0x100] sm:$0xff] }
 0x132   : > { %v1463_v5 = vadd.f32 %v6294_v19, %v1394_v47  ;;  %v1332_v45 = vmul.f32 %v6279_v57, %v1089_v43  ;;  %5257 = vmatmul.mubr.msk.f32.vlgmr.msra.gmra.mrb[0].mxu0 %vm1597_vm0, %v1525_v36  ;;  %v1401_v21 = vadd.f32 %v1337_v41, %v1012_v3  ;;  %v1011_v47 = vadd.f32 %v947_v55, %v622_v46 }
 0x133   : > { %5259 = vmatprep.mubr.msk.f32.mxu0 %vm1597_vm0, %v1526_v25  ;;  %v1403_v31 = vadd.f32 %v1339_v20, %v1014_v11  ;;  %v1015_v55 = vadd.f32 %v951_v0, %v626_v29  ;;  %v1017_v20 = vadd.f32 %v953_v2, %v628_v32 }
 0x134   : > { %v1527_v53 = vmax.f32 %v1463_v5, 0.0  ;;  %v1396_v40 = vadd.f32 %v1332_v45, %v1007_v30  ;;  %5630 = vset.pattern.permute.xlu1 %v8013_v13  ;;  %v744_v42 = vpop.permute.xlu1 %743  ;;  %v1468_v30 = vadd.f32 %v6294_v19, %v1399_v17  ;;  %v1470_v51 = vadd.f32 %v6294_v19, %v1401_v21 }
 0x135   : > { %441 = vperm.xlu1 %5630, %v6369_v50   ;;  %v1097_v48 = vpop.permute.xlu0 %1096  ;;  %v954_v15 = vmul.f32 %v6274_v35, %v744_v42 }
 0x136   : > { %v1465_v4 = vadd.f32 %v6294_v19, %v1396_v40  ;;  %v1334_v12 = vmul.f32 %v6279_v57, %v1097_v48  ;;  %5260 = vmatmul.mubr.msk.f32.gmra.mrb[2].mxu0 %vm1597_vm0, %v1527_v53  ;;  %v1532_v54 = vmax.f32 %v1468_v30, 0.0  ;;  %v1534_v38 = vmax.f32 %v1470_v51, 0.0 }
 0x137   : > { %5262 = vmatprep.mubr.msk.f32.mxu0 %vm1597_vm0, %v1528_v63  ;;  %v1016_v63 = vadd.f32 %v952_v18, %v627_v6 }
 0x138   : > { %v1529_v25 = vmax.f32 %v1465_v4, 0.0  ;;  %v1398_v36 = vadd.f32 %v1334_v12, %v1009_v16  ;;  %v748_v49 = vpop.permute.xlu1 %747  ;;  %v1472_v16 = vadd.f32 %v6294_v19, %v1403_v31 }
 0x139   : > { %5631 = vset.pattern.permute.xlu1 %v8016_v58  ;;  %v1105_v62 = vpop.permute.xlu0 %1104  ;;  %v1405_v3 = vadd.f32 %v1341_v1, %v1016_v63 }
 0x13a   : > { %v1467_v60 = vadd.f32 %v6294_v19, %v1398_v36  ;;  %v1336_v43 = vmul.f32 %v6279_v57, %v1105_v62  ;;  %799 = vperm.xlu1 %5631, %v6369_v50   ;;  %5263 = vmatmul.mubr.msk.f32.gmra.mrb[4].mxu0 %vm1597_vm0, %v1529_v25  ;;  %v1536_v25 = vmax.f32 %v1472_v16, 0.0  ;;  %v955_v62 = vmul.f32 %v6274_v35, %v748_v49 }
 0x13b   : > { %5265 = vmatprep.mubr.msk.f32.mxu0 %vm1597_vm0, %v1530_v7  ;;  %v1474_v36 = vadd.f32 %v6294_v19, %v1405_v3  ;;  %v632_v49 = vmul.f32 %v6264_v33, %v6137_v14 }
 0x13c   : > { %v1531_v5 = vmax.f32 %v1467_v60, 0.0  ;;  %v1400_v45 = vadd.f32 %v1336_v43, %v1011_v47  ;;  %v1019_v51 = vadd.f32 %v955_v62, %v630_v44 }
 0x13d   : > { %v1133_v41 = vpop.permute.xlu1 %1132  ;;  %v1113_v53 = vpop.permute.xlu0 %1112  ;;  %v1538_v29 = vmax.f32 %v1474_v36, 0.0 }
 0x13e   : > { %v1469_v40 = vadd.f32 %v6294_v19, %v1400_v45  ;;  %v1338_v46 = vmul.f32 %v6279_v57, %v1113_v53  ;;  %803 = vperm.xlu1 %5631, %v5989_v22   ;;  %5266 = vmatmul.mubr.msk.f32.gmra.mrb[6].mxu0 %vm1597_vm0, %v1531_v5  ;;  %v629_v22 = vmul.f32 %v6264_v33, %v6352_v61 }
 0x13f   : > { %5268 = vmatprep.mubr.msk.f32.mxu0 %vm1597_vm0, %v1532_v54  ;;  %v1343_v4 = vmul.f32 %v6279_v57, %v1133_v41 }
 0x140   : > { %v1533_v17 = vmax.f32 %v1469_v40, 0.0  ;;  %v1402_v48 = vadd.f32 %v1338_v46, %v1013_v34  ;;  %v1018_v7 = vadd.f32 %v954_v15, %v629_v22 }
 0x141   : > { %v1121_v12 = vpop.permute.xlu0 %1120 }
 0x142   : > { %v1471_v42 = vadd.f32 %v6294_v19, %v1402_v48  ;;  %v1340_v52 = vmul.f32 %v6279_v57, %v1121_v12  ;;  %5632 = vset.pattern.permute.xlu1 %v8011_v59  ;;  %v382_v56 = vpop.permute.xlu1 %381  ;;  %5269 = vmatmul.mubr.msk.f32.gmra.mrb[8].mxu0 %vm1597_vm0, %v1533_v17  ;;  %v1407_v47 = vadd.f32 %v1343_v4, %v1018_v7  ;;  %v258_v12 = vld [vmem:[%s5905_s5 + $0x110] sm:$0xff] }
 0x143   : > { %1188 = vperm.xlu1 %5632, %v6369_v50   ;;  %5271 = vmatprep.mubr.msk.f32.mxu0 %vm1597_vm0, %v1534_v38  ;;  %v631_v46 = vmul.f32 %v6264_v33, %v382_v56 }
 0x144   : > { %v1535_v61 = vmax.f32 %v1471_v42, 0.0  ;;  %v1404_v21 = vadd.f32 %v1340_v52, %v1015_v55  ;;  %v1476_v11 = vadd.f32 %v6294_v19, %v1407_v47  ;;  %v634_v42 = vmul.f32 %v6264_v33, %v6144_v9 }
 0x145   : > { %v1129_v30 = vpop.permute.xlu0 %1128 }
 0x146   : > { %v1473_v28 = vadd.f32 %v6294_v19, %v1404_v21  ;;  %v1342_v50 = vmul.f32 %v6279_v57, %v1129_v30  ;;  %5272 = vmatmul.mubr.msk.f32.gmra.mrb[10].mxu0 %vm1597_vm0, %v1535_v61  ;;  %v1540_v1 = vmax.f32 %v1476_v11, 0.0 }
 0x147   : > { %5633 = vset.pattern.permute.xlu1 %v8013_v13  ;;  %v752_v60 = vpop.permute.xlu1 %751  ;;  %5274 = vmatprep.mubr.msk.f32.mxu0 %vm1597_vm0, %v1536_v25 }
 0x148   : > { %v1537_v8 = vmax.f32 %v1473_v28, 0.0  ;;  %v1406_v43 = vadd.f32 %v1342_v50, %v1017_v20  ;;  %451 = vperm.xlu1 %5633, %v256_v39   ;;  %v956_v41 = vmul.f32 %v6274_v35, %v752_v60  ;;  %v260_v60 = vld [vmem:[%s5905_s5 + $0x120] sm:$0xff] }
 0x149   : > { %v1137_v18 = vpop.permute.xlu0 %1136 }
 0x14a   : > { %v1475_v0 = vadd.f32 %v6294_v19, %v1406_v43  ;;  %v1344_v5 = vmul.f32 %v6279_v57, %v1137_v18  ;;  %5275 = vmatmul.mubr.msk.f32.gmra.mrb[12].mxu0 %vm1597_vm0, %v1537_v8  ;;  %v1020_v38 = vadd.f32 %v956_v41, %v631_v46  ;;  %v636_v43 = vmul.f32 %v6264_v33, %v6150_v10 }
 0x14b   : > { %v756_v45 = vpop.permute.xlu1 %755  ;;  %5277 = vmatprep.mubr.msk.f32.mxu0 %vm1597_vm0, %v1538_v29  ;;  %v638_v46 = vmul.f32 %v6264_v33, %v6155_v37 }
 0x14c   : > { %v1539_v54 = vmax.f32 %v1475_v0, 0.0  ;;  %v1408_v31 = vadd.f32 %v1344_v5, %v1019_v51  ;;  %v957_v6 = vmul.f32 %v6274_v35, %v756_v45  ;;  %5634 = vset.pattern.permute.xlu1 %v8016_v58 }
 0x14d   : > { %807 = vperm.xlu1 %5634, %v256_v39   ;;  %v1145_v14 = vpop.permute.xlu0 %1144 }
 0x14e   : > { %v1477_v53 = vadd.f32 %v6294_v19, %v1408_v31  ;;  %v1021_v34 = vadd.f32 %v957_v6, %v632_v49  ;;  %v1346_v40 = vmul.f32 %v6279_v57, %v1145_v14  ;;  %5278 = vmatmul.mubr.msk.f32.gmra.mrb[14].mxu0 %vm1597_vm0, %v1539_v54 }
 0x14f   : > { %5280 = vmatprep.mubr.msk.f32.mxu0 %vm1597_vm0, %v1540_v1 }
 0x150   : > { %v1541_v32 = vmax.f32 %v1477_v53, 0.0  ;;  %v1410_v63 = vadd.f32 %v1346_v40, %v1021_v34  ;;  %v1141_v15 = vpop.permute.xlu1 %1140  ;;  %v262_v34 = vld [vmem:[%s5905_s5 + $0x130] sm:$0xff] }
 0x151   : > { %v1345_v55 = vmul.f32 %v6279_v57, %v1141_v15  ;;  %811 = vperm.xlu1 %5634, %v5993_v23   ;;  %v1153_v23 = vpop.permute.xlu0 %1152 }
 0x152   : > { %5281 = vmatmul.mubr.msk.f32.gmra.mrb[16].mxu0 %vm1597_vm0, %v1541_v32  ;;  %v1479_v48 = vadd.f32 %v6294_v19, %v1410_v63  ;;  %v1348_v7 = vmul.f32 %v6279_v57, %v1153_v23 }
 0x153   : > { %v1409_v17 = vadd.f32 %v1345_v55, %v1020_v38 }
 0x154   : > { %v1543_v4 = vmax.f32 %v1479_v48, 0.0 }
 0x155   : > { %v1478_v16 = vadd.f32 %v6294_v19, %v1409_v17  ;;  %5635 = vset.pattern.permute.xlu1 %v8011_v59  ;;  %v392_v3 = vpop.permute.xlu1 %391 }
 0x156   : > { %1196 = vperm.xlu1 %5635, %v256_v39   ;;  %v633_v44 = vmul.f32 %v6264_v33, %v392_v3 }
 0x157   : > { %v1542_v22 = vmax.f32 %v1478_v16, 0.0 }
 0x159   : > { %5283 = vmatprep.mubr.msk.f32.mxu0 %vm1597_vm0, %v1542_v22 }
 0x15a   : > { %5636 = vset.pattern.permute.xlu1 %v8013_v13  ;;  %v760_v2 = vpop.permute.xlu1 %759  ;;  %5284 = vmatmul.mubr.msk.f32.gmra.mrb[18].mxu0 %vm1597_vm0, %v1543_v4 }
 0x15b   : > { %461 = vperm.xlu1 %5636, %v258_v12   ;;  %v958_v61 = vmul.f32 %v6274_v35, %v760_v2 }
 0x15d   : > { %v1022_v47 = vadd.f32 %v958_v61, %v633_v44 }
 0x15e   : > { %v764_v52 = vpop.permute.xlu1 %763 }
 0x15f   : > { %v959_v56 = vmul.f32 %v6274_v35, %v764_v52  ;;  %5637 = vset.pattern.permute.xlu1 %v8016_v58  ;;  %v264_v52 = vld [vmem:[%s5905_s5 + $0x140] sm:$0xff] }
 0x160   : > { %815 = vperm.xlu1 %5637, %v258_v12  }
 0x161   : > { %v1023_v21 = vadd.f32 %v959_v56, %v634_v42 }
 0x163   : > { %v1412_v25 = vadd.f32 %v1348_v7, %v1023_v21  ;;  %v1149_v36 = vpop.permute.xlu1 %1148  ;;  %v8025_v7 = vld [vmem:[#allocation5_spill] sm:$0xff] }
 0x164   : > { %v1347_v30 = vmul.f32 %v6279_v57, %v1149_v36  ;;  %819 = vperm.xlu1 %5637, %v5998_v24   ;;  %v1161_v24 = vpop.permute.xlu0 %1160  ;;  %v640_v61 = vmul.f32 %v6264_v33, %v8025_v7  ;;  %v5730_v7 = vld [vmem:[%s5905_s5 + $0x168] sm:$0xff] }
 0x165   : > { %v1481_v39 = vadd.f32 %v6294_v19, %v1412_v25  ;;  %v1350_v18 = vmul.f32 %v6279_v57, %v1161_v24 }
 0x166   : > { %v1411_v9 = vadd.f32 %v1347_v30, %v1022_v47 }
 0x167   : > { %v1545_v50 = vmax.f32 %v1481_v39, 0.0 }
 0x168   : > { %v1480_v20 = vadd.f32 %v6294_v19, %v1411_v9  ;;  %5638 = vset.pattern.permute.xlu1 %v8011_v59  ;;  %v402_v62 = vpop.permute.xlu1 %401 }
 0x169   : > { %1204 = vperm.xlu1 %5638, %v258_v12   ;;  %v635_v0 = vmul.f32 %v6264_v33, %v402_v62 }
 0x16a   : > { %v1544_v28 = vmax.f32 %v1480_v20, 0.0 }
 0x16c   : > { %5286 = vmatprep.mubr.msk.f32.mxu0 %vm1597_vm0, %v1544_v28  ;;  %v5728_v28 = vld [vmem:[%s5905_s5 + $0x148] sm:$0xff] }
 0x16d   : > { %5639 = vset.pattern.permute.xlu1 %v8013_v13  ;;  %v768_v8 = vpop.permute.xlu1 %767  ;;  %5287 = vmatmul.mubr.msk.f32.gmra.mrb[20].mxu0 %vm1597_vm0, %v1545_v50 }
 0x16e   : > { %471 = vperm.xlu1 %5639, %v260_v60   ;;  %v960_v49 = vmul.f32 %v6274_v35, %v768_v8 }
 0x170   : > { %v1024_v54 = vadd.f32 %v960_v49, %v635_v0 }
 0x171   : > { %v772_v29 = vpop.permute.xlu1 %771 }
 0x172   : > { %v961_v11 = vmul.f32 %v6274_v35, %v772_v29  ;;  %5640 = vset.pattern.permute.xlu1 %v8016_v58 }
 0x173   : > { %823 = vperm.xlu1 %5640, %v260_v60  }
 0x174   : > { %v1025_v51 = vadd.f32 %v961_v11, %v636_v43  ;;  %v266_v11 = vld [vmem:[%s5905_s5 + $0x150] sm:$0xff] }
 0x176   : > { %v1414_v5 = vadd.f32 %v1350_v18, %v1025_v51  ;;  %v1157_v45 = vpop.permute.xlu1 %1156  ;;  %v8026_v51 = vld [vmem:[#allocation6_spill] sm:$0xff] }
 0x177   : > { %v1349_v31 = vmul.f32 %v6279_v57, %v1157_v45  ;;  %827 = vperm.xlu1 %5640, %v6004_v26   ;;  %v1169_v26 = vpop.permute.xlu0 %1168  ;;  %v642_v0 = vmul.f32 %v6264_v33, %v8026_v51  ;;  %v5731_v51 = vld [vmem:[%s5905_s5 + $0x178] sm:$0xff] }
 0x178   : > { %v1483_v6 = vadd.f32 %v6294_v19, %v1414_v5  ;;  %v1352_v15 = vmul.f32 %v6279_v57, %v1169_v26 }
 0x179   : > { %v1413_v10 = vadd.f32 %v1349_v31, %v1024_v54 }
 0x17a   : > { %v1547_v53 = vmax.f32 %v1483_v6, 0.0 }
 0x17b   : > { %v1482_v1 = vadd.f32 %v6294_v19, %v1413_v10  ;;  %5641 = vset.pattern.permute.xlu1 %v8011_v59  ;;  %v412_v41 = vpop.permute.xlu1 %411 }
 0x17c   : > { %1212 = vperm.xlu1 %5641, %v260_v60   ;;  %v637_v17 = vmul.f32 %v6264_v33, %v412_v41 }
 0x17d   : > { %v1546_v14 = vmax.f32 %v1482_v1, 0.0 }
 0x17f   : > { %5289 = vmatprep.mubr.msk.f32.mxu0 %vm1597_vm0, %v1546_v14 }
 0x180   : > { %5642 = vset.pattern.permute.xlu1 %v8013_v13  ;;  %v776_v40 = vpop.permute.xlu1 %775  ;;  %5290 = vmatmul.mubr.msk.f32.gmra.mrb[22].mxu0 %vm1597_vm0, %v1547_v53 }
 0x181   : > { %481 = vperm.xlu1 %5642, %v262_v34   ;;  %v962_v38 = vmul.f32 %v6274_v35, %v776_v40 }
 0x183   : > { %v1026_v3 = vadd.f32 %v962_v38, %v637_v17  ;;  %v268_v38 = vld [vmem:[%s5905_s5 + $0x160] sm:$0xff]  ;;  %v5818_v17 = vmov 0.0  }
 0x184   : > { %v780_v32 = vpop.permute.xlu1 %779  ;;  %4541 = vst [vmem:[%s6553_s9 + $0x10] sm:$0xff] %v5818_v17  ;;  %4539 = vst [vmem:[%s6553_s9] sm:$0xff] %v5818_v17 }
 0x185   : > { %v963_v63 = vmul.f32 %v6274_v35, %v780_v32  ;;  %5643 = vset.pattern.permute.xlu1 %v8016_v58  ;;  %4540 = vst [vmem:[%s6553_s9 + $0x8] sm:$0xff] %v5818_v17  ;;  %4542 = vst [vmem:[%s6553_s9 + $0x18] sm:$0xff] %v5818_v17 }
 0x186   : > { %831 = vperm.xlu1 %5643, %v262_v34   ;;  %4543 = vst [vmem:[%s6553_s9 + $0x20] sm:$0xff] %v5818_v17  ;;  %4544 = vst [vmem:[%s6553_s9 + $0x28] sm:$0xff] %v5818_v17 }
 0x187   : > { %v1027_v55 = vadd.f32 %v963_v63, %v638_v46  ;;  %4545 = vst [vmem:[%s6553_s9 + $0x30] sm:$0xff] %v5818_v17  ;;  %4546 = vst [vmem:[%s6553_s9 + $0x38] sm:$0xff] %v5818_v17 }
 0x188   : > { %4547 = vst [vmem:[%s6553_s9 + $0x40] sm:$0xff] %v5818_v17  ;;  %4548 = vst [vmem:[%s6553_s9 + $0x48] sm:$0xff] %v5818_v17 }
 0x189   : > { %v1416_v48 = vadd.f32 %v1352_v15, %v1027_v55  ;;  %v1165_v16 = vpop.permute.xlu1 %1164  ;;  %4549 = vst [vmem:[%s6553_s9 + $0x50] sm:$0xff] %v5818_v17  ;;  %4550 = vst [vmem:[%s6553_s9 + $0x58] sm:$0xff] %v5818_v17 }
 0x18a   : > { %v1351_v22 = vmul.f32 %v6279_v57, %v1165_v16  ;;  %835 = vperm.xlu1 %5643, %v6009_v27   ;;  %v1177_v27 = vpop.permute.xlu0 %1176  ;;  %4551 = vst [vmem:[%s6553_s9 + $0x60] sm:$0xff] %v5818_v17  ;;  %4552 = vst [vmem:[%s6553_s9 + $0x68] sm:$0xff] %v5818_v17  ;;  %v8027_v16 = vld [vmem:[#allocation7_spill] sm:$0xff] }
 0x18b   : > { %v1485_v4 = vadd.f32 %v6294_v19, %v1416_v48  ;;  %v1354_v25 = vmul.f32 %v6279_v57, %v1177_v27  ;;  %4553 = vst [vmem:[%s6553_s9 + $0x70] sm:$0xff] %v5818_v17  ;;  %4554 = vst [vmem:[%s6553_s9 + $0x78] sm:$0xff] %v5818_v17 }
 0x18c   : > { %v1415_v37 = vadd.f32 %v1351_v22, %v1026_v3  ;;  %v644_v3 = vmul.f32 %v6264_v33, %v8027_v16 }
 0x18d   : > { %v1549_v42 = vmax.f32 %v1485_v4, 0.0 }
 0x18e   : > { %v1484_v12 = vadd.f32 %v6294_v19, %v1415_v37  ;;  %5644 = vset.pattern.permute.xlu1 %v8011_v59  ;;  %v422_v2 = vpop.permute.xlu1 %421  ;;  %v1185_v49 = vpop.permute.xlu0 %1184 }
 0x18f   : > { %1220 = vperm.xlu1 %5644, %v262_v34   ;;  %v639_v30 = vmul.f32 %v6264_v33, %v422_v2  ;;  %v1356_v54 = vmul.f32 %v6279_v57, %v1185_v49  ;;  %v5729_v34 = vld [vmem:[%s5905_s5 + $0x158] sm:$0xff] }
 0x190   : > { %v1548_v23 = vmax.f32 %v1484_v12, 0.0 }
 0x192   : > { %5292 = vmatprep.mubr.msk.f32.mxu0 %vm1597_vm0, %v1548_v23  ;;  %v1193_v48 = vpop.permute.xlu0 %1192 }
 0x193   : > { %5645 = vset.pattern.permute.xlu1 %v8013_v13  ;;  %v784_v56 = vpop.permute.xlu1 %783  ;;  %5293 = vmatmul.mubr.msk.f32.gmra.mrb[24].mxu0 %vm1597_vm0, %v1549_v42  ;;  %v1358_v4 = vmul.f32 %v6279_v57, %v1193_v48  ;;  %v5732_v48 = vld [vmem:[%s5905_s5 + $0x188] sm:$0xff] }
 0x194   : > { %491 = vperm.xlu1 %5645, %v264_v52   ;;  %v964_v36 = vmul.f32 %v6274_v35, %v784_v56 }
 0x196   : > { %v1028_v20 = vadd.f32 %v964_v36, %v639_v30  ;;  %v270_v30 = vld [vmem:[%s5905_s5 + $0x170] sm:$0xff] }
 0x197   : > { %v788_v21 = vpop.permute.xlu1 %787 }
 0x198   : > { %v965_v44 = vmul.f32 %v6274_v35, %v788_v21  ;;  %5646 = vset.pattern.permute.xlu1 %v8016_v58 }
 0x199   : > { %839 = vperm.xlu1 %5646, %v264_v52  }
 0x19a   : > { %v1029_v47 = vadd.f32 %v965_v44, %v640_v61 }
 0x19c   : > { %v1418_v9 = vadd.f32 %v1354_v25, %v1029_v47  ;;  %v1173_v39 = vpop.permute.xlu1 %1172 }
 0x19d   : > { %v1353_v62 = vmul.f32 %v6279_v57, %v1173_v39  ;;  %843 = vperm.xlu1 %5646, %v5728_v28   ;;  %v1201_v39 = vpop.permute.xlu0 %1200 }
 0x19e   : > { %v1487_v60 = vadd.f32 %v6294_v19, %v1418_v9 }
 0x19f   : > { %v1417_v50 = vadd.f32 %v1353_v62, %v1028_v20  ;;  %v8028_v20 = vld [vmem:[#allocation8_spill] sm:$0xff] }
 0x1a0   : > { %v1551_v29 = vmax.f32 %v1487_v60, 0.0  ;;  %v646_v62 = vmul.f32 %v6264_v33, %v8028_v20  ;;  %v1360_v60 = vmul.f32 %v6279_v57, %v1201_v39  ;;  %v5733_v39 = vld [vmem:[%s5905_s5 + $0x198] sm:$0xff] }
 0x1a1   : > { %v1486_v8 = vadd.f32 %v6294_v19, %v1417_v50  ;;  %5647 = vset.pattern.permute.xlu1 %v8011_v59  ;;  %v432_v24 = vpop.permute.xlu1 %431 }
 0x1a2   : > { %1228 = vperm.xlu1 %5647, %v264_v52   ;;  %v641_v6 = vmul.f32 %v6264_v33, %v432_v24 }
 0x1a3   : > { %v1550_v43 = vmax.f32 %v1486_v8, 0.0 }
 0x1a5   : > { %5295 = vmatprep.mubr.msk.f32.mxu0 %vm1597_vm0, %v1550_v43 }
 0x1a6   : > { %5648 = vset.pattern.permute.xlu1 %v8013_v13  ;;  %v792_v18 = vpop.permute.xlu1 %791  ;;  %5296 = vmatmul.mubr.msk.f32.gmra.mrb[26].mxu0 %vm1597_vm0, %v1551_v29 }
 0x1a7   : > { %501 = vperm.xlu1 %5648, %v266_v11   ;;  %v966_v31 = vmul.f32 %v6274_v35, %v792_v18 }
 0x1a9   : > { %v1030_v14 = vadd.f32 %v966_v31, %v641_v6  ;;  %v272_v6 = vld [vmem:[%s5905_s5 + $0x180] sm:$0xff] }
 0x1aa   : > { %v796_v5 = vpop.permute.xlu1 %795 }
 0x1ab   : > { %v967_v45 = vmul.f32 %v6274_v35, %v796_v5  ;;  %5649 = vset.pattern.permute.xlu1 %v8016_v58 }
 0x1ac   : > { %847 = vperm.xlu1 %5649, %v266_v11  }
 0x1ad   : > { %v1031_v10 = vadd.f32 %v967_v45, %v642_v0 }
 0x1af   : > { %v1420_v1 = vadd.f32 %v1356_v54, %v1031_v10  ;;  %v1181_v41 = vpop.permute.xlu1 %1180 }
 0x1b0   : > { %v1355_v53 = vmul.f32 %v6279_v57, %v1181_v41  ;;  %851 = vperm.xlu1 %5649, %v5729_v34   ;;  %v1209_v41 = vpop.permute.xlu0 %1208 }
 0x1b1   : > { %v1489_v26 = vadd.f32 %v6294_v19, %v1420_v1 }
 0x1b2   : > { %v1419_v40 = vadd.f32 %v1355_v53, %v1030_v14  ;;  %v8029_v14 = vld [vmem:[#allocation9_spill] sm:$0xff] }
 0x1b3   : > { %v1553_v15 = vmax.f32 %v1489_v26, 0.0  ;;  %v648_v53 = vmul.f32 %v6264_v33, %v8029_v14  ;;  %v1362_v26 = vmul.f32 %v6279_v57, %v1209_v41  ;;  %v6664_v14 = vld [vmem:[%s7989_s2 + $0x2] ss:$0 sm:$0xff] }
 0x1b4   : > { %v1488_v46 = vadd.f32 %v6294_v19, %v1419_v40  ;;  %5650 = vset.pattern.permute.xlu1 %v8011_v59  ;;  %v442_v32 = vpop.permute.xlu1 %441 }
 0x1b5   : > { %1236 = vperm.xlu1 %5650, %v266_v11   ;;  %v643_v23 = vmul.f32 %v6264_v33, %v442_v32 }
 0x1b6   : > { %v1552_v63 = vmax.f32 %v1488_v46, 0.0 }
 0x1b8   : > { %5298 = vmatprep.mubr.msk.f32.mxu0 %vm1597_vm0, %v1552_v63 }
 0x1b9   : > { %5651 = vset.pattern.permute.xlu1 %v8013_v13  ;;  %v800_v55 = vpop.permute.xlu1 %799  ;;  %5299 = vmatmul.mubr.msk.f32.gmra.mrb[28].mxu0 %vm1597_vm0, %v1553_v15 }
 0x1ba   : > { %511 = vperm.xlu1 %5651, %v268_v38   ;;  %v968_v12 = vmul.f32 %v6274_v35, %v800_v55 }
 0x1bc   : > { %v1032_v56 = vadd.f32 %v968_v12, %v643_v23 }
 0x1bd   : > { %v804_v22 = vpop.permute.xlu1 %803 }
 0x1be   : > { %v969_v37 = vmul.f32 %v6274_v35, %v804_v22  ;;  %5652 = vset.pattern.permute.xlu1 %v8016_v58 }
 0x1bf   : > { %855 = vperm.xlu1 %5652, %v268_v38  }
 0x1c0   : > { %v1033_v2 = vadd.f32 %v969_v37, %v644_v3 }
 0x1c2   : > { %v1422_v42 = vadd.f32 %v1358_v4, %v1033_v2  ;;  %v1189_v52 = vpop.permute.xlu1 %1188  ;;  %v274_v2 = vld [vmem:[%s5905_s5 + $0x190] sm:$0xff] }
 0x1c3   : > { %v1357_v27 = vmul.f32 %v6279_v57, %v1189_v52  ;;  %859 = vperm.xlu1 %5652, %v5730_v7  }
 0x1c4   : > { %v1491_v21 = vadd.f32 %v6294_v19, %v1422_v42  ;;  %v1217_v42 = vpop.permute.xlu0 %1216 }
 0x1c5   : > { %v1421_v61 = vadd.f32 %v1357_v27, %v1032_v56  ;;  %v8030_v56 = vld [vmem:[#allocation10_spill] sm:$0xff] }
 0x1c6   : > { %v1555_v47 = vmax.f32 %v1491_v21, 0.0  ;;  %v650_v27 = vmul.f32 %v6264_v33, %v8030_v56 }
 0x1c7   : > { %v1490_v44 = vadd.f32 %v6294_v19, %v1421_v61  ;;  %5653 = vset.pattern.permute.xlu1 %v8011_v59  ;;  %v452_v25 = vpop.permute.xlu1 %451  ;;  %v1364_v61 = vmul.f32 %v6279_v57, %v1217_v42  ;;  %v5737_v42 = vld [vmem:[%s5905_s5 + $0x1a8] sm:$0xff] }
 0x1c8   : > { %1244 = vperm.xlu1 %5653, %v268_v38   ;;  %v645_v43 = vmul.f32 %v6264_v33, %v452_v25 }
 0x1c9   : > { %v1554_v36 = vmax.f32 %v1490_v44, 0.0 }
 0x1cb   : > { %5301 = vmatprep.mubr.msk.f32.mxu0 %vm1597_vm0, %v1554_v36 }
 0x1cc   : > { %5654 = vset.pattern.permute.xlu1 %v8013_v13  ;;  %v808_v9 = vpop.permute.xlu1 %807  ;;  %5302 = vmatmul.mubr.msk.f32.gmra.mrb[30].mxu0 %vm1597_vm0, %v1555_v47 }
 0x1cd   : > { %521 = vperm.xlu1 %5654, %v270_v30   ;;  %v970_v8 = vmul.f32 %v6274_v35, %v808_v9 }
 0x1cf   : > { %v1034_v18 = vadd.f32 %v970_v8, %v645_v43  ;;  %v6637_v8 = vld [vmem:[%s5905_s5 + $0x1a0] sm:$0xff] }
 0x1d0   : > { %v812_v28 = vpop.permute.xlu1 %811 }
 0x1d1   : > { %v971_v50 = vmul.f32 %v6274_v35, %v812_v28  ;;  %5655 = vset.pattern.permute.xlu1 %v8016_v58 }
 0x1d2   : > { %863 = vperm.xlu1 %5655, %v270_v30  }
 0x1d3   : > { %v1035_v24 = vadd.f32 %v971_v50, %v646_v62 }
 0x1d5   : > { %v1424_v29 = vadd.f32 %v1360_v60, %v1035_v24  ;;  %v1197_v11 = vpop.permute.xlu1 %1196 }
 0x1d6   : > { %v1359_v49 = vmul.f32 %v6279_v57, %v1197_v11  ;;  %867 = vperm.xlu1 %5655, %v5731_v51   ;;  %v1225_v11 = vpop.permute.xlu0 %1224  ;;  %v8031_v51 = vld [vmem:[#allocation11_spill] sm:$0xff] }
 0x1d7   : > { %v1493_v5 = vadd.f32 %v6294_v19, %v1424_v29 }
 0x1d8   : > { %v1423_v0 = vadd.f32 %v1359_v49, %v1034_v18  ;;  %v6648_v49 = vld [vmem:[%s7989_s2] ss:$0 sm:$0xff] }
 0x1d9   : > { %v1557_v10 = vmax.f32 %v1493_v5, 0.0 }
 0x1da   : > { %v1492_v45 = vadd.f32 %v6294_v19, %v1423_v0  ;;  %5656 = vset.pattern.permute.xlu1 %v8011_v59  ;;  %v462_v54 = vpop.permute.xlu1 %461  ;;  %v652_v0 = vmul.f32 %v6648_v49, %v8031_v51 }
 0x1db   : > { %1252 = vperm.xlu1 %5656, %v270_v30   ;;  %v647_v63 = vmul.f32 %v6264_v33, %v462_v54 }
 0x1dc   : > { %v1556_v31 = vmax.f32 %v1492_v45, 0.0 }
 0x1de   : > { %5304 = vmatprep.mubr.msk.f32.mxu0 %vm1597_vm0, %v1556_v31 }
 0x1df   : > { %5657 = vset.pattern.permute.xlu1 %v8013_v13  ;;  %v816_v1 = vpop.permute.xlu1 %815  ;;  %5305 = vmatmul.mubr.msk.f32.gmra.mrb[32].mxu0 %vm1597_vm0, %v1557_v10  ;;  %v6656_v10 = vld [vmem:[%s7989_s2 + $0x1] ss:$0 sm:$0xff] }
 0x1e0   : > { %531 = vperm.xlu1 %5657, %v272_v6   ;;  %v972_v46 = vmul.f32 %v6274_v35, %v816_v1 }
 0x1e2   : > { %v1036_v55 = vadd.f32 %v972_v46, %v647_v63 }
 0x1e3   : > { %v820_v34 = vpop.permute.xlu1 %819 }
 0x1e4   : > { %v973_v40 = vmul.f32 %v6274_v35, %v820_v34  ;;  %5658 = vset.pattern.permute.xlu1 %v8016_v58 }
 0x1e5   : > { %871 = vperm.xlu1 %5658, %v272_v6  }
 0x1e6   : > { %v1037_v32 = vadd.f32 %v973_v40, %v648_v53  ;;  %v1366_v53 = vmul.f32 %v6664_v14, %v1225_v11 }
 0x1e8   : > { %v1426_v15 = vadd.f32 %v1362_v26, %v1037_v32  ;;  %v1205_v38 = vpop.permute.xlu1 %1204 }
 0x1e9   : > { %v1361_v17 = vmul.f32 %v6279_v57, %v1205_v38  ;;  %875 = vperm.xlu1 %5658, %v5732_v48  }
 0x1ea   : > { %v1495_v3 = vadd.f32 %v6294_v19, %v1426_v15 }
 0x1eb   : > { %v1425_v16 = vadd.f32 %v1361_v17, %v1036_v55 }
 0x1ec   : > { %v1559_v12 = vmax.f32 %v1495_v3, 0.0 }
 0x1ed   : > { %v1494_v22 = vadd.f32 %v6294_v19, %v1425_v16  ;;  %5659 = vset.pattern.permute.xlu1 %v8011_v59  ;;  %v472_v37 = vpop.permute.xlu1 %471 }
 0x1ee   : > { %1260 = vperm.xlu1 %5659, %v272_v6   ;;  %v649_v25 = vmul.f32 %v6264_v33, %v472_v37  ;;  %v6634_v33 = vld [vmem:[%s7990_s3 + $0x1] ss:$0 sm:$0xff] }
 0x1ef   : > { %v1558_v4 = vmax.f32 %v1494_v22, 0.0 }
 0x1f1   : > { %5307 = vmatprep.mubr.msk.f32.mxu0 %vm1597_vm0, %v1558_v4 }
 0x1f2   : > { %5660 = vset.pattern.permute.xlu1 %v8013_v13  ;;  %v824_v23 = vpop.permute.xlu1 %823  ;;  %5308 = vmatmul.mubr.msk.f32.gmra.mrb[34].mxu0 %vm1597_vm0, %v1559_v12 }
 0x1f3   : > { %541 = vperm.xlu1 %5660, %v274_v2   ;;  %v974_v21 = vmul.f32 %v6274_v35, %v824_v23 }
 0x1f5   : > { %v1038_v30 = vadd.f32 %v974_v21, %v649_v25 }
 0x1f6   : > { %v828_v52 = vpop.permute.xlu1 %827 }
 0x1f7   : > { %v975_v7 = vmul.f32 %v6274_v35, %v828_v52  ;;  %5661 = vset.pattern.permute.xlu1 %v8016_v58 }
 0x1f8   : > { %879 = vperm.xlu1 %5661, %v274_v2  }
 0x1f9   : > { %v1039_v44 = vadd.f32 %v975_v7, %v650_v27 }
 0x1fb   : > { %v1428_v36 = vadd.f32 %v1364_v61, %v1039_v44  ;;  %v1213_v47 = vpop.permute.xlu1 %1212 }
 0x1fc   : > { %v1363_v9 = vmul.f32 %v6279_v57, %v1213_v47  ;;  %883 = vperm.xlu1 %5661, %v5733_v39  }
 0x1fd   : > { %v1497_v62 = vadd.f32 %v6294_v19, %v1428_v36  ;;  %v6681_v36 = vld [vmem:[%s7990_s3] ss:$0 sm:$0xff] }
 0x1fe   : > { %v1427_v20 = vadd.f32 %v1363_v9, %v1038_v30 }
 0x1ff   : > { %v1561_v60 = vmax.f32 %v1497_v62, 0.0 }
 0x200   : > { %v1496_v28 = vadd.f32 %v6294_v19, %v1427_v20  ;;  %5662 = vset.pattern.permute.xlu1 %v8011_v59  ;;  %v482_v35 = vpop.permute.xlu1 %481 }
 0x201   : > { %1268 = vperm.xlu1 %5662, %v274_v2   ;;  %v651_v15 = vmul.f32 %v6648_v49, %v482_v35 }
 0x202   : > { %v1560_v50 = vmax.f32 %v1496_v28, 0.0 }
 0x204   : > { %5310 = vmatprep.mubr.msk.f32.mxu0 %vm1597_vm0, %v1560_v50  ;;  %v8032_v50 = vld [vmem:[#allocation12_spill] sm:$0xff] }
 0x205   : > { %5663 = vset.pattern.permute.xlu1 %v8013_v13  ;;  %v832_v57 = vpop.permute.xlu1 %831  ;;  %v5258_v24 = vpop.f32.mrb[0].mxu0  ;;  %5311 = vmatmul.mubr.msk.f32.gmra.mrb[36].mxu0 %vm1597_vm0, %v1561_v60  ;;  %v6692_v60 = vmul.f32 %v6648_v49, %v8032_v50 }
 0x206   : > { %v1862_v19 = vadd.f32 %v5258_v24, %v6634_v33  ;;  %551 = vperm.xlu1 %5663, %v6637_v8   ;;  %v1856_v43 = vpop.f32.mrb[1].mxu0  ;;  %v976_v34 = vmul.f32 %v6656_v10, %v832_v57 }
 0x207   : > { %v1857_v29 = vadd.f32 %v6634_v33, %v1856_v43 }
 0x208   : > { %v2176_v18 = vmax.f32 %v1862_v19, 0.0  ;;  %v1040_v4 = vadd.f32 %v976_v34, %v651_v15 }
 0x209   : > { %v2175_v5 = vmax.f32 %v1857_v29, 0.0  ;;  %v836_v45 = vpop.permute.xlu1 %835  ;;  %v5261_v54 = vpop.f32.mrb[2].mxu0 }
 0x20a   : > { %v2240_v31 = vsel %vm1597_vm0, %v2176_v18, -inf  ;;  %v977_v6 = vmul.f32 %v6656_v10, %v836_v45  ;;  %v1872_v1 = vadd.f32 %v5261_v54, %v6634_v33  ;;  %5664 = vset.pattern.permute.xlu1 %v8016_v58  ;;  %v1866_v41 = vpop.f32.mrb[3].mxu0 }
 0x20b   : > { %v2239_v40 = vsel %vm1597_vm0, %v2175_v5, -inf  ;;  %v1867_v26 = vadd.f32 %v6634_v33, %v1866_v41  ;;  %887 = vperm.xlu1 %5664, %v6637_v8  }
 0x20c   : > { %v2241_v46 = vmax.f32 %v2239_v40, %v2240_v31  ;;  %v1041_v32 = vadd.f32 %v977_v6, %v652_v0  ;;  %v2178_v63 = vmax.f32 %v1872_v1, 0.0  ;;  %v6697_v31 = vld [vmem:[%s5905_s5 + $0x1b0] sm:$0xff]  ;;  %v1233_v6 = vpop.permute.xlu0 %1232 }
 0x20d   : > { %v2177_v38 = vmax.f32 %v1867_v26, 0.0  ;;  %v5264_v55 = vpop.f32.mrb[4].mxu0 }
 0x20e   : > { %v2242_v17 = vrot.slane %v2241_v46, 4  ;;  %v2249_v48 = vsel %vm1597_vm0, %v2178_v63, -inf  ;;  %v1430_v16 = vadd.f32 %v1366_v53, %v1041_v32  ;;  %v1882_v3 = vadd.f32 %v5264_v55, %v6634_v33  ;;  %v1221_v22 = vpop.permute.xlu1 %1220  ;;  %v1876_v37 = vpop.f32.mrb[5].mxu0 }
 0x20f   : > { %v2248_v12 = vsel %vm1597_vm0, %v2177_v38, -inf  ;;  %v1365_v2 = vmul.f32 %v6664_v14, %v1221_v22  ;;  %v1877_v23 = vadd.f32 %v6634_v33, %v1876_v37  ;;  %891 = vperm.xlu1 %5664, %v5737_v42   ;;  %v1368_v55 = vmul.f32 %v6664_v14, %v1233_v6 }
 0x210   : > { %v2243_v52 = vmax.f32 %v2241_v46, %v2242_v17  ;;  %v2250_v56 = vmax.f32 %v2248_v12, %v2249_v48  ;;  %v2180_v27 = vmax.f32 %v1882_v3, 0.0  ;;  %v1499_v47 = vadd.f32 %v6681_v36, %v1430_v16 }
 0x211   : > { %v1429_v7 = vadd.f32 %v1365_v2, %v1040_v4  ;;  %v2179_v61 = vmax.f32 %v1877_v23, 0.0  ;;  %v5267_v21 = vpop.f32.mrb[6].mxu0 }
 0x212   : > { %v2244_v44 = vrot.slane %v2243_v52, 2  ;;  %v2251_v25 = vrot.slane %v2250_v56, 4  ;;  %v2258_v30 = vsel %vm1597_vm0, %v2180_v27, -inf  ;;  %v1886_v9 = vpop.f32.mrb[7].mxu0  ;;  %v1892_v62 = vadd.f32 %v5267_v21, %v6634_v33 }
 0x213   : > { %v1498_v39 = vadd.f32 %v6681_v36, %v1429_v7  ;;  %v2257_v20 = vsel %vm1597_vm0, %v2179_v61, -inf  ;;  %v1887_v28 = vadd.f32 %v6634_v33, %v1886_v9  ;;  %5665 = vset.pattern.permute.xlu1 %v8011_v59  ;;  %v492_v35 = vpop.permute.xlu1 %491  ;;  %v1563_v0 = vmax.f32 %v1499_v47, 0.0 }
 0x214   : > { %v2245_v57 = vmax.f32 %v2243_v52, %v2244_v44  ;;  %v2252_v24 = vmax.f32 %v2250_v56, %v2251_v25  ;;  %v2259_v19 = vmax.f32 %v2257_v20, %v2258_v30  ;;  %1276 = vperm.xlu1 %5665, %v6637_v8   ;;  %v2182_v29 = vmax.f32 %v1892_v62, 0.0 }
 0x215   : > { %v1562_v43 = vmax.f32 %v1498_v39, 0.0  ;;  %v2181_v11 = vmax.f32 %v1887_v28, 0.0  ;;  %v5270_v18 = vpop.f32.mrb[8].mxu0  ;;  %v653_v32 = vmul.f32 %v6648_v49, %v492_v35 }
 0x216   : > { %v2253_v51 = vrot.slane %v2252_v24, 2  ;;  %v2260_v5 = vrot.slane %v2259_v19, 4  ;;  %v1902_v45 = vadd.f32 %v5270_v18, %v6634_v33  ;;  %v1896_v54 = vpop.f32.mrb[9].mxu0  ;;  %v2246_v1 = vrot.slane %v2245_v57, 1 }
 0x217   : > { %v2267_v41 = vsel %vm1597_vm0, %v2182_v29, -inf  ;;  %v2266_v53 = vsel %vm1597_vm0, %v2181_v11, -inf  ;;  %v1897_v8 = vadd.f32 %v6634_v33, %v1896_v54  ;;  %5313 = vmatprep.mubr.msk.f32.mxu0 %vm1597_vm0, %v1562_v43 }
 0x218   : > { %v2254_v34 = vmax.f32 %v2252_v24, %v2253_v51  ;;  %v2261_v40 = vmax.f32 %v2259_v19, %v2260_v5  ;;  %v2268_v26 = vmax.f32 %v2266_v53, %v2267_v41  ;;  %5666 = vset.pattern.permute.xlu1 %v8013_v13  ;;  %v840_v46 = vpop.permute.xlu1 %839  ;;  %v2184_v63 = vmax.f32 %v1902_v45, 0.0  ;;  %5314 = vmatmul.mubr.msk.f32.gmra.mrb[38].mxu0 %vm1597_vm0, %v1563_v0 }
 0x219   : > { %v2183_v15 = vmax.f32 %v1897_v8, 0.0  ;;  %561 = vperm.xlu1 %5666, %v6697_v31   ;;  %v5273_v38 = vpop.f32.mrb[10].mxu0  ;;  %v2247_v37 = vmax.f32 %v2245_v57, %v2246_v1  ;;  %v978_v7 = vmul.f32 %v6656_v10, %v840_v46  ;;  %v5739_v1 = vld [vmem:[%s5905_s5 + $0x1b8] sm:$0xff] }
 0x21a   : > { %v2255_v17 = vrot.slane %v2254_v34, 1  ;;  %v2262_v48 = vrot.slane %v2261_v40, 2  ;;  %v2269_v16 = vrot.slane %v2268_v26, 4  ;;  %v1912_v3 = vadd.f32 %v5273_v38, %v6634_v33  ;;  %v1906_v22 = vpop.f32.mrb[11].mxu0 }
 0x21b   : > { %v2276_v4 = vsel %vm1597_vm0, %v2184_v63, -inf  ;;  %v2275_v12 = vsel %vm1597_vm0, %v2183_v15, -inf  ;;  %v1907_v2 = vadd.f32 %v6634_v33, %v1906_v22  ;;  %v1042_v29 = vadd.f32 %v978_v7, %v653_v32 }
 0x21c   : > { %v2256_v23 = vmax.f32 %v2254_v34, %v2255_v17  ;;  %v2263_v42 = vmax.f32 %v2261_v40, %v2262_v48  ;;  %v2270_v52 = vmax.f32 %v2268_v26, %v2269_v16  ;;  %v2277_v56 = vmax.f32 %v2275_v12, %v2276_v4  ;;  %v844_v27 = vpop.permute.xlu1 %843 }
 0x21d   : > { %v2186_v61 = vmax.f32 %v1912_v3, 0.0  ;;  %v2185_v21 = vmax.f32 %v1907_v2, 0.0  ;;  %v979_v44 = vmul.f32 %v6656_v10, %v844_v27  ;;  %5667 = vset.pattern.permute.xlu1 %v8016_v58  ;;  %v5276_v25 = vpop.f32.mrb[12].mxu0 }
 0x21e   : > { %v2569_v47 = vsel %vm2568_vm1, %v2256_v23, %v2247_v37  ;;  %v2264_v30 = vrot.slane %v2263_v42, 1  ;;  %v2271_v9 = vrot.slane %v2270_v52, 2  ;;  %v2278_v39 = vrot.slane %v2277_v56, 4  ;;  %895 = vperm.xlu1 %5667, %v6697_v31   ;;  %v1916_v20 = vpop.f32.mrb[13].mxu0 }
 0x21f   : > { %v2285_v62 = vsel %vm1597_vm0, %v2186_v61, -inf  ;;  %v2284_v28 = vsel %vm1597_vm0, %v2185_v21, -inf  ;;  %v1043_v35 = vadd.f32 %v979_v44, %v6692_v60  ;;  %v1922_v50 = vadd.f32 %v5276_v25, %v6634_v33 }
 0x220   : > { %v2265_v57 = vmax.f32 %v2263_v42, %v2264_v30  ;;  %v2272_v24 = vmax.f32 %v2270_v52, %v2271_v9  ;;  %v2279_v19 = vmax.f32 %v2277_v56, %v2278_v39  ;;  %v2286_v43 = vmax.f32 %v2284_v28, %v2285_v62 }
 0x221   : > { %v2188_v11 = vmax.f32 %v1922_v50, 0.0  ;;  %v1917_v18 = vadd.f32 %v6634_v33, %v1916_v20  ;;  %v1432_v51 = vadd.f32 %v1368_v55, %v1043_v35  ;;  %v1229_v0 = vpop.permute.xlu1 %1228  ;;  %v5279_v5 = vpop.f32.mrb[14].mxu0 }
 0x222   : > { %v2571_v45 = vsel %vm2570_vm2, %v2265_v57, %v2569_v47  ;;  %v2273_v54 = vrot.slane %v2272_v24, 1  ;;  %v2280_v6 = vrot.slane %v2279_v19, 2  ;;  %v2287_v60 = vrot.slane %v2286_v43, 4  ;;  %899 = vperm.xlu1 %5667, %v5739_v1   ;;  %v1926_v41 = vpop.f32.mrb[15].mxu0  ;;  %v6738_v47 = vld [vmem:[%s5905_s5 + $0x1c0] sm:$0xff] }
 0x223   : > { %v2294_v53 = vsel %vm1597_vm0, %v2188_v11, -inf  ;;  %v2187_v8 = vmax.f32 %v1917_v18, 0.0  ;;  %v1501_v34 = vadd.f32 %v6681_v36, %v1432_v51  ;;  %v1367_v40 = vmul.f32 %v6664_v14, %v1229_v0  ;;  %v8033_v11 = vld [vmem:[#allocation13_spill] sm:$0xff] }
 0x224   : > { %v2281_v26 = vmax.f32 %v2279_v19, %v2280_v6  ;;  %v2288_v46 = vmax.f32 %v2286_v43, %v2287_v60  ;;  %v1932_v32 = vadd.f32 %v5279_v5, %v6634_v33  ;;  %v2274_v63 = vmax.f32 %v2272_v24, %v2273_v54  ;;  %v1241_v19 = vpop.permute.xlu0 %1240 }
 0x225   : > { %v2293_v15 = vsel %vm1597_vm0, %v2187_v8, -inf  ;;  %v1431_v38 = vadd.f32 %v1367_v40, %v1042_v29  ;;  %v1927_v55 = vadd.f32 %v6634_v33, %v1926_v41  ;;  %v5282_v17 = vpop.f32.mrb[16].mxu0  ;;  %v1565_v12 = vmax.f32 %v1501_v34, 0.0 }
 0x226   : > { %v2282_v48 = vrot.slane %v2281_v26, 1  ;;  %v2289_v16 = vrot.slane %v2288_v46, 2  ;;  %v2295_v3 = vmax.f32 %v2293_v15, %v2294_v53  ;;  %v2190_v22 = vmax.f32 %v1932_v32, 0.0  ;;  %5668 = vset.pattern.permute.xlu1 %v8011_v59  ;;  %v502_v37 = vpop.permute.xlu1 %501  ;;  %v1936_v4 = vpop.f32.mrb[17].mxu0 }
 0x227   : > { %v1500_v2 = vadd.f32 %v6681_v36, %v1431_v38  ;;  %v2189_v23 = vmax.f32 %v1927_v55, 0.0  ;;  %v1942_v42 = vadd.f32 %v5282_v17, %v6634_v33  ;;  %1284 = vperm.xlu1 %5668, %v6697_v31   ;;  %v1937_v25 = vadd.f32 %v6634_v33, %v1936_v4 }
 0x228   : > { %v2283_v52 = vmax.f32 %v2281_v26, %v2282_v48  ;;  %v2290_v56 = vmax.f32 %v2288_v46, %v2289_v16  ;;  %v2296_v27 = vrot.slane %v2295_v3, 4  ;;  %v2303_v7 = vsel %vm1597_vm0, %v2190_v22, -inf }
 0x229   : > { %v1564_v61 = vmax.f32 %v1500_v2, 0.0  ;;  %v2302_v21 = vsel %vm1597_vm0, %v2189_v23, -inf  ;;  %v2192_v44 = vmax.f32 %v1942_v42, 0.0  ;;  %v2573_v20 = vsel %vm2572_vm3, %v2274_v63, %v2571_v45 }
 0x22a   : > { %v2291_v30 = vrot.slane %v2290_v56, 1  ;;  %v2297_v9 = vmax.f32 %v2295_v3, %v2296_v27  ;;  %v2304_v39 = vmax.f32 %v2302_v21, %v2303_v7  ;;  %v2191_v62 = vmax.f32 %v1937_v25, 0.0 }
 0x22b   : > { %v2312_v31 = vsel %vm1597_vm0, %v2192_v44, -inf  ;;  %5316 = vmatprep.mubr.msk.f32.mxu0 %vm1597_vm0, %v1564_v61  ;;  %5669 = vset.pattern.permute.xlu1 %v8013_v13  ;;  %v848_v28 = vpop.permute.xlu1 %847  ;;  %v2575_v35 = vsel %vm2574_vm4, %v2283_v52, %v2573_v20  ;;  %v656_v18 = vmul.f32 %v6648_v49, %v8033_v11  ;;  %v1370_v1 = vmul.f32 %v6664_v14, %v1241_v19  ;;  %v5740_v52 = vld [vmem:[%s5905_s5 + $0x1c8] sm:$0xff]  ;;  %v5741_v20 = vld [vmem:[%s5905_s5 + $0x1e0] sm:$0xff] }
 0x22c   : > { %v2292_v50 = vmax.f32 %v2290_v56, %v2291_v30  ;;  %v2298_v57 = vrot.slane %v2297_v9, 2  ;;  %v2305_v24 = vrot.slane %v2304_v39, 4  ;;  %5317 = vmatmul.mubr.msk.f32.gmra.mrb[40].mxu0 %vm1597_vm0, %v1565_v12  ;;  %571 = vperm.xlu1 %5669, %v6738_v47   ;;  %v2311_v43 = vsel %vm1597_vm0, %v2191_v62, -inf }
 0x22d   : > { %v5285_v29 = vpop.f32.mrb[18].mxu0  ;;  %v2313_v5 = vmax.f32 %v2311_v43, %v2312_v31  ;;  %v980_v26 = vmul.f32 %v6656_v10, %v848_v28  ;;  %v655_v17 = vmul.f32 %v6648_v49, %v502_v37 }
 0x22e   : > { %v2299_v51 = vmax.f32 %v2297_v9, %v2298_v57  ;;  %v2306_v0 = vmax.f32 %v2304_v39, %v2305_v24  ;;  %v1946_v45 = vpop.f32.mrb[19].mxu0  ;;  %v1952_v54 = vadd.f32 %v5285_v29, %v6634_v33  ;;  %v2577_v41 = vsel %vm2576_vm5, %v2292_v50, %v2575_v35  ;;  %v1249_v29 = vpop.permute.xlu0 %1248 }
 0x22f   : > { %v1947_v6 = vadd.f32 %v6634_v33, %v1946_v45  ;;  %v852_v60 = vpop.permute.xlu1 %851  ;;  %v2314_v34 = vrot.slane %v2313_v5, 4  ;;  %v1044_v23 = vadd.f32 %v980_v26, %v655_v17  ;;  %v8034_v45 = vld [vmem:[#allocation14_spill] sm:$0xff] }
 0x230   : > { %v2300_v53 = vrot.slane %v2299_v51, 1  ;;  %v2307_v8 = vrot.slane %v2306_v0, 2  ;;  %v981_v40 = vmul.f32 %v6656_v10, %v852_v60  ;;  %5670 = vset.pattern.permute.xlu1 %v8016_v58  ;;  %v2194_v46 = vmax.f32 %v1952_v54, 0.0 }
 0x231   : > { %v2193_v32 = vmax.f32 %v1947_v6, 0.0  ;;  %903 = vperm.xlu1 %5670, %v6738_v47   ;;  %v2315_v38 = vmax.f32 %v2313_v5, %v2314_v34  ;;  %v658_v54 = vmul.f32 %v6648_v49, %v8034_v45 }
 0x232   : > { %v2301_v63 = vmax.f32 %v2299_v51, %v2300_v53  ;;  %v2308_v15 = vmax.f32 %v2306_v0, %v2307_v8  ;;  %v1045_v55 = vadd.f32 %v981_v40, %v656_v18  ;;  %v2321_v48 = vsel %vm1597_vm0, %v2194_v46, -inf  ;;  %v5742_v53 = vld [vmem:[%s5905_s5 + $0x1e8] sm:$0xff] }
 0x233   : > { %v2320_v16 = vsel %vm1597_vm0, %v2193_v32, -inf  ;;  %v2316_v3 = vrot.slane %v2315_v38, 2 }
 0x234   : > { %v2322_v22 = vmax.f32 %v2320_v16, %v2321_v48  ;;  %v1434_v4 = vadd.f32 %v1370_v1, %v1045_v55  ;;  %v1237_v12 = vpop.permute.xlu1 %1236  ;;  %v2309_v2 = vrot.slane %v2308_v15, 1  ;;  %v2579_v56 = vsel %vm2578_vm6, %v2301_v63, %v2577_v41 }
 0x235   : > { %v1369_v42 = vmul.f32 %v6664_v14, %v1237_v12  ;;  %907 = vperm.xlu1 %5670, %v5740_v52   ;;  %v2317_v61 = vmax.f32 %v2315_v38, %v2316_v3 }
 0x236   : > { %v2323_v37 = vrot.slane %v2322_v22, 4  ;;  %v2310_v27 = vmax.f32 %v2308_v15, %v2309_v2  ;;  %v1503_v44 = vadd.f32 %v6681_v36, %v1434_v4  ;;  %v5743_v2 = vld [vmem:[%s5905_s5 + $0x1d0] sm:$0xff] }
 0x237   : > { %v1433_v7 = vadd.f32 %v1369_v42, %v1044_v23  ;;  %v2318_v62 = vrot.slane %v2317_v61, 1 }
 0x238   : > { %v2324_v21 = vmax.f32 %v2322_v22, %v2323_v37  ;;  %v6766_v25 = vsel %vm2580_vm7, %v2310_v27, %v2579_v56  ;;  %v1567_v35 = vmax.f32 %v1503_v44, 0.0 }
 0x239   : > { %v1502_v30 = vadd.f32 %v6681_v36, %v1433_v7  ;;  %5671 = vset.pattern.permute.xlu1 %v8013_v13  ;;  %v512_v9 = vpop.permute.xlu1 %511  ;;  %4858 = vst.msk [vmem:[%s6553_s9 + $0x10] sm:$0xff] %vm1597_vm0, %v6766_v25  ;;  %v2319_v24 = vmax.f32 %v2317_v61, %v2318_v62  ;;  %v1257_v7 = vpop.permute.xlu0 %1256 }
 0x23a   : > { %v2325_v39 = vrot.slane %v2324_v21, 2  ;;  %591 = vperm.xlu1 %5671, %v5741_v20   ;;  %v657_v40 = vmul.f32 %v6648_v49, %v512_v9 }
 0x23b   : > { %v1566_v31 = vmax.f32 %v1502_v30, 0.0 }
 0x23c   : > { %v2326_v28 = vmax.f32 %v2324_v21, %v2325_v39  ;;  %v8035_v39 = vld [vmem:[#allocation15_spill] sm:$0xff] }
 0x23d   : > { %5319 = vmatprep.mubr.msk.f32.mxu0 %vm1597_vm0, %v1566_v31  ;;  %v660_v31 = vmul.f32 %v6648_v49, %v8035_v39 }
 0x23e   : > { %v2327_v50 = vrot.slane %v2326_v28, 1  ;;  %5672 = vset.pattern.permute.xlu1 %v8011_v59  ;;  %v856_v57 = vpop.permute.xlu1 %855  ;;  %5320 = vmatmul.mubr.msk.f32.gmra.mrb[42].mxu0 %vm1597_vm0, %v1567_v35 }
 0x23f   : > { %1292 = vperm.xlu1 %5672, %v6738_v47   ;;  %v1372_v47 = vmul.f32 %v6664_v14, %v1249_v29  ;;  %v982_v1 = vmul.f32 %v6656_v10, %v856_v57 }
 0x240   : > { %v2328_v19 = vmax.f32 %v2326_v28, %v2327_v50  ;;  %v5288_v43 = vpop.f32.mrb[20].mxu0 }
 0x241   : > { %v1962_v11 = vadd.f32 %v5288_v43, %v6634_v33  ;;  %v1956_v18 = vpop.f32.mrb[21].mxu0  ;;  %v1046_v15 = vadd.f32 %v982_v1, %v657_v40 }
 0x242   : > { %v2582_v51 = vsel %vm2568_vm1, %v2328_v19, %v2319_v24  ;;  %v1957_v0 = vadd.f32 %v6634_v33, %v1956_v18  ;;  %v860_v5 = vpop.permute.xlu1 %859  ;;  %v5744_v19 = vld [vmem:[%s5905_s5 + $0x1d8] sm:$0xff] }
 0x243   : > { %v2196_v6 = vmax.f32 %v1962_v11, 0.0  ;;  %v983_v60 = vmul.f32 %v6656_v10, %v860_v5  ;;  %5673 = vset.pattern.permute.xlu1 %v8013_v13 }
 0x244   : > { %v2195_v41 = vmax.f32 %v1957_v0, 0.0  ;;  %596 = vperm.xlu1 %5673, %v5742_v53   ;;  %v286_v0 = vld [vmem:[%s5905_s5 + $0x1f0] sm:$0xff] }
 0x245   : > { %v2330_v8 = vsel %vm1597_vm0, %v2196_v6, -inf  ;;  %v1047_v34 = vadd.f32 %v983_v60, %v658_v54 }
 0x246   : > { %v2329_v26 = vsel %vm1597_vm0, %v2195_v41, -inf }
 0x247   : > { %v2331_v46 = vmax.f32 %v2329_v26, %v2330_v8  ;;  %v1436_v32 = vadd.f32 %v1372_v47, %v1047_v34  ;;  %v1245_v63 = vpop.permute.xlu1 %1244 }
 0x248   : > { %v1371_v38 = vmul.f32 %v6664_v14, %v1245_v63  ;;  %5674 = vset.pattern.permute.xlu1 %v8011_v59 }
 0x249   : > { %v2332_v55 = vrot.slane %v2331_v46, 4  ;;  %1296 = vperm.xlu1 %5674, %v5740_v52   ;;  %v1505_v16 = vadd.f32 %v6681_v36, %v1436_v32 }
 0x24a   : > { %v1435_v17 = vadd.f32 %v1371_v38, %v1046_v15  ;;  %v5745_v38 = vld [vmem:[%s5905_s5 + $0x1f8] sm:$0xff]  ;;  %s5820_s5 = smov [#allocation2]  }
 0x24b   : > { %v2333_v48 = vmax.f32 %v2331_v46, %v2332_v55  ;;  %v1569_v42 = vmax.f32 %v1505_v16, 0.0  ;;  %s5755_s30 = sshll.u32 %s5820_s5, 4  ;;  %s5756_s30 = int_to_ptr.vmem [resolvable:$false] %s5755_s30 }
 0x24c   : > { %v1504_v3 = vadd.f32 %v6681_v36, %v1435_v17  ;;  %v522_v22 = vpop.permute.xlu1 %521  ;;  %s5757_s6 = scalar_lea.vmem %s5756_s30, 4096  ;;  %p5758_p0 = scmp.lt.s32.totalorder %s7939_s20, %s5756_s30 }
 0x24d   : > { %v2334_v4 = vrot.slane %v2333_v48, 2  ;;  %5675 = vset.pattern.permute.xlu1 %v8016_v58  ;;  %v659_v43 = vmul.f32 %v6648_v49, %v522_v22  ;;  %v8036_v22 = vld [vmem:[#allocation16_spill] sm:$0xff]  ;;  %p5759_p1 = scmp.lt.s32.totalorder %s5757_s6, %s5751_s29 }
 0x24e   : > { %v1568_v12 = vmax.f32 %v1504_v3, 0.0  ;;  %911 = vperm.xlu1 %5675, %v5743_v2  }
 0x24f   : > { %v2335_v23 = vmax.f32 %v2333_v48, %v2334_v4  ;;  %v1265_v48 = vpop.permute.xlu0 %1264  ;;  %v662_v4 = vmul.f32 %v6648_v49, %v8036_v22  ;;  %p5760_p2 = por %p5759_p1, %p5758_p0 }
 0x250   : > { %5322 = vmatprep.mubr.msk.f32.mxu0 %vm1597_vm0, %v1568_v12  ;;  %v1376_v12 = vmul.f32 %v6664_v14, %v1265_v48 }
 0x251   : > { %v2336_v56 = vrot.slane %v2335_v23, 1  ;;  %v864_v37 = vpop.permute.xlu1 %863  ;;  %5323 = vmatmul.mubr.msk.f32.gmra.mrb[44].mxu0 %vm1597_vm0, %v1569_v42  ;;  %p5761_p3 = pnand %p5760_p2, %p5754_p13 }
 0x252   : > { %5676 = vset.pattern.permute.xlu1 %v8011_v59  ;;  %v984_v35 = vmul.f32 %v6656_v10, %v864_v37 }
 0x253   : > { %v2337_v52 = vmax.f32 %v2335_v23, %v2336_v56  ;;  %1308 = vperm.xlu1 %5676, %v5741_v20   ;;  %v5291_v27 = vpop.f32.mrb[22].mxu0  ;;  %v1374_v20 = vmul.f32 %v6664_v14, %v1257_v7 }
 0x254   : > { %v1972_v61 = vadd.f32 %v5291_v27, %v6634_v33  ;;  %v1966_v21 = vpop.f32.mrb[23].mxu0  ;;  %v1048_v5 = vadd.f32 %v984_v35, %v659_v43 }
 0x255   : > { %v2583_v44 = vsel %vm2570_vm2, %v2337_v52, %v2582_v51  ;;  %v1967_v30 = vadd.f32 %v6634_v33, %v1966_v21  ;;  %v868_v9 = vpop.permute.xlu1 %867 }
 0x256   : > { %v2198_v62 = vmax.f32 %v1972_v61, 0.0  ;;  %v985_v28 = vmul.f32 %v6656_v10, %v868_v9 }
 0x257   : > { %v2197_v50 = vmax.f32 %v1967_v30, 0.0  ;;  %5678 = vset.pattern.permute.xlu1 %v8016_v58 }
 0x258   : > { %v2339_v57 = vsel %vm1597_vm0, %v2198_v62, -inf  ;;  %v1049_v24 = vadd.f32 %v985_v28, %v660_v31  ;;  %915 = vperm.xlu1 %5678, %v5744_v19  }
 0x259   : > { %v2338_v29 = vsel %vm1597_vm0, %v2197_v50, -inf }
 0x25a   : > { %v2340_v11 = vmax.f32 %v2338_v29, %v2339_v57  ;;  %v1438_v18 = vadd.f32 %v1374_v20, %v1049_v24  ;;  %v1253_v51 = vpop.permute.xlu1 %1252  ;;  %v2527_v24 = vld [vmem:[%s7989_s2 + $0x28] sm:$0xff] }
 0x25b   : > { %v1373_v45 = vmul.f32 %v6664_v14, %v1253_v51 }
 0x25c   : > { %v2341_v54 = vrot.slane %v2340_v11, 4  ;;  %5679 = vset.pattern.permute.xlu1 %v8013_v13  ;;  %v1507_v47 = vadd.f32 %v6681_v36, %v1438_v18 }
 0x25d   : > { %v1437_v6 = vadd.f32 %v1373_v45, %v1048_v5  ;;  %601 = vperm.xlu1 %5679, %v286_v0  }
 0x25e   : > { %v2342_v60 = vmax.f32 %v2340_v11, %v2341_v54  ;;  %v1571_v40 = vmax.f32 %v1507_v47, 0.0 }
 0x25f   : > { %v1506_v1 = vadd.f32 %v6681_v36, %v1437_v6  ;;  %v532_v41 = vpop.permute.xlu1 %531 }
 0x260   : > { %v2343_v53 = vrot.slane %v2342_v60, 2  ;;  %v661_v27 = vmul.f32 %v6648_v49, %v532_v41 }
 0x261   : > { %v1570_v8 = vmax.f32 %v1506_v1, 0.0  ;;  %5680 = vset.pattern.permute.xlu1 %v8016_v58  ;;  %v8037_v1 = vld [vmem:[#allocation17_spill] sm:$0xff] }
 0x262   : > { %v2344_v34 = vmax.f32 %v2342_v60, %v2343_v53  ;;  %927 = vperm.xlu1 %5680, %v286_v0   ;;  %v664_v41 = vmul.f32 %v6648_v49, %v8037_v1 }
 0x263   : > { %5325 = vmatprep.mubr.msk.f32.mxu0 %vm1597_vm0, %v1570_v8 }
 0x264   : > { %v2345_v26 = vrot.slane %v2344_v34, 1  ;;  %v872_v46 = vpop.permute.xlu1 %871  ;;  %5326 = vmatmul.mubr.msk.f32.gmra.mrb[46].mxu0 %vm1597_vm0, %v1571_v40 }
 0x265   : > { %v986_v42 = vmul.f32 %v6656_v10, %v872_v46 }
 0x266   : > { %v2346_v32 = vmax.f32 %v2344_v34, %v2345_v26  ;;  %5681 = vset.pattern.permute.xlu1 %v8013_v13  ;;  %v5294_v63 = vpop.f32.mrb[24].mxu0  ;;  %v1273_v34 = vpop.permute.xlu0 %1272 }
 0x267   : > { %v1982_v15 = vadd.f32 %v5294_v63, %v6634_v33  ;;  %606 = vperm.xlu1 %5681, %v5745_v38   ;;  %v1976_v55 = vpop.f32.mrb[25].mxu0  ;;  %v1050_v30 = vadd.f32 %v986_v42, %v661_v27  ;;  %v1378_v46 = vmul.f32 %v6664_v14, %v1273_v34 }
 0x268   : > { %v2584_v17 = vsel %vm2572_vm3, %v2346_v32, %v2583_v44  ;;  %v1977_v16 = vadd.f32 %v6634_v33, %v1976_v55  ;;  %v876_v3 = vpop.permute.xlu1 %875 }
 0x269   : > { %v2200_v2 = vmax.f32 %v1982_v15, 0.0  ;;  %v987_v23 = vmul.f32 %v6656_v10, %v876_v3 }
 0x26a   : > { %v2199_v56 = vmax.f32 %v1977_v16, 0.0 }
 0x26b   : > { %v2348_v37 = vsel %vm1597_vm0, %v2200_v2, -inf  ;;  %v1051_v52 = vadd.f32 %v987_v23, %v662_v4  ;;  %5683 = vset.pattern.permute.xlu1 %v8011_v59 }
 0x26c   : > { %v2347_v7 = vsel %vm1597_vm0, %v2199_v56, -inf  ;;  %1304 = vperm.xlu1 %5683, %v5744_v19   ;;  %v2528_v19 = vld [vmem:[%s7989_s2 + $0x30] sm:$0xff] }
 0x26d   : > { %v2349_v61 = vmax.f32 %v2347_v7, %v2348_v37  ;;  %v1440_v21 = vadd.f32 %v1376_v12, %v1051_v52  ;;  %v1261_v44 = vpop.permute.xlu1 %1260  ;;  %v6845_v11 = vpack.c.bf16 %v2528_v19, %v2527_v24 }
 0x26e   : > { %v1375_v9 = vmul.f32 %v6664_v14, %v1261_v44 }
 0x26f   : > { %v2350_v39 = vrot.slane %v2349_v61, 4  ;;  %v1509_v28 = vadd.f32 %v6681_v36, %v1440_v21  ;;  %5487 = vmatprep.subr.bf16.mxu1 %v6845_v11 }
 0x270   : > { %v1439_v31 = vadd.f32 %v1375_v9, %v1050_v30  ;;  %1316 = vperm.xlu1 %5683, %v286_v0  }
 0x271   : > { %v2351_v62 = vmax.f32 %v2349_v61, %v2350_v39  ;;  %v1573_v29 = vmax.f32 %v1509_v28, 0.0  ;;  %v8038_v28 = vld [vmem:[#allocation18_spill] sm:$0xff] }
 0x272   : > { %v1508_v20 = vadd.f32 %v6681_v36, %v1439_v31  ;;  %v542_v35 = vpop.permute.xlu1 %541 }
 0x273   : > { %v2352_v50 = vrot.slane %v2351_v62, 2  ;;  %v663_v15 = vmul.f32 %v6648_v49, %v542_v35 }
 0x274   : > { %v1572_v57 = vmax.f32 %v1508_v20, 0.0  ;;  %5684 = vset.pattern.permute.xlu1 %v8013_v13  ;;  %v666_v20 = vmul.f32 %v6648_v49, %v8038_v28 }
 0x275   : > { %v2353_v43 = vmax.f32 %v2351_v62, %v2352_v50 }
 0x276   : > { %5328 = vmatprep.mubr.msk.f32.mxu0 %vm1597_vm0, %v1572_v57  ;;  %v1281_v57 = vpop.permute.xlu0 %1280 }
 0x277   : > { %v2354_v18 = vrot.slane %v2353_v43, 1  ;;  %v880_v51 = vpop.permute.xlu1 %879  ;;  %5329 = vmatmul.mubr.msk.f32.gmra.mrb[48].mxu0 %vm1597_vm0, %v1573_v29 }
 0x278   : > { %v988_v40 = vmul.f32 %v6656_v10, %v880_v51 }
 0x279   : > { %v2355_v0 = vmax.f32 %v2353_v43, %v2354_v18  ;;  %v5297_v5 = vpop.f32.mrb[26].mxu0  ;;  %v1380_v43 = vmul.f32 %v6664_v14, %v1281_v57 }
 0x27a   : > { %v1992_v45 = vadd.f32 %v5297_v5, %v6634_v33  ;;  %v1986_v54 = vpop.f32.mrb[27].mxu0  ;;  %v1052_v16 = vadd.f32 %v988_v40, %v663_v15 }
 0x27b   : > { %v2585_v6 = vsel %vm2574_vm4, %v2355_v0, %v2584_v17  ;;  %v1987_v60 = vadd.f32 %v6634_v33, %v1986_v54  ;;  %v884_v47 = vpop.permute.xlu1 %883 }
 0x27c   : > { %v2202_v53 = vmax.f32 %v1992_v45, 0.0  ;;  %v989_v8 = vmul.f32 %v6656_v10, %v884_v47 }
 0x27d   : > { %v2201_v26 = vmax.f32 %v1987_v60, 0.0 }
 0x27e   : > { %v2357_v32 = vsel %vm1597_vm0, %v2202_v53, -inf  ;;  %v1053_v63 = vadd.f32 %v989_v8, %v664_v41 }
 0x27f   : > { %v2356_v38 = vsel %vm1597_vm0, %v2201_v26, -inf }
 0x280   : > { %v2358_v55 = vmax.f32 %v2356_v38, %v2357_v32  ;;  %v1442_v17 = vadd.f32 %v1378_v46, %v1053_v63  ;;  %v1269_v48 = vpop.permute.xlu1 %1268 }
 0x281   : > { %v1377_v3 = vmul.f32 %v6664_v14, %v1269_v48 }
 0x282   : > { %v2359_v22 = vrot.slane %v2358_v55, 4  ;;  %v1511_v2 = vadd.f32 %v6681_v36, %v1442_v17 }
 0x283   : > { %v1441_v4 = vadd.f32 %v1377_v3, %v1052_v16 }
 0x284   : > { %v2360_v12 = vmax.f32 %v2358_v55, %v2359_v22  ;;  %v1575_v27 = vmax.f32 %v1511_v2, 0.0 }
 0x285   : > { %v1510_v23 = vadd.f32 %v6681_v36, %v1441_v4  ;;  %v552_v42 = vpop.permute.xlu1 %551  ;;  %v8039_v4 = vld [vmem:[#allocation19_spill] sm:$0xff] }
 0x286   : > { %v2361_v56 = vrot.slane %v2360_v12, 2  ;;  %v665_v51 = vmul.f32 %v6648_v49, %v552_v42  ;;  %v1289_v42 = vpop.permute.xlu0 %1288 }
 0x287   : > { %v1574_v37 = vmax.f32 %v1510_v23, 0.0 }
 0x288   : > { %v2362_v52 = vmax.f32 %v2360_v12, %v2361_v56  ;;  %v668_v12 = vmul.f32 %v6648_v49, %v8039_v4 }
 0x289   : > { %5331 = vmatprep.mubr.msk.f32.mxu0 %vm1597_vm0, %v1574_v37 }
 0x28a   : > { %v2363_v7 = vrot.slane %v2362_v52, 1  ;;  %v888_v61 = vpop.permute.xlu1 %887  ;;  %5332 = vmatmul.mubr.msk.f32.gmra.mrb[50].mxu0 %vm1597_vm0, %v1575_v27 }
 0x28b   : > { %v990_v24 = vmul.f32 %v6656_v10, %v888_v61 }
 0x28c   : > { %v2364_v21 = vmax.f32 %v2362_v52, %v2363_v7  ;;  %v5300_v44 = vpop.f32.mrb[28].mxu0  ;;  %v1382_v52 = vmul.f32 %v6664_v14, %v1289_v42 }
 0x28d   : > { %v2002_v30 = vadd.f32 %v5300_v44, %v6634_v33  ;;  %v1996_v9 = vpop.f32.mrb[29].mxu0 }
 0x28e   : > { %v1997_v39 = vadd.f32 %v6634_v33, %v1996_v9  ;;  %v892_v31 = vpop.permute.xlu1 %891  ;;  %v2586_v62 = vsel %vm2576_vm5, %v2364_v21, %v2585_v6  ;;  %v1054_v6 = vadd.f32 %v990_v24, %v665_v51 }
 0x28f   : > { %v2204_v35 = vmax.f32 %v2002_v30, 0.0  ;;  %v991_v50 = vmul.f32 %v6656_v10, %v892_v31 }
 0x290   : > { %v2203_v19 = vmax.f32 %v1997_v39, 0.0 }
 0x291   : > { %v2366_v29 = vsel %vm1597_vm0, %v2204_v35, -inf  ;;  %v1055_v18 = vadd.f32 %v991_v50, %v666_v20 }
 0x292   : > { %v2365_v0 = vsel %vm1597_vm0, %v2203_v19, -inf }
 0x293   : > { %v2367_v5 = vmax.f32 %v2365_v0, %v2366_v29  ;;  %v1444_v45 = vadd.f32 %v1380_v43, %v1055_v18  ;;  %v1277_v54 = vpop.permute.xlu1 %1276 }
 0x294   : > { %v1379_v60 = vmul.f32 %v6664_v14, %v1277_v54 }
 0x295   : > { %v2368_v47 = vrot.slane %v2367_v5, 4  ;;  %v1513_v53 = vadd.f32 %v6681_v36, %v1444_v45 }
 0x296   : > { %v1443_v1 = vadd.f32 %v1379_v60, %v1054_v6 }
 0x297   : > { %v2369_v41 = vmax.f32 %v2367_v5, %v2368_v47  ;;  %v1577_v32 = vmax.f32 %v1513_v53, 0.0 }
 0x298   : > { %v1512_v8 = vadd.f32 %v6681_v36, %v1443_v1  ;;  %v562_v34 = vpop.permute.xlu1 %561 }
 0x299   : > { %v2370_v40 = vrot.slane %v2369_v41, 2  ;;  %v667_v61 = vmul.f32 %v6648_v49, %v562_v34 }
 0x29a   : > { %v1576_v26 = vmax.f32 %v1512_v8, 0.0 }
 0x29b   : > { %v2371_v46 = vmax.f32 %v2369_v41, %v2370_v40 }
 0x29c   : > { %5334 = vmatprep.mubr.msk.f32.mxu0 %vm1597_vm0, %v1576_v26 }
 0x29d   : > { %v2372_v63 = vrot.slane %v2371_v46, 1  ;;  %v896_v15 = vpop.permute.xlu1 %895  ;;  %5335 = vmatmul.mubr.msk.f32.gmra.mrb[52].mxu0 %vm1597_vm0, %v1577_v32 }
 0x29e   : > { %v992_v56 = vmul.f32 %v6656_v10, %v896_v15 }
 0x29f   : > { %v2373_v38 = vmax.f32 %v2371_v46, %v2372_v63  ;;  %v5303_v55 = vpop.f32.mrb[30].mxu0 }
 0x2a0   : > { %v2012_v17 = vadd.f32 %v5303_v55, %v6634_v33  ;;  %v2006_v48 = vpop.f32.mrb[31].mxu0  ;;  %v1056_v39 = vadd.f32 %v992_v56, %v667_v61 }
 0x2a1   : > { %v2007_v16 = vadd.f32 %v6634_v33, %v2006_v48  ;;  %v900_v3 = vpop.permute.xlu1 %899  ;;  %v2587_v22 = vsel %vm2578_vm6, %v2373_v38, %v2586_v62 }
 0x2a2   : > { %v2206_v2 = vmax.f32 %v2012_v17, 0.0  ;;  %v993_v23 = vmul.f32 %v6656_v10, %v900_v3 }
 0x2a3   : > { %v2205_v37 = vmax.f32 %v2007_v16, 0.0 }
 0x2a4   : > { %v2375_v27 = vsel %vm1597_vm0, %v2206_v2, -inf  ;;  %v1057_v7 = vadd.f32 %v993_v23, %v668_v12  ;;  %v8040_v12 = vld [vmem:[#allocation20_spill] sm:$0xff] }
 0x2a5   : > { %v2374_v21 = vsel %vm1597_vm0, %v2205_v37, -inf  ;;  %v1313_v37 = vpop.permute.xlu0 %1312 }
 0x2a6   : > { %v2376_v44 = vmax.f32 %v2374_v21, %v2375_v27  ;;  %v1446_v30 = vadd.f32 %v1382_v52, %v1057_v7  ;;  %v1285_v9 = vpop.permute.xlu1 %1284  ;;  %v6931_v7 = vld [vmem:[%s7989_s2 + $0x2] ss:$0 sm:$0xff] }
 0x2a7   : > { %v1381_v31 = vmul.f32 %v6664_v14, %v1285_v9 }
 0x2a8   : > { %v2377_v62 = vrot.slane %v2376_v44, 4  ;;  %v1515_v35 = vadd.f32 %v6681_v36, %v1446_v30 }
 0x2a9   : > { %v1445_v28 = vadd.f32 %v1381_v31, %v1056_v39  ;;  %v6940_v39 = vld [vmem:[%s7989_s2 + $0x1] ss:$0 sm:$0xff]  ;;  %v8041_v31 = vld [vmem:[#allocation24_spill] sm:$0xff] }
 0x2aa   : > { %v2378_v20 = vmax.f32 %v2376_v44, %v2377_v62  ;;  %v1579_v29 = vmax.f32 %v1515_v35, 0.0  ;;  %v999_v62 = vmul.f32 %v6940_v39, %v8041_v31 }
 0x2ab   : > { %v1514_v50 = vadd.f32 %v6681_v36, %v1445_v28  ;;  %v572_v57 = vpop.permute.xlu1 %571 }
 0x2ac   : > { %v2379_v24 = vrot.slane %v2378_v20, 2  ;;  %v669_v46 = vmul.f32 %v6648_v49, %v572_v57  ;;  %v8042_v57 = vld [vmem:[#allocation21_spill] sm:$0xff] }
 0x2ad   : > { %v1578_v19 = vmax.f32 %v1514_v50, 0.0 }
 0x2ae   : > { %v2380_v43 = vmax.f32 %v2378_v20, %v2379_v24 }
 0x2af   : > { %5337 = vmatprep.mubr.msk.f32.mxu0 %vm1597_vm0, %v1578_v19 }
 0x2b0   : > { %v2381_v18 = vrot.slane %v2380_v43, 1  ;;  %v904_v51 = vpop.permute.xlu1 %903  ;;  %5338 = vmatmul.mubr.msk.f32.gmra.mrb[54].mxu0 %vm1597_vm0, %v1579_v29 }
 0x2b1   : > { %v994_v26 = vmul.f32 %v6656_v10, %v904_v51  ;;  %v1301_v51 = vpop.permute.xlu0 %1300 }
 0x2b2   : > { %v2382_v0 = vmax.f32 %v2380_v43, %v2381_v18  ;;  %v5306_v5 = vpop.f32.mrb[32].mxu0  ;;  %v1388_v18 = vmul.f32 %v6931_v7, %v1313_v37 }
 0x2b3   : > { %v2022_v45 = vadd.f32 %v5306_v5, %v6634_v33  ;;  %v2016_v54 = vpop.f32.mrb[33].mxu0  ;;  %v1058_v32 = vadd.f32 %v994_v26, %v669_v46 }
 0x2b4   : > { %v2017_v6 = vadd.f32 %v6634_v33, %v2016_v54  ;;  %v908_v60 = vpop.permute.xlu1 %907  ;;  %v6901_v47 = vsel %vm2580_vm7, %v2382_v0, %v2587_v22  ;;  %v6916_v22 = vld [vmem:[%s7990_s3 + $0x1] ss:$0 sm:$0xff] }
 0x2b5   : > { %v2208_v1 = vmax.f32 %v2022_v45, 0.0  ;;  %4859 = vst.msk [vmem:[%s6553_s9 + $0x30] sm:$0xff] %vm1597_vm0, %v6901_v47  ;;  %v995_v48 = vmul.f32 %v6656_v10, %v908_v60  ;;  %v1385_v45 = vmul.f32 %v6931_v7, %v1301_v51 }
 0x2b6   : > { %v2207_v41 = vmax.f32 %v2017_v6, 0.0 }
 0x2b7   : > { %v2384_v53 = vsel %vm1597_vm0, %v2208_v1, -inf }
 0x2b8   : > { %v2383_v8 = vsel %vm1597_vm0, %v2207_v41, -inf }
 0x2b9   : > { %v2385_v34 = vmax.f32 %v2383_v8, %v2384_v53  ;;  %v592_v40 = vpop.permute.xlu1 %591 }
 0x2bb   : > { %v2386_v17 = vrot.slane %v2385_v34, 4 }
 0x2bd   : > { %v2387_v23 = vmax.f32 %v2385_v34, %v2386_v17 }
 0x2be   : > { %v1293_v33 = vpop.permute.xlu1 %1292 }
 0x2bf   : > { %v1383_v63 = vmul.f32 %v6664_v14, %v1293_v33  ;;  %v6922_v14 = vld [vmem:[%s7989_s2] ss:$0 sm:$0xff]  ;;  %v2388_v28 = vrot.slane %v2387_v23, 2 }
 0x2c0   : > { %v670_v2 = vmul.f32 %v6922_v14, %v8040_v12  ;;  %v671_v24 = vmul.f32 %v6922_v14, %v8042_v57  ;;  %v673_v0 = vmul.f32 %v6922_v14, %v592_v40 }
 0x2c1   : > { %v1447_v15 = vadd.f32 %v1383_v63, %v1058_v32  ;;  %v2389_v54 = vmax.f32 %v2387_v23, %v2388_v28  ;;  %v6958_v32 = vld [vmem:[%s7990_s3] ss:$0 sm:$0xff] }
 0x2c2   : > { %v1059_v52 = vadd.f32 %v995_v48, %v670_v2 }
 0x2c3   : > { %v1516_v38 = vadd.f32 %v6681_v36, %v1447_v15  ;;  %v597_v55 = vpop.permute.xlu1 %596  ;;  %v2390_v33 = vrot.slane %v2389_v54, 1 }
 0x2c4   : > { %v674_v21 = vmul.f32 %v6922_v14, %v597_v55 }
 0x2c5   : > { %v1580_v16 = vmax.f32 %v1516_v38, 0.0  ;;  %v5309_v3 = vpop.f32.mrb[34].mxu0 }
 0x2c6   : > { %v2032_v49 = vadd.f32 %v6916_v22, %v5309_v3  ;;  %v2026_v4 = vpop.f32.mrb[35].mxu0  ;;  %v1063_v19 = vadd.f32 %v999_v62, %v674_v21  ;;  %v2529_v3 = vld [vmem:[%s7989_s2 + $0x38] sm:$0xff] }
 0x2c7   : > { %v2027_v10 = vadd.f32 %v6916_v22, %v2026_v4  ;;  %5340 = vmatprep.mubr.msk.f32.mxu0 %vm1597_vm0, %v1580_v16  ;;  %v2391_v4 = vmax.f32 %v2389_v54, %v2390_v33 }
 0x2c8   : > { %v2210_v42 = vmax.f32 %v2032_v49, 0.0  ;;  %v1297_v56 = vpop.permute.xlu1 %1296  ;;  %v1452_v41 = vadd.f32 %v1388_v18, %v1063_v19  ;;  %v2530_v49 = vld [vmem:[%s7989_s2 + $0x40] sm:$0xff] }
 0x2c9   : > { %v2209_v27 = vmax.f32 %v2027_v10, 0.0  ;;  %v1384_v61 = vmul.f32 %v6931_v7, %v1297_v56 }
 0x2ca   : > { %v2393_v44 = vsel %vm1597_vm0, %v2210_v42, -inf  ;;  %v1521_v38 = vadd.f32 %v6958_v32, %v1452_v41 }
 0x2cb   : > { %v2392_v30 = vsel %vm1597_vm0, %v2209_v27, -inf  ;;  %v1448_v9 = vadd.f32 %v1384_v61, %v1059_v52  ;;  %v5490_v27 = vpack.c.bf16 %v2530_v49, %v2529_v3 }
 0x2cc   : > { %v2394_v20 = vmax.f32 %v2392_v30, %v2393_v44  ;;  %v1585_v52 = vmax.f32 %v1521_v38, 0.0 }
 0x2cd   : > { %v1517_v35 = vadd.f32 %v6681_v36, %v1448_v9  ;;  %v912_v50 = vpop.permute.xlu1 %911  ;;  %v8043_v36 = vld [vmem:[#allocation23_spill] sm:$0xff] }
 0x2ce   : > { %v2395_v43 = vrot.slane %v2394_v20, 4  ;;  %v996_v29 = vmul.f32 %v6940_v39, %v912_v50  ;;  %v998_v1 = vmul.f32 %v6940_v39, %v8043_v36 }
 0x2cf   : > { %v1581_v5 = vmax.f32 %v1517_v35, 0.0 }
 0x2d0   : > { %v2396_v6 = vmax.f32 %v2394_v20, %v2395_v43  ;;  %v1060_v60 = vadd.f32 %v996_v29, %v671_v24  ;;  %v1062_v26 = vadd.f32 %v998_v1, %v673_v0  ;;  %v8044_v43 = vld [vmem:[#allocation25_spill] sm:$0xff]  ;;  %v1321_v0 = vpop.permute.xlu0 %1320 }
 0x2d1   : > { %5341 = vmatmul.mubr.msk.f32.gmra.mrb[56].mxu0 %vm1597_vm0, %v1581_v5  ;;  %v1001_v29 = vmul.f32 %v6940_v39, %v8044_v43  ;;  %v1390_v41 = vmul.f32 %v6931_v7, %v1321_v0 }
 0x2d2   : > { %v2397_v53 = vrot.slane %v2396_v6, 2  ;;  %v1449_v8 = vadd.f32 %v1385_v45, %v1060_v60  ;;  %v1309_v34 = vpop.permute.xlu1 %1308 }
 0x2d3   : > { %v1387_v46 = vmul.f32 %v6931_v7, %v1309_v34 }
 0x2d4   : > { %v2398_v40 = vmax.f32 %v2396_v6, %v2397_v53  ;;  %v1518_v63 = vadd.f32 %v6958_v32, %v1449_v8 }
 0x2d5   : > { %v1451_v15 = vadd.f32 %v1387_v46, %v1062_v26 }
 0x2d6   : > { %v2399_v55 = vrot.slane %v2398_v40, 1  ;;  %v1582_v17 = vmax.f32 %v1518_v63, 0.0 }
 0x2d7   : > { %v916_v48 = vpop.permute.xlu1 %915  ;;  %v1520_v16 = vadd.f32 %v6958_v32, %v1451_v15 }
 0x2d8   : > { %v2400_v12 = vmax.f32 %v2398_v40, %v2399_v55  ;;  %v5312_v2 = vpop.f32.mrb[36].mxu0  ;;  %5343 = vmatprep.mubr.msk.f32.mxu0 %vm1597_vm0, %v1582_v17  ;;  %v997_v19 = vmul.f32 %v6940_v39, %v916_v48 }
 0x2d9   : > { %v2042_v10 = vadd.f32 %v6916_v22, %v5312_v2  ;;  %v2036_v23 = vpop.f32.mrb[37].mxu0  ;;  %v1584_v42 = vmax.f32 %v1520_v16, 0.0 }
 0x2da   : > { %v2589_v56 = vsel %vm2568_vm1, %v2400_v12, %v2391_v4  ;;  %v2037_v37 = vadd.f32 %v6916_v22, %v2036_v23 }
 0x2db   : > { %v2212_v61 = vmax.f32 %v2042_v10, 0.0  ;;  %5346 = vmatprep.mubr.msk.f32.mxu1 %vm1597_vm0, %v1584_v42 }
 0x2dc   : > { %v2211_v21 = vmax.f32 %v2037_v37, 0.0  ;;  %v602_v44 = vpop.permute.xlu1 %601  ;;  %5347 = vmatmul.mubr.msk.f32.vlgmr.msra.gmra.mrb[0].mxu1 %vm1597_vm0, %v1585_v52 }
 0x2dd   : > { %v2402_v30 = vsel %vm1597_vm0, %v2212_v61, -inf  ;;  %5489 = vmatpush3.bf16.msra.mxu1 %v6845_v11  ;;  %v8045_v11 = vld [vmem:[#allocation22_spill] sm:$0xff]  ;;  %v675_v26 = vmul.f32 %v6922_v14, %v602_v44 }
 0x2de   : > { %v2401_v9 = vsel %vm1597_vm0, %v2211_v21, -inf  ;;  %5491 = vmatprep.subr.bf16.mxu1 %v5490_v27  ;;  %v672_v51 = vmul.f32 %v6922_v14, %v8045_v11 }
 0x2df   : > { %v2403_v31 = vmax.f32 %v2401_v9, %v2402_v30 }
 0x2e0   : > { %v1061_v6 = vadd.f32 %v997_v19, %v672_v51 }
 0x2e1   : > { %v2404_v62 = vrot.slane %v2403_v31, 4  ;;  %v928_v28 = vpop.permute.xlu1 %927  ;;  %5493 = vmatpush3.bf16.msra.mxu1 %v5490_v27 }
 0x2e2   : > { %v1000_v60 = vmul.f32 %v6940_v39, %v928_v28 }
 0x2e3   : > { %v2405_v20 = vmax.f32 %v2403_v31, %v2404_v62 }
 0x2e4   : > { %v1064_v38 = vadd.f32 %v1000_v60, %v675_v26 }
 0x2e5   : > { %v2406_v35 = vrot.slane %v2405_v20, 2 }
 0x2e6   : > { %v607_v50 = vpop.permute.xlu1 %606 }
 0x2e7   : > { %v2407_v57 = vmax.f32 %v2405_v20, %v2406_v35  ;;  %v676_v24 = vmul.f32 %v6922_v14, %v607_v50 }
 0x2e9   : > { %v2408_v18 = vrot.slane %v2407_v57, 1  ;;  %v1065_v45 = vadd.f32 %v1001_v29, %v676_v24 }
 0x2eb   : > { %v2409_v5 = vmax.f32 %v2407_v57, %v2408_v18  ;;  %v1305_v54 = vpop.permute.xlu1 %1304  ;;  %v5315_v1 = vpop.f32.mrb[38].mxu0  ;;  %v1454_v40 = vadd.f32 %v1390_v41, %v1065_v45 }
 0x2ec   : > { %v1386_v36 = vmul.f32 %v6931_v7, %v1305_v54  ;;  %v2052_v8 = vadd.f32 %v6916_v22, %v5315_v1  ;;  %v2046_v34 = vpop.f32.mrb[39].mxu0 }
 0x2ed   : > { %v2590_v53 = vsel %vm2570_vm2, %v2409_v5, %v2589_v56  ;;  %v2047_v33 = vadd.f32 %v6916_v22, %v2046_v34  ;;  %v1523_v14 = vadd.f32 %v6958_v32, %v1454_v40 }
 0x2ee   : > { %v1450_v46 = vadd.f32 %v1386_v36, %v1061_v6  ;;  %v2214_v63 = vmax.f32 %v2052_v8, 0.0 }
 0x2ef   : > { %v1317_v15 = vpop.permute.xlu1 %1316  ;;  %v2213_v55 = vmax.f32 %v2047_v33, 0.0  ;;  %v1587_v42 = vmax.f32 %v1523_v14, 0.0 }
 0x2f0   : > { %v1519_v39 = vadd.f32 %v6958_v32, %v1450_v46  ;;  %v1389_v17 = vmul.f32 %v6931_v7, %v1317_v15  ;;  %v2411_v48 = vsel %vm1597_vm0, %v2214_v63, -inf }
 0x2f1   : > { %v2410_v3 = vsel %vm1597_vm0, %v2213_v55, -inf }
 0x2f2   : > { %v1583_v16 = vmax.f32 %v1519_v39, 0.0  ;;  %v1453_v49 = vadd.f32 %v1389_v17, %v1064_v38  ;;  %v2412_v4 = vmax.f32 %v2410_v3, %v2411_v48 }
 0x2f4   : > { %v1522_v12 = vadd.f32 %v6958_v32, %v1453_v49  ;;  %5344 = vmatmul.mubr.msk.f32.gmra.mrb[58].mxu0 %vm1597_vm0, %v1583_v16  ;;  %v2413_v2 = vrot.slane %v2412_v4, 4 }
 0x2f6   : > { %v1586_v10 = vmax.f32 %v1522_v12, 0.0  ;;  %v2414_v23 = vmax.f32 %v2412_v4, %v2413_v2 }
 0x2f8   : > { %5349 = vmatprep.mubr.msk.f32.mxu1 %vm1597_vm0, %v1586_v10  ;;  %v2415_v7 = vrot.slane %v2414_v23, 2 }
 0x2f9   : > { %5350 = vmatmul.mubr.msk.f32.gmra.mrb[2].mxu1 %vm1597_vm0, %v1587_v42 }
 0x2fa   : > { %5360 = vmatprep.mubr.msk.f32.mxu1 %vm1597_vm0, %v6766_v25  ;;  %v2416_v56 = vmax.f32 %v2414_v23, %v2415_v7 }
 0x2fc   : > { %v2417_v37 = vrot.slane %v2416_v56, 1 }
 0x2fd   : > { %5361 = vmatmul.mubr.msk.f32.vlgmr.msra.gmra.mrb[4].mxu1 %vm1597_vm0, %v6901_v47 }
 0x2fe   : > { %v2418_v32 = vmax.f32 %v2416_v56, %v2417_v37 }
 0x2ff   : > { %v5318_v52 = vpop.f32.mrb[40].mxu0 }
 0x300   : > { %v2062_v27 = vadd.f32 %v6916_v22, %v5318_v52  ;;  %v2056_v61 = vpop.f32.mrb[41].mxu0  ;;  %v2591_v44 = vsel %vm2572_vm3, %v2418_v32, %v2590_v53 }
 0x301   : > { %v2057_v21 = vadd.f32 %v6916_v22, %v2056_v61 }
 0x302   : > { %v2216_v30 = vmax.f32 %v2062_v27, 0.0 }
 0x303   : > { %v2215_v9 = vmax.f32 %v2057_v21, 0.0 }
 0x304   : > { %v2420_v31 = vsel %vm1597_vm0, %v2216_v30, -inf }
 0x305   : > { %v2419_v25 = vsel %vm1597_vm0, %v2215_v9, -inf }
 0x306   : > { %v2421_v62 = vmax.f32 %v2419_v25, %v2420_v31 }
 0x308   : > { %v2422_v28 = vrot.slane %v2421_v62, 4 }
 0x30a   : > { %v2423_v20 = vmax.f32 %v2421_v62, %v2422_v28 }
 0x30c   : > { %v2424_v35 = vrot.slane %v2423_v20, 2 }
 0x30e   : > { %v2425_v47 = vmax.f32 %v2423_v20, %v2424_v35 }
 0x310   : > { %v2426_v50 = vrot.slane %v2425_v47, 1 }
 0x311   : > { %v5321_v57 = vpop.f32.mrb[42].mxu0 }
 0x312   : > { %v2427_v24 = vmax.f32 %v2425_v47, %v2426_v50  ;;  %v2072_v19 = vadd.f32 %v6916_v22, %v5321_v57  ;;  %v2066_v43 = vpop.f32.mrb[43].mxu0 }
 0x313   : > { %v2067_v29 = vadd.f32 %v6916_v22, %v2066_v43 }
 0x314   : > { %v2218_v18 = vmax.f32 %v2072_v19, 0.0  ;;  %v2592_v11 = vsel %vm2574_vm4, %v2427_v24, %v2591_v44 }
 0x315   : > { %v2217_v51 = vmax.f32 %v2067_v29, 0.0 }
 0x316   : > { %v2429_v0 = vsel %vm1597_vm0, %v2218_v18, -inf }
 0x317   : > { %v2428_v5 = vsel %vm1597_vm0, %v2217_v51, -inf }
 0x318   : > { %v2430_v45 = vmax.f32 %v2428_v5, %v2429_v0  ;;  %v2696_v0 = vld [vmem:[%s7989_s2 + $0x48] sm:$0xff]  ;;  %v2697_v5 = vld [vmem:[%s7989_s2 + $0x50] sm:$0xff] }
 0x31a   : > { %v2431_v54 = vrot.slane %v2430_v45, 4 }
 0x31c   : > { %v2432_v6 = vmax.f32 %v2430_v45, %v2431_v54  ;;  %v5494_v54 = vpack.c.bf16 %v2697_v5, %v2696_v0 }
 0x31e   : > { %v2433_v60 = vrot.slane %v2432_v6, 2  ;;  %5495 = vmatprep.subr.bf16.mxu1 %v5494_v54 }
 0x31f   : > { %5497 = vmatpush3.bf16.msra.mxu1 %v5494_v54 }
 0x320   : > { %v2434_v36 = vmax.f32 %v2432_v6, %v2433_v60 }
 0x322   : > { %v2435_v1 = vrot.slane %v2434_v36, 1 }
 0x324   : > { %v2436_v41 = vmax.f32 %v2434_v36, %v2435_v1  ;;  %v5324_v53 = vpop.f32.mrb[44].mxu0 }
 0x325   : > { %v2082_v8 = vadd.f32 %v6916_v22, %v5324_v53  ;;  %v2076_v34 = vpop.f32.mrb[45].mxu0 }
 0x326   : > { %v2077_v26 = vadd.f32 %v6916_v22, %v2076_v34  ;;  %v2593_v46 = vsel %vm2576_vm5, %v2436_v41, %v2592_v11 }
 0x327   : > { %v2220_v33 = vmax.f32 %v2082_v8, 0.0 }
 0x328   : > { %v2219_v40 = vmax.f32 %v2077_v26, 0.0 }
 0x329   : > { %v2438_v63 = vsel %vm1597_vm0, %v2220_v33, -inf }
 0x32a   : > { %v2437_v15 = vsel %vm1597_vm0, %v2219_v40, -inf }
 0x32b   : > { %v2439_v38 = vmax.f32 %v2437_v15, %v2438_v63 }
 0x32d   : > { %v2440_v39 = vrot.slane %v2439_v38, 4 }
 0x32f   : > { %v2441_v55 = vmax.f32 %v2439_v38, %v2440_v39 }
 0x331   : > { %v2442_v17 = vrot.slane %v2441_v55, 2 }
 0x333   : > { %v2443_v48 = vmax.f32 %v2441_v55, %v2442_v17 }
 0x335   : > { %v2444_v16 = vrot.slane %v2443_v48, 1 }
 0x337   : > { %v2445_v3 = vmax.f32 %v2443_v48, %v2444_v16  ;;  %v5327_v49 = vpop.f32.mrb[46].mxu0 }
 0x338   : > { %v2092_v14 = vadd.f32 %v6916_v22, %v5327_v49  ;;  %v2086_v4 = vpop.f32.mrb[47].mxu0 }
 0x339   : > { %v2087_v12 = vadd.f32 %v6916_v22, %v2086_v4  ;;  %v2594_v2 = vsel %vm2578_vm6, %v2445_v3, %v2593_v46 }
 0x33a   : > { %v2222_v10 = vmax.f32 %v2092_v14, 0.0 }
 0x33b   : > { %v2221_v23 = vmax.f32 %v2087_v12, 0.0 }
 0x33c   : > { %v2447_v42 = vsel %vm1597_vm0, %v2222_v10, -inf }
 0x33d   : > { %v2446_v7 = vsel %vm1597_vm0, %v2221_v23, -inf }
 0x33e   : > { %v2448_v56 = vmax.f32 %v2446_v7, %v2447_v42 }
 0x340   : > { %v2449_v37 = vrot.slane %v2448_v56, 4 }
 0x342   : > { %v2450_v32 = vmax.f32 %v2448_v56, %v2449_v37 }
 0x344   : > { %v2451_v52 = vrot.slane %v2450_v32, 2 }
 0x346   : > { %v2452_v27 = vmax.f32 %v2450_v32, %v2451_v52 }
 0x348   : > { %v2453_v61 = vrot.slane %v2452_v27, 1 }
 0x34a   : > { %v5330_v21 = vpop.f32.mrb[48].mxu0  ;;  %v2454_v44 = vmax.f32 %v2452_v27, %v2453_v61 }
 0x34b   : > { %v2102_v30 = vadd.f32 %v6916_v22, %v5330_v21  ;;  %v2096_v9 = vpop.f32.mrb[49].mxu0 }
 0x34c   : > { %v2097_v31 = vadd.f32 %v6916_v22, %v2096_v9  ;;  %v2595_v25 = vsel %vm2580_vm7, %v2454_v44, %v2594_v2 }
 0x34d   : > { %v2224_v62 = vmax.f32 %v2102_v30, 0.0  ;;  %5363 = vmatprep.mubr.msk.f32.mxu1 %vm1597_vm0, %v2595_v25  ;;  %4860 = vst.msk [vmem:[%s6553_s9 + $0x50] sm:$0xff] %vm1597_vm0, %v2595_v25 }
 0x34e   : > { %v2223_v28 = vmax.f32 %v2097_v31, 0.0 }
 0x34f   : > { %v2456_v20 = vsel %vm1597_vm0, %v2224_v62, -inf }
 0x350   : > { %v2455_v35 = vsel %vm1597_vm0, %v2223_v28, -inf }
 0x351   : > { %v2457_v47 = vmax.f32 %v2455_v35, %v2456_v20 }
 0x353   : > { %v2458_v50 = vrot.slane %v2457_v47, 4 }
 0x355   : > { %v2459_v29 = vmax.f32 %v2457_v47, %v2458_v50 }
 0x357   : > { %v2460_v6 = vrot.slane %v2459_v29, 2 }
 0x359   : > { %v2461_v1 = vmax.f32 %v2459_v29, %v2460_v6 }
 0x35b   : > { %v2462_v8 = vrot.slane %v2461_v1, 1 }
 0x35d   : > { %v5333_v57 = vpop.f32.mrb[50].mxu0  ;;  %v2463_v46 = vmax.f32 %v2461_v1, %v2462_v8 }
 0x35e   : > { %v2112_v24 = vadd.f32 %v6916_v22, %v5333_v57  ;;  %v2106_v19 = vpop.f32.mrb[51].mxu0 }
 0x35f   : > { %v2107_v43 = vadd.f32 %v6916_v22, %v2106_v19 }
 0x360   : > { %v2226_v18 = vmax.f32 %v2112_v24, 0.0 }
 0x361   : > { %v2225_v11 = vmax.f32 %v2107_v43, 0.0 }
 0x362   : > { %v2465_v51 = vsel %vm1597_vm0, %v2226_v18, -inf }
 0x363   : > { %v2464_v45 = vsel %vm1597_vm0, %v2225_v11, -inf }
 0x364   : > { %v2466_v60 = vmax.f32 %v2464_v45, %v2465_v51 }
 0x366   : > { %v2467_v36 = vrot.slane %v2466_v60, 4 }
 0x368   : > { %v2468_v41 = vmax.f32 %v2466_v60, %v2467_v36 }
 0x36a   : > { %v2469_v53 = vrot.slane %v2468_v41, 2 }
 0x36c   : > { %v2470_v34 = vmax.f32 %v2468_v41, %v2469_v53 }
 0x36e   : > { %v2471_v26 = vrot.slane %v2470_v34, 1 }
 0x370   : > { %v2472_v33 = vmax.f32 %v2470_v34, %v2471_v26  ;;  %v5336_v40 = vpop.f32.mrb[52].mxu0 }
 0x371   : > { %v2122_v63 = vadd.f32 %v6916_v22, %v5336_v40  ;;  %v2116_v15 = vpop.f32.mrb[53].mxu0 }
 0x372   : > { %v2596_v38 = vsel %vm2568_vm1, %v2472_v33, %v2463_v46  ;;  %v2117_v39 = vadd.f32 %v6916_v22, %v2116_v15 }
 0x373   : > { %v2228_v55 = vmax.f32 %v2122_v63, 0.0 }
 0x374   : > { %v2227_v17 = vmax.f32 %v2117_v39, 0.0 }
 0x375   : > { %v2474_v48 = vsel %vm1597_vm0, %v2228_v55, -inf }
 0x376   : > { %v2473_v16 = vsel %vm1597_vm0, %v2227_v17, -inf }
 0x377   : > { %v2475_v3 = vmax.f32 %v2473_v16, %v2474_v48 }
 0x379   : > { %v2476_v49 = vrot.slane %v2475_v3, 4 }
 0x37b   : > { %v2477_v14 = vmax.f32 %v2475_v3, %v2476_v49 }
 0x37d   : > { %v2478_v4 = vrot.slane %v2477_v14, 2 }
 0x37f   : > { %v2479_v12 = vmax.f32 %v2477_v14, %v2478_v4 }
 0x381   : > { %v2480_v2 = vrot.slane %v2479_v12, 1 }
 0x383   : > { %v2481_v10 = vmax.f32 %v2479_v12, %v2480_v2  ;;  %v5339_v23 = vpop.f32.mrb[54].mxu0  ;;  %v5034_v12 = vld [vmem:[%s7990_s3 + $0x2] ss:$0 sm:$0xff] }
 0x384   : > { %v2132_v42 = vadd.f32 %v6916_v22, %v5339_v23  ;;  %v2126_v7 = vpop.f32.mrb[55].mxu0 }
 0x385   : > { %v2597_v56 = vsel %vm2570_vm2, %v2481_v10, %v2596_v38  ;;  %v2127_v37 = vadd.f32 %v6916_v22, %v2126_v7 }
 0x386   : > { %v2230_v32 = vmax.f32 %v2132_v42, 0.0 }
 0x387   : > { %v2229_v52 = vmax.f32 %v2127_v37, 0.0 }
 0x388   : > { %v2483_v27 = vsel %vm1597_vm0, %v2230_v32, -inf }
 0x389   : > { %v2482_v61 = vsel %vm1597_vm0, %v2229_v52, -inf }
 0x38a   : > { %v2484_v21 = vmax.f32 %v2482_v61, %v2483_v27 }
 0x38c   : > { %v2485_v44 = vrot.slane %v2484_v21, 4 }
 0x38e   : > { %v2486_v30 = vmax.f32 %v2484_v21, %v2485_v44 }
 0x390   : > { %v2487_v9 = vrot.slane %v2486_v30, 2 }
 0x392   : > { %v2488_v31 = vmax.f32 %v2486_v30, %v2487_v9 }
 0x394   : > { %v2489_v25 = vrot.slane %v2488_v31, 1 }
 0x396   : > { %v2490_v62 = vmax.f32 %v2488_v31, %v2489_v25 }
 0x398   : > { %v2598_v28 = vsel %vm2572_vm3, %v2490_v62, %v2597_v56 }
 0x3a4   : > { %v5342_v20 = vpop.f32.mrb[56].mxu0 }
 0x3a5   : > { %v2142_v35 = vadd.f32 %v6916_v22, %v5342_v20  ;;  %v2136_v47 = vpop.f32.mrb[57].mxu0 }
 0x3a6   : > { %v2137_v50 = vadd.f32 %v6916_v22, %v2136_v47 }
 0x3a7   : > { %v2232_v57 = vmax.f32 %v2142_v35, 0.0 }
 0x3a8   : > { %v2231_v24 = vmax.f32 %v2137_v50, 0.0 }
 0x3a9   : > { %v2492_v19 = vsel %vm1597_vm0, %v2232_v57, -inf }
 0x3aa   : > { %v2491_v43 = vsel %vm1597_vm0, %v2231_v24, -inf }
 0x3ab   : > { %v2493_v29 = vmax.f32 %v2491_v43, %v2492_v19 }
 0x3ad   : > { %v2494_v18 = vrot.slane %v2493_v29, 4 }
 0x3af   : > { %v2495_v11 = vmax.f32 %v2493_v29, %v2494_v18  ;;  %v5348_v51 = vpop.f32.mrb[0].mxu1  ;;  %v2805_v29 = vld [vmem:[%s7989_s2 + $0x58] sm:$0xff]  ;;  %v2806_v18 = vld [vmem:[%s7989_s2 + $0x60] sm:$0xff] }
 0x3b0   : > { %v2162_v0 = vadd.f32 %v6916_v22, %v5348_v51  ;;  %v2156_v5 = vpop.f32.mrb[1].mxu1  ;;  %v2807_v51 = vld [vmem:[%s7989_s2 + $0x68] sm:$0xff] }
 0x3b1   : > { %v2496_v45 = vrot.slane %v2495_v11, 2  ;;  %v2157_v54 = vadd.f32 %v6916_v22, %v2156_v5 }
 0x3b2   : > { %v2236_v6 = vmax.f32 %v2162_v0, 0.0  ;;  %v2808_v0 = vld [vmem:[%s7989_s2 + $0x70] sm:$0xff] }
 0x3b3   : > { %v2497_v60 = vmax.f32 %v2495_v11, %v2496_v45  ;;  %v2235_v36 = vmax.f32 %v2157_v54, 0.0  ;;  %v5498_v11 = vpack.c.bf16 %v2806_v18, %v2805_v29  ;;  %v5502_v5 = vpack.c.bf16 %v2808_v0, %v2807_v51  ;;  %v2911_v45 = vld [vmem:[%s7989_s2 + $0x78] sm:$0xff]  ;;  %v2912_v54 = vld [vmem:[%s7989_s2 + $0x80] sm:$0xff] }
 0x3b4   : > { %v2510_v1 = vsel %vm1597_vm0, %v2236_v6, -inf  ;;  %v5506_v6 = vpack.c.bf16 %v2912_v54, %v2911_v45  ;;  %v3140_v0 = vld [vmem:[%s7134_s13 + $0x78] sm:$0xff]  ;;  %v3146_v45 = vld [vmem:[%s7134_s13 + $0xa8] sm:$0xff] }
 0x3b5   : > { %v2498_v41 = vrot.slane %v2497_v60, 1  ;;  %v2509_v53 = vsel %vm1597_vm0, %v2235_v36, -inf  ;;  %5499 = vmatprep.subr.bf16.mxu1 %v5498_v11 }
 0x3b6   : > { %v2511_v8 = vmax.f32 %v2509_v53, %v2510_v1  ;;  %v7106_v53 = vld [vmem:[%s7990_s3 + $0x3] ss:$0 sm:$0xff] }
 0x3b7   : > { %v2499_v34 = vmax.f32 %v2497_v60, %v2498_v41 }
 0x3b8   : > { %v2512_v46 = vrot.slane %v2511_v8, 4 }
 0x3b9   : > { %v2599_v26 = vsel %vm2574_vm4, %v2499_v34, %v2598_v28 }
 0x3ba   : > { %v2513_v39 = vmax.f32 %v2511_v8, %v2512_v46 }
 0x3bc   : > { %v2514_v2 = vrot.slane %v2513_v39, 2 }
 0x3be   : > { %v2515_v61 = vmax.f32 %v2513_v39, %v2514_v2  ;;  %v2915_v39 = vld [vmem:[%s7989_s2 + $0x98] sm:$0xff]  ;;  %v7147_v2 = vld [vmem:[%s7134_s13 + $0x80] sm:$0xff] }
 0x3c0   : > { %v2516_v31 = vrot.slane %v2515_v61, 1 }
 0x3c2   : > { %v2517_v35 = vmax.f32 %v2515_v61, %v2516_v31  ;;  %v7211_v31 = vld [vmem:[%s7990_s3 + $0x4] ss:$0 sm:$0xff] }
 0x3c7   : > { %v5345_v33 = vpop.f32.mrb[58].mxu0 }
 0x3c8   : > { %v2152_v40 = vadd.f32 %v6916_v22, %v5345_v33  ;;  %v2146_v63 = vpop.f32.mrb[59].mxu0 }
 0x3c9   : > { %v2147_v15 = vadd.f32 %v6916_v22, %v2146_v63  ;;  %v2913_v63 = vld [vmem:[%s7989_s2 + $0x88] sm:$0xff] }
 0x3ca   : > { %v2234_v38 = vmax.f32 %v2152_v40, 0.0 }
 0x3cb   : > { %v2233_v55 = vmax.f32 %v2147_v15, 0.0  ;;  %v2914_v15 = vld [vmem:[%s7989_s2 + $0x90] sm:$0xff] }
 0x3cc   : > { %v2501_v17 = vsel %vm1597_vm0, %v2234_v38, -inf  ;;  %v5351_v48 = vpop.f32.mrb[2].mxu1  ;;  %v5510_v38 = vpack.c.bf16 %v2914_v15, %v2913_v63  ;;  %v3149_v15 = vld [vmem:[%s7134_s13 + $0xc0] sm:$0xff] }
 0x3cd   : > { %v2500_v16 = vsel %vm1597_vm0, %v2233_v55, -inf  ;;  %v2172_v3 = vadd.f32 %v6916_v22, %v5351_v48  ;;  %v2166_v49 = vpop.f32.mrb[3].mxu1  ;;  %v2916_v55 = vld [vmem:[%s7989_s2 + $0xa0] sm:$0xff] }
 0x3ce   : > { %v2502_v14 = vmax.f32 %v2500_v16, %v2501_v17  ;;  %v2167_v4 = vadd.f32 %v6916_v22, %v2166_v49  ;;  %v5514_v17 = vpack.c.bf16 %v2916_v55, %v2915_v39  ;;  %v3125_v48 = vld [vmem:[%s7134_s13] sm:$0xff]  ;;  %v3126_v16 = vld [vmem:[%s7134_s13 + $0x8] sm:$0xff]  ;;  %v3128_v49 = vld [vmem:[%s7134_s13 + $0x18] sm:$0xff] }
 0x3cf   : > { %v2238_v10 = vmax.f32 %v2172_v3, 0.0  ;;  %3160 = vperm.xlu1 %5684, %v3125_v48   ;;  %3356 = vperm.xlu0 %5685, %v3125_v48   ;;  %v3129_v3 = vld [vmem:[%s7134_s13 + $0x20] sm:$0xff] }
 0x3d0   : > { %v2503_v23 = vrot.slane %v2502_v14, 4  ;;  %v2237_v42 = vmax.f32 %v2167_v4, 0.0  ;;  %v5362_v7 = vpop.f32.mrb[4].mxu1  ;;  %v7142_v4 = vld [vmem:[%s7134_s13 + $0x60] sm:$0xff] }
 0x3d1   : > { %v2519_v56 = vsel %vm1597_vm0, %v2238_v10, -inf  ;;  %v2683_v37 = vadd.f32 %v5362_v7, %v5034_v12  ;;  %v2677_v32 = vpop.f32.mrb[5].mxu1  ;;  %v7151_v10 = vld [vmem:[%s7134_s13 + $0xa0] sm:$0xff]  ;;  %v7161_v7 = vld [vmem:[%s7134_s13 + $0x70] sm:$0xff] }
 0x3d2   : > { %v2504_v52 = vmax.f32 %v2502_v14, %v2503_v23  ;;  %v2518_v27 = vsel %vm1597_vm0, %v2237_v42, -inf  ;;  %v2678_v22 = vadd.f32 %v5034_v12, %v2677_v32  ;;  %v3133_v14 = vld [vmem:[%s7134_s13 + $0x40] sm:$0xff]  ;;  %v3135_v23 = vld [vmem:[%s7134_s13 + $0x50] sm:$0xff]  ;;  %v7175_v32 = vld [vmem:[%s7134_s13 + $0x48] sm:$0xff] }
 0x3d3   : > { %v2520_v21 = vmax.f32 %v2518_v27, %v2519_v56  ;;  %4851 = vst.msk [vmem:[%s6553_s9 + $0x28] sm:$0xff] %vm2703_vm8, %v2683_v37  ;;  %3165 = vperm.xlu1 %5684, %v3126_v16   ;;  %3372 = vperm.xlu0 %5685, %v3129_v3   ;;  %v7158_v42 = vld [vmem:[%s7134_s13 + $0x10] sm:$0xff]  ;;  %v7166_v56 = vld [vmem:[%s7134_s13 + $0x28] sm:$0xff]  ;;  %v7193_v27 = vld [vmem:[%s7134_s13 + $0x38] sm:$0xff] }
 0x3d4   : > { %v2505_v44 = vrot.slane %v2504_v52, 2  ;;  %4850 = vst.msk [vmem:[%s6553_s9 + $0x8] sm:$0xff] %vm2703_vm8, %v2678_v22 }
 0x3d5   : > { %v2521_v30 = vrot.slane %v2520_v21, 4 }
 0x3d6   : > { %v2506_v9 = vmax.f32 %v2504_v52, %v2505_v44  ;;  %v7180_v52 = vld [vmem:[%s7134_s13 + $0xb0] sm:$0xff] }
 0x3d7   : > { %v2522_v25 = vmax.f32 %v2520_v21, %v2521_v30  ;;  %3175 = vperm.xlu1 %5684, %v3128_v49   ;;  %3388 = vperm.xlu0 %5685, %v3133_v14  }
 0x3d8   : > { %v2507_v62 = vrot.slane %v2506_v9, 1 }
 0x3d9   : > { %v2523_v28 = vrot.slane %v2522_v25, 2 }
 0x3da   : > { %v2508_v20 = vmax.f32 %v2506_v9, %v2507_v62 }
 0x3db   : > { %v2524_v47 = vmax.f32 %v2522_v25, %v2523_v28  ;;  %3180 = vperm.xlu1 %5684, %v3129_v3   ;;  %3404 = vperm.xlu0 %5685, %v7142_v4  }
 0x3dc   : > { %v2600_v50 = vsel %vm2576_vm5, %v2508_v20, %v2599_v26 }
 0x3dd   : > { %v2525_v57 = vrot.slane %v2524_v47, 1  ;;  %v2601_v24 = vsel %vm2578_vm6, %v2517_v35, %v2600_v50  ;;  %v3024_v50 = vld [vmem:[%s7989_s2 + $0xb0] sm:$0xff] }
 0x3df   : > { %v2526_v19 = vmax.f32 %v2524_v47, %v2525_v57  ;;  %3420 = vperm.xlu0 %5685, %v7147_v2   ;;  %v3138_v47 = vld [vmem:[%s7134_s13 + $0x68] sm:$0xff]  ;;  %v3025_v57 = vld [vmem:[%s7989_s2 + $0xb8] sm:$0xff] }
 0x3e1   : > { %v2602_v43 = vsel %vm2580_vm7, %v2526_v19, %v2601_v24  ;;  %v5518_v24 = vpack.c.bf16 %v3025_v57, %v3024_v50  ;;  %v3026_v19 = vld [vmem:[%s7989_s2 + $0xc0] sm:$0xff] }
 0x3e2   : > { %5364 = vmatmul.mubr.msk.f32.gmra.mrb[6].mxu1 %vm1597_vm0, %v2602_v43  ;;  %4861 = vst.msk [vmem:[%s6553_s9 + $0x70] sm:$0xff] %vm1597_vm0, %v2602_v43  ;;  %v3027_v43 = vld [vmem:[%s7989_s2 + $0xc8] sm:$0xff] }
 0x3e3   : > { %5370 = vmatprep.mubr.msk.f32.mxu1 %vm2703_vm8, %v2678_v22  ;;  %3436 = vperm.xlu0 %5685, %v7151_v10   ;;  %v7203_v22 = vld [vmem:[%s7134_s13 + $0x58] sm:$0xff]  ;;  %v5522_v29 = vpack.c.bf16 %v3027_v43, %v3026_v19 }
 0x3e6   : > { %5371 = vmatmul.mubr.msk.f32.vlgmr.msra.gmra.mrb[8].mxu1 %vm2703_vm8, %v2683_v37  ;;  %v7171_v37 = vld [vmem:[%s7134_s13 + $0x90] sm:$0xff] }
 0x3e7   : > { %5501 = vmatpush3.bf16.msra.mxu1 %v5498_v11  ;;  %5706 = vset.pattern.permute.xlu0 %v8011_v59  ;;  %v3142_v11 = vld [vmem:[%s7134_s13 + $0x88] sm:$0xff] }
 0x3e8   : > { %5503 = vmatprep.subr.bf16.mxu1 %v5502_v5  ;;  %3557 = vperm.xlu0 %5706, %v3126_v16  }
 0x3eb   : > { %5505 = vmatpush3.bf16.msra.mxu1 %v5502_v5 }
 0x3ec   : > { %5507 = vmatprep.subr.bf16.mxu1 %v5506_v6  ;;  %3561 = vperm.xlu0 %5706, %v7158_v42  }
 0x3f0   : > { %3573 = vperm.xlu0 %5706, %v7166_v56  }
 0x44e   : > { %v7242_v18 = vpop.permute.xlu1 %3160  ;;  %v7309_v55 = vpop.permute.xlu0 %3356 }
 0x452   : > { %v7247_v51 = vpop.permute.xlu1 %3165 }
 0x456   : > { %v7251_v5 = vpop.permute.xlu1 %3175 }
 0x45a   : > { %v7255_v54 = vpop.permute.xlu1 %3180 }
 0x4b5   : > { %v5365_v60 = vpop.f32.mrb[6].mxu1 }
 0x4b6   : > { %v2693_v36 = vadd.f32 %v5365_v60, %v5034_v12  ;;  %v2687_v1 = vpop.f32.mrb[7].mxu1 }
 0x4b7   : > { %v2688_v41 = vadd.f32 %v5034_v12, %v2687_v1  ;;  %v3131_v12 = vld [vmem:[%s7134_s13 + $0x30] sm:$0xff] }
 0x4b8   : > { %4853 = vst.msk [vmem:[%s6553_s9 + $0x68] sm:$0xff] %vm2703_vm8, %v2693_v36  ;;  %3190 = vperm.xlu1 %5684, %v3131_v12   ;;  %3577 = vperm.xlu0 %5706, %v3131_v12  }
 0x4b9   : > { %4852 = vst.msk [vmem:[%s6553_s9 + $0x48] sm:$0xff] %vm2703_vm8, %v2688_v41  ;;  %v5372_v8 = vpop.f32.mrb[8].mxu1  ;;  %5373 = vmatprep.mubr.msk.f32.mxu1 %vm2703_vm8, %v2688_v41  ;;  %v3144_v41 = vld [vmem:[%s7134_s13 + $0x98] sm:$0xff] }
 0x4ba   : > { %v2788_v34 = vadd.f32 %v5372_v8, %v7106_v53  ;;  %v2782_v26 = vpop.f32.mrb[9].mxu1  ;;  %5374 = vmatmul.mubr.msk.f32.gmra.mrb[10].mxu1 %vm2703_vm8, %v2693_v36 }
 0x4bb   : > { %v2783_v46 = vadd.f32 %v7106_v53, %v2782_v26 }
 0x4bc   : > { %v2802_v40 = vmax.f32 %v2788_v34, 0.0  ;;  %3200 = vperm.xlu1 %5684, %v3133_v14   ;;  %3589 = vperm.xlu0 %5706, %v7175_v32  }
 0x4bd   : > { %v2801_v33 = vmax.f32 %v2783_v46, 0.0 }
 0x4bf   : > { %5384 = vmatprep.mubr.msk.f32.mxu1 %vm1597_vm0, %v2801_v33 }
 0x4c0   : > { %5385 = vmatmul.mubr.msk.f32.vlgmr.msra.gmra.mrb[12].mxu1 %vm1597_vm0, %v2802_v40  ;;  %3210 = vperm.xlu1 %5684, %v3135_v23   ;;  %v7296_v40 = vld [vmem:[%s7134_s13 + $0xb8] sm:$0xff] }
 0x4c1   : > { %5509 = vmatpush3.bf16.msra.mxu1 %v5506_v6  ;;  %3593 = vperm.xlu0 %5706, %v3135_v23  }
 0x4c2   : > { %5511 = vmatprep.subr.bf16.mxu1 %v5510_v38 }
 0x4c4   : > { %3220 = vperm.xlu1 %5684, %v7142_v4  }
 0x4c5   : > { %5513 = vmatpush3.bf16.msra.mxu1 %v5510_v38  ;;  %3605 = vperm.xlu0 %5706, %v3138_v47  }
 0x4c6   : > { %5515 = vmatprep.subr.bf16.mxu1 %v5514_v17 }
 0x4c8   : > { %3230 = vperm.xlu1 %5684, %v7161_v7  }
 0x4c9   : > { %5517 = vmatpush3.bf16.msra.mxu1 %v5514_v17  ;;  %3609 = vperm.xlu0 %5706, %v7161_v7  }
 0x4ca   : > { %5519 = vmatprep.subr.bf16.mxu1 %v5518_v24 }
 0x4cc   : > { %3240 = vperm.xlu1 %5684, %v7147_v2  }
 0x4cd   : > { %3621 = vperm.xlu0 %5706, %v3142_v11  }
 0x4d0   : > { %3250 = vperm.xlu1 %5684, %v7171_v37  }
 0x4d1   : > { %3625 = vperm.xlu0 %5706, %v7171_v37  }
 0x4d4   : > { %3260 = vperm.xlu1 %5684, %v7151_v10  }
 0x4d5   : > { %3637 = vperm.xlu0 %5706, %v3146_v45  }
 0x4d8   : > { %3270 = vperm.xlu1 %5684, %v7180_v52  }
 0x4d9   : > { %5709 = vset.pattern.permute.xlu0 %v8013_v13 }
 0x4da   : > { %3170 = vperm.xlu0 %5709, %v7158_v42  }
 0x4dc   : > { %5686 = vset.pattern.permute.xlu1 %v8016_v58 }
 0x4dd   : > { %3360 = vperm.xlu1 %5686, %v3126_v16  }
 0x4de   : > { %3185 = vperm.xlu0 %5709, %v7166_v56  }
 0x4e1   : > { %5687 = vset.pattern.permute.xlu1 %v8011_v59 }
 0x4e2   : > { %3553 = vperm.xlu1 %5687, %v3125_v48   ;;  %3195 = vperm.xlu0 %5709, %v7193_v27   ;;  %v7315_v48 = vpop.permute.xlu0 %3372 }
 0x4e6   : > { %5688 = vset.pattern.permute.xlu1 %v8016_v58  ;;  %3205 = vperm.xlu0 %5709, %v7175_v32  }
 0x4e7   : > { %3364 = vperm.xlu1 %5688, %v7158_v42  }
 0x4ea   : > { %3215 = vperm.xlu0 %5709, %v7203_v22  }
 0x4eb   : > { %3368 = vperm.xlu1 %5688, %v3128_v49  }
 0x4ee   : > { %3225 = vperm.xlu0 %5709, %v3138_v47  }
 0x4ef   : > { %5689 = vset.pattern.permute.xlu1 %v8011_v59 }
 0x4f0   : > { %3565 = vperm.xlu1 %5689, %v3128_v49  }
 0x4f2   : > { %3235 = vperm.xlu0 %5709, %v3140_v0  }
 0x4f4   : > { %5690 = vset.pattern.permute.xlu1 %v8016_v58 }
 0x4f5   : > { %3376 = vperm.xlu1 %5690, %v7166_v56  }
 0x4f6   : > { %3245 = vperm.xlu0 %5709, %v3142_v11  }
 0x4f9   : > { %5691 = vset.pattern.permute.xlu1 %v8011_v59 }
 0x4fa   : > { %3569 = vperm.xlu1 %5691, %v3129_v3   ;;  %3255 = vperm.xlu0 %5709, %v3144_v41   ;;  %v7320_v3 = vld [vmem:[%s7134_s13 + $0xc8] sm:$0xff] }
 0x4fe   : > { %5692 = vset.pattern.permute.xlu1 %v8016_v58  ;;  %3265 = vperm.xlu0 %5709, %v3146_v45  }
 0x4ff   : > { %3380 = vperm.xlu1 %5692, %v3131_v12  }
 0x502   : > { %3280 = vperm.xlu0 %5709, %v3149_v15  }
 0x503   : > { %3384 = vperm.xlu1 %5692, %v7193_v27  }
 0x507   : > { %5693 = vset.pattern.permute.xlu1 %v8011_v59 }
 0x508   : > { %3581 = vperm.xlu1 %5693, %v7193_v27  }
 0x50c   : > { %5694 = vset.pattern.permute.xlu1 %v8016_v58 }
 0x50d   : > { %3392 = vperm.xlu1 %5694, %v7175_v32  }
 0x511   : > { %5695 = vset.pattern.permute.xlu1 %v8011_v59 }
 0x512   : > { %3585 = vperm.xlu1 %5695, %v3133_v14   ;;  %v7326_v14 = vpop.permute.xlu0 %3388 }
 0x516   : > { %5696 = vset.pattern.permute.xlu1 %v8016_v58  ;;  %v7331_v12 = vpop.permute.xlu0 %3404 }
 0x517   : > { %3396 = vperm.xlu1 %5696, %v3135_v23  }
 0x51a   : > { %v3421_v23 = vpop.permute.xlu0 %3420 }
 0x51b   : > { %3400 = vperm.xlu1 %5696, %v7203_v22  }
 0x51f   : > { %5697 = vset.pattern.permute.xlu1 %v8011_v59 }
 0x520   : > { %3597 = vperm.xlu1 %5697, %v7203_v22  }
 0x524   : > { %5698 = vset.pattern.permute.xlu1 %v8016_v58 }
 0x525   : > { %3408 = vperm.xlu1 %5698, %v3138_v47  }
 0x529   : > { %5699 = vset.pattern.permute.xlu1 %v8011_v59 }
 0x52a   : > { %3601 = vperm.xlu1 %5699, %v7142_v4  }
 0x52e   : > { %5700 = vset.pattern.permute.xlu1 %v8016_v58 }
 0x52f   : > { %3412 = vperm.xlu1 %5700, %v7161_v7   ;;  %v7341_v7 = vpop.permute.xlu0 %3436 }
 0x530   : > { %8048 = vst [vmem:[#allocation7_spill] sm:$0xff] %v7341_v7 }
 0x533   : > { %3416 = vperm.xlu1 %5700, %v3140_v0  }
 0x537   : > { %5701 = vset.pattern.permute.xlu1 %v8011_v59  ;;  %v7259_v6 = vpop.permute.xlu1 %3190 }
 0x538   : > { %3613 = vperm.xlu1 %5701, %v3140_v0  }
 0x53b   : > { %v7263_v60 = vpop.permute.xlu1 %3200 }
 0x53c   : > { %5702 = vset.pattern.permute.xlu1 %v8016_v58 }
 0x53d   : > { %3424 = vperm.xlu1 %5702, %v3142_v11  }
 0x53f   : > { %v7268_v36 = vpop.permute.xlu1 %3210 }
 0x541   : > { %5703 = vset.pattern.permute.xlu1 %v8011_v59 }
 0x542   : > { %3617 = vperm.xlu1 %5703, %v7147_v2  }
 0x543   : > { %v7273_v1 = vpop.permute.xlu1 %3220 }
 0x546   : > { %5704 = vset.pattern.permute.xlu1 %v8016_v58 }
 0x547   : > { %3428 = vperm.xlu1 %5704, %v7171_v37   ;;  %v7345_v37 = vpop.permute.xlu0 %3557 }
 0x54b   : > { %3432 = vperm.xlu1 %5704, %v3144_v41  }
 0x54f   : > { %5705 = vset.pattern.permute.xlu1 %v8011_v59 }
 0x550   : > { %3629 = vperm.xlu1 %5705, %v3144_v41   ;;  %v7395_v41 = vld [vmem:[%s7989_s2 + $0xa8] ss:$0 sm:$0xff] }
 0x554   : > { %5707 = vset.pattern.permute.xlu1 %v8016_v58 }
 0x555   : > { %3440 = vperm.xlu1 %5707, %v3146_v45  }
 0x559   : > { %5708 = vset.pattern.permute.xlu1 %v8011_v59 }
 0x55a   : > { %3633 = vperm.xlu1 %5708, %v7151_v10  }
 0x55e   : > { %5710 = vset.pattern.permute.xlu1 %v8016_v58 }
 0x55f   : > { %3444 = vperm.xlu1 %5710, %v7180_v52  }
 0x563   : > { %5711 = vset.pattern.permute.xlu1 %v8013_v13 }
 0x564   : > { %3275 = vperm.xlu1 %5711, %v7296_v40  }
 0x568   : > { %5712 = vset.pattern.permute.xlu1 %v8011_v59 }
 0x569   : > { %3641 = vperm.xlu1 %5712, %v7180_v52   ;;  %v7349_v52 = vpop.permute.xlu0 %3561 }
 0x56d   : > { %3645 = vperm.xlu1 %5712, %v7296_v40   ;;  %v7353_v22 = vpop.permute.xlu0 %3573 }
 0x571   : > { %5713 = vset.pattern.permute.xlu1 %v8016_v58 }
 0x572   : > { %3452 = vperm.xlu1 %5713, %v3149_v15  }
 0x576   : > { %5714 = vset.pattern.permute.xlu1 %v8013_v13 }
 0x577   : > { %3285 = vperm.xlu1 %5714, %v7320_v3  }
 0x57b   : > { %5715 = vset.pattern.permute.xlu1 %v8011_v59 }
 0x57c   : > { %3649 = vperm.xlu1 %5715, %v3149_v15   ;;  %v7400_v15 = vld [vmem:[%s7989_s2 + $0xa9] ss:$0 sm:$0xff] }
 0x580   : > { %3653 = vperm.xlu1 %5715, %v7320_v3  }
 0x584   : > { %5716 = vset.pattern.permute.xlu1 %v8016_v58 }
 0x58d   : > { %v5375_v61 = vpop.f32.mrb[10].mxu1 }
 0x58e   : > { %v2798_v21 = vadd.f32 %v5375_v61, %v7106_v53  ;;  %v2792_v44 = vpop.f32.mrb[11].mxu1 }
 0x58f   : > { %v2793_v30 = vadd.f32 %v7106_v53, %v2792_v44  ;;  %v7277_v53 = vpop.permute.xlu1 %3230 }
 0x590   : > { %v2804_v25 = vmax.f32 %v2798_v21, 0.0 }
 0x591   : > { %v2803_v9 = vmax.f32 %v2793_v30, 0.0 }
 0x593   : > { %v5386_v62 = vpop.f32.mrb[12].mxu1  ;;  %5387 = vmatprep.mubr.msk.f32.mxu1 %vm1597_vm0, %v2803_v9  ;;  %v7280_v8 = vpop.permute.xlu1 %3240 }
 0x594   : > { %v2898_v28 = vadd.f32 %v5386_v62, %v7211_v31  ;;  %v2892_v20 = vpop.f32.mrb[13].mxu1  ;;  %5388 = vmatmul.mubr.msk.f32.gmra.mrb[14].mxu1 %vm1597_vm0, %v2804_v25  ;;  %v7362_v25 = vld [vmem:[%s7990_s3 + $0x5] ss:$0 sm:$0xff]  ;;  %v7364_v62 = vpop.permute.xlu0 %3577 }
 0x595   : > { %v2893_v35 = vadd.f32 %v7211_v31, %v2892_v20 }
 0x596   : > { %4863 = vst.msk [vmem:[%s6553_s9 + $0x38] sm:$0xff] %vm2922_vm9, %v2898_v28 }
 0x597   : > { %4862 = vst.msk [vmem:[%s6553_s9 + $0x18] sm:$0xff] %vm2922_vm9, %v2893_v35  ;;  %5402 = vmatprep.mubr.msk.f32.mxu1 %vm2922_vm9, %v2893_v35  ;;  %v7282_v34 = vpop.permute.xlu1 %3250 }
 0x598   : > { %5403 = vmatmul.mubr.msk.f32.vlgmr.msra.gmra.mrb[16].mxu1 %vm2922_vm9, %v2898_v28  ;;  %v7376_v57 = vpop.permute.xlu0 %3589 }
 0x599   : > { %5521 = vmatpush3.bf16.msra.mxu1 %v5518_v24 }
 0x59a   : > { %5523 = vmatprep.subr.bf16.mxu1 %v5522_v29 }
 0x59b   : > { %v7285_v26 = vpop.permute.xlu1 %3260 }
 0x59c   : > { %8046 = vst [vmem:[#allocation5_spill] sm:$0xff] %v7285_v26 }
 0x59d   : > { %5525 = vmatpush3.bf16.msra.mxu1 %v5522_v29  ;;  %v7384_v29 = vpop.permute.xlu0 %3593 }
 0x59f   : > { %v7289_v46 = vpop.permute.xlu1 %3270 }
 0x5a0   : > { %8047 = vst [vmem:[#allocation6_spill] sm:$0xff] %v7289_v46 }
 0x5a1   : > { %v7388_v0 = vpop.permute.xlu0 %3605 }
 0x5a2   : > { %8052 = vst [vmem:[#allocation11_spill] sm:$0xff] %v7388_v0 }
 0x5a3   : > { %v7293_v33 = vpop.permute.xlu1 %3360 }
 0x5a7   : > { %v7299_v63 = vpop.permute.xlu1 %3553 }
 0x5ab   : > { %v7303_v38 = vpop.permute.xlu1 %3364 }
 0x5af   : > { %v7307_v39 = vpop.permute.xlu1 %3368 }
 0x5b3   : > { %v7312_v17 = vpop.permute.xlu1 %3565 }
 0x5b7   : > { %v7317_v16 = vpop.permute.xlu1 %3376 }
 0x5bb   : > { %v7323_v49 = vpop.permute.xlu1 %3569 }
 0x5bf   : > { %v7328_v4 = vpop.permute.xlu1 %3380 }
 0x5c3   : > { %v7333_v2 = vpop.permute.xlu1 %3384 }
 0x5c7   : > { %v7336_v10 = vpop.permute.xlu1 %3581 }
 0x5cb   : > { %v7339_v42 = vpop.permute.xlu1 %3392 }
 0x5cf   : > { %v7343_v56 = vpop.permute.xlu1 %3585 }
 0x5d3   : > { %v7347_v32 = vpop.permute.xlu1 %3396 }
 0x5d7   : > { %v7351_v27 = vpop.permute.xlu1 %3400 }
 0x5db   : > { %v7355_v61 = vpop.permute.xlu1 %3597 }
 0x5df   : > { %v7371_v20 = vpop.permute.xlu1 %3408 }
 0x5e0   : > { %8049 = vst [vmem:[#allocation8_spill] sm:$0xff] %v7371_v20 }
 0x5e3   : > { %v7378_v19 = vpop.permute.xlu1 %3601 }
 0x5e7   : > { %v7382_v43 = vpop.permute.xlu1 %3412 }
 0x5e8   : > { %8050 = vst [vmem:[#allocation9_spill] sm:$0xff] %v7382_v43 }
 0x5eb   : > { %v7386_v11 = vpop.permute.xlu1 %3416 }
 0x5ec   : > { %8051 = vst [vmem:[#allocation10_spill] sm:$0xff] %v7386_v11 }
 0x5ef   : > { %v7390_v45 = vpop.permute.xlu1 %3613 }
 0x5f0   : > { %8053 = vst [vmem:[#allocation12_spill] sm:$0xff] %v7390_v45 }
 0x667   : > { %v5389_v21 = vpop.f32.mrb[14].mxu1 }
 0x668   : > { %v2908_v44 = vadd.f32 %v5389_v21, %v7211_v31  ;;  %v2902_v30 = vpop.f32.mrb[15].mxu1  ;;  %v7402_v21 = vpop.permute.xlu0 %3609 }
 0x669   : > { %v2903_v9 = vadd.f32 %v7211_v31, %v2902_v30  ;;  %8054 = vst [vmem:[#allocation13_spill] sm:$0xff] %v7402_v21  ;;  %v3503_v30 = vmul.f32 %v7400_v15, %v3421_v23 }
 0x66a   : > { %4865 = vst.msk [vmem:[%s6553_s9 + $0x78] sm:$0xff] %vm2922_vm9, %v2908_v44 }
 0x66b   : > { %4864 = vst.msk [vmem:[%s6553_s9 + $0x58] sm:$0xff] %vm2922_vm9, %v2903_v9  ;;  %v5404_v28 = vpop.f32.mrb[16].mxu1  ;;  %5405 = vmatprep.mubr.msk.f32.mxu1 %vm2922_vm9, %v2903_v9  ;;  %v7407_v9 = vpop.permute.xlu1 %3424 }
 0x66c   : > { %v3007_v35 = vadd.f32 %v5404_v28, %v7362_v25  ;;  %v3001_v47 = vpop.f32.mrb[17].mxu1  ;;  %5406 = vmatmul.mubr.msk.f32.gmra.mrb[18].mxu1 %vm2922_vm9, %v2908_v44  ;;  %v3338_v44 = vmul.f32 %v7395_v41, %v7280_v8  ;;  %v7412_v28 = vld [vmem:[%s7989_s2 + $0xaa] ss:$0 sm:$0xff]  ;;  %v3340_v8 = vmul.f32 %v7395_v41, %v7282_v34 }
 0x66d   : > { %v3002_v31 = vadd.f32 %v7362_v25, %v3001_v47  ;;  %v7414_v47 = vpop.permute.xlu0 %3621 }
 0x66e   : > { %v3021_v24 = vmax.f32 %v3007_v35, 0.0  ;;  %v3535_v35 = vadd.f32 %v3503_v30, %v3338_v44  ;;  %v3151_v44 = vld [vmem:[%s7134_s13 + $0xd0] sm:$0xff] }
 0x66f   : > { %v3020_v50 = vmax.f32 %v3002_v31, 0.0  ;;  %v3618_v31 = vpop.permute.xlu1 %3617  ;;  %3460 = vperm.xlu1 %5716, %v3151_v44   ;;  %3290 = vperm.xlu0 %5709, %v3151_v44  }
 0x671   : > { %5416 = vmatprep.mubr.msk.f32.mxu1 %vm1597_vm0, %v3020_v50  ;;  %v3700_v50 = vmul.f32 %v7412_v28, %v3618_v31  ;;  %v3626_v46 = vpop.permute.xlu0 %3625  ;;  %v3152_v31 = vld [vmem:[%s7134_s13 + $0xd8] sm:$0xff] }
 0x672   : > { %5417 = vmatmul.mubr.msk.f32.vlgmr.msra.gmra.mrb[20].mxu1 %vm1597_vm0, %v3021_v24  ;;  %v3702_v26 = vmul.f32 %v7412_v28, %v3626_v46  ;;  %v4210_v46 = vld [vmem:[%s7989_s2 + $0xd8] sm:$0xff] }
 0x673   : > { %v7417_v24 = vadd.f32 %v3700_v50, %v3535_v35  ;;  %v3429_v23 = vpop.permute.xlu1 %3428  ;;  %5717 = vset.pattern.permute.xlu1 %v8013_v13  ;;  %v3793_v35 = vlaneseq }
 0x674   : > { %v3505_v7 = vmul.f32 %v7400_v15, %v3429_v23  ;;  %3295 = vperm.xlu1 %5717, %v3152_v31  }
 0x675   : > { %8055 = vst [vmem:[#allocation14_spill] sm:$0xff] %v7417_v24  ;;  %v7426_v30 = vpop.permute.xlu0 %3637 }
 0x676   : > { %v3537_v45 = vadd.f32 %v3505_v7, %v3340_v8  ;;  %8057 = vst [vmem:[#allocation16_spill] sm:$0xff] %v7426_v30  ;;  %v7439_v7 = vshrl.u32 %v3793_v35, 7  ;;  %v3504_v30 = vmul.f32 %v7400_v15, %v7407_v9 }
 0x677   : > { %v3433_v24 = vpop.permute.xlu1 %3432 }
 0x678   : > { %v7423_v21 = vadd.f32 %v3702_v26, %v3537_v45  ;;  %5718 = vset.pattern.permute.xlu1 %v8011_v59  ;;  %v4209_v26 = vld [vmem:[%s7989_s2 + $0xd0] sm:$0xff]  ;;  %v4684_v45 = vand.u32 127, %v3793_v35  ;;  %v3506_v11 = vmul.f32 %v7400_v15, %v3433_v24  ;;  %v3323_v24 = vmul.f32 %v7395_v41, %v7247_v51 }
 0x679   : > { %v7430_v34 = vpop.permute.xlu0 %3170  ;;  %3657 = vperm.xlu1 %5718, %v3151_v44   ;;  %v5526_v50 = vpack.c.bf16 %v4210_v46, %v4209_v26  ;;  %v4211_v44 = vld [vmem:[%s7989_s2 + $0xe0] sm:$0xff]  ;;  %v3325_v51 = vmul.f32 %v7395_v41, %v7251_v5  ;;  %v3493_v5 = vmul.f32 %v7400_v15, %v7328_v4  ;;  %v3686_v4 = vmul.f32 %v7412_v28, %v7349_v52 }
 0x67a   : > { %8056 = vst [vmem:[#allocation15_spill] sm:$0xff] %v7423_v21  ;;  %v7442_v8 = vsub.s32 %v4684_v45, %v7439_v7  ;;  %v4212_v21 = vld [vmem:[%s7989_s2 + $0xe8] sm:$0xff]  ;;  %v3153_v26 = vld [vmem:[%s7134_s13 + $0xe0] sm:$0xff]  ;;  %v3690_v52 = vmul.f32 %v7412_v28, %v7364_v62  ;;  %v7555_v62 = vmul.f32 %v7412_v28, %v7376_v57 }
 0x67b   : > { %5527 = vmatprep.subr.bf16.mxu1 %v5526_v50  ;;  %v5530_v35 = vpack.c.bf16 %v4212_v21, %v4211_v44  ;;  %3300 = vperm.xlu0 %5709, %v3153_v26   ;;  %v3154_v45 = vld [vmem:[%s7134_s13 + $0xe8] sm:$0xff]  ;;  %v3155_v44 = vld [vmem:[%s7134_s13 + $0xf0] sm:$0xff] }
 0x67c   : > { %8058 = vst [vmem:[#allocation17_spill] sm:$0xff] %v7442_v8  ;;  %5529 = vmatpush3.bf16.msra.mxu1 %v5526_v50  ;;  %v3156_v8 = vld [vmem:[%s7134_s13 + $0xf8] sm:$0xff] }
 0x67d   : > { %v7444_v23 = vpop.permute.xlu0 %3185  ;;  %3661 = vperm.xlu1 %5718, %v3152_v31   ;;  %5531 = vmatprep.subr.bf16.mxu1 %v5530_v35 }
 0x67f   : > { %3310 = vperm.xlu0 %5709, %v3155_v44  }
 0x680   : > { %5533 = vmatpush3.bf16.msra.mxu1 %v5530_v35 }
 0x681   : > { %5719 = vset.pattern.permute.xlu1 %v8016_v58  ;;  %v7454_v46 = vpop.permute.xlu0 %3195 }
 0x682   : > { %3468 = vperm.xlu1 %5719, %v3153_v26  }
 0x683   : > { %5722 = vset.pattern.permute.xlu0 %v8016_v58 }
 0x684   : > { %3448 = vperm.xlu0 %5722, %v7296_v40  }
 0x685   : > { %v7458_v50 = vpop.permute.xlu0 %3205 }
 0x686   : > { %5720 = vset.pattern.permute.xlu1 %v8013_v13 }
 0x687   : > { %3305 = vperm.xlu1 %5720, %v3154_v45  }
 0x688   : > { %3456 = vperm.xlu0 %5722, %v7320_v3  }
 0x689   : > { %v7461_v21 = vpop.permute.xlu0 %3215 }
 0x68b   : > { %5721 = vset.pattern.permute.xlu1 %v8011_v59 }
 0x68c   : > { %3665 = vperm.xlu1 %5721, %v3153_v26   ;;  %3464 = vperm.xlu0 %5722, %v3152_v31  }
 0x68d   : > { %v7464_v35 = vpop.permute.xlu0 %3225 }
 0x68e   : > { %8059 = vst [vmem:[#allocation18_spill] sm:$0xff] %v7464_v35 }
 0x690   : > { %3669 = vperm.xlu1 %5721, %v3154_v45   ;;  %3472 = vperm.xlu0 %5722, %v3154_v45  }
 0x691   : > { %v7472_v26 = vpop.permute.xlu0 %3235 }
 0x692   : > { %8060 = vst [vmem:[#allocation19_spill] sm:$0xff] %v7472_v26  ;;  %v3630_v26 = vpop.permute.xlu1 %3629 }
 0x693   : > { %v3703_v35 = vmul.f32 %v7412_v28, %v3630_v26 }
 0x694   : > { %5723 = vset.pattern.permute.xlu1 %v8016_v58  ;;  %v3701_v58 = vmul.f32 %v7412_v28, %v7414_v47  ;;  %3480 = vperm.xlu0 %5722, %v3156_v8   ;;  %v3487_v47 = vmul.f32 %v7400_v15, %v7309_v55 }
 0x695   : > { %3476 = vperm.xlu1 %5723, %v3155_v44   ;;  %v3246_v0 = vpop.permute.xlu0 %3245 }
 0x696   : > { %v3339_v40 = vmul.f32 %v7395_v41, %v3246_v0  ;;  %v3322_v0 = vmul.f32 %v7395_v41, %v7242_v18  ;;  %v3495_v18 = vmul.f32 %v7400_v15, %v7326_v14  ;;  %v3685_v14 = vmul.f32 %v7412_v28, %v7345_v37 }
 0x697   : > { %v3332_v37 = vmul.f32 %v7395_v41, %v7268_v36  ;;  %v7538_v36 = vld [vmem:[%s7990_s3 + $0x6] ss:$0 sm:$0xff] }
 0x698   : > { %v3536_v3 = vadd.f32 %v3504_v30, %v3339_v40  ;;  %5727 = vset.pattern.permute.xlu0 %v8013_v13  ;;  %v3491_v30 = vmul.f32 %v7400_v15, %v7315_v48  ;;  %v3499_v48 = vmul.f32 %v7400_v15, %v7331_v12  ;;  %v3687_v12 = vmul.f32 %v7412_v28, %v7312_v17 }
 0x699   : > { %5724 = vset.pattern.permute.xlu1 %v8013_v13  ;;  %v3256_v43 = vpop.permute.xlu0 %3255  ;;  %v3324_v17 = vmul.f32 %v7395_v41, %v7430_v34 }
 0x69a   : > { %3315 = vperm.xlu1 %5724, %v3156_v8   ;;  %v7482_v9 = vadd.f32 %v3701_v58, %v3536_v3 }
 0x69e   : > { %5725 = vset.pattern.permute.xlu1 %v8011_v59  ;;  %v3341_v59 = vmul.f32 %v7395_v41, %v3256_v43  ;;  %v3326_v43 = vmul.f32 %v7395_v41, %v7255_v54  ;;  %v3490_v54 = vmul.f32 %v7400_v15, %v7307_v39 }
 0x69f   : > { %3673 = vperm.xlu1 %5725, %v3155_v44   ;;  %v3519_v44 = vadd.f32 %v3487_v47, %v3322_v0  ;;  %v3489_v0 = vmul.f32 %v7400_v15, %v7303_v38  ;;  %v7547_v38 = vmul.f32 %v7395_v41, %v7277_v53 }
 0x6a0   : > { %v3538_v31 = vadd.f32 %v3506_v11, %v3341_v59  ;;  %v3488_v11 = vmul.f32 %v7400_v15, %v7293_v33  ;;  %v3334_v33 = vmul.f32 %v7395_v41, %v7273_v1  ;;  %v3684_v1 = vmul.f32 %v7412_v28, %v7299_v63 }
 0x6a1   : > { %v3522_v40 = vadd.f32 %v3490_v54, %v3325_v51  ;;  %v3688_v63 = vmul.f32 %v7412_v28, %v7323_v49  ;;  %v7563_v51 = vmul.f32 %v7412_v28, %v7384_v29  ;;  %v3696_v29 = vmul.f32 %v7412_v28, %v7378_v19 }
 0x6a2   : > { %v7485_v20 = vadd.f32 %v3703_v35, %v3538_v31  ;;  %v3520_v45 = vadd.f32 %v3488_v11, %v3323_v24  ;;  %v3328_v35 = vmul.f32 %v7395_v41, %v7259_v6  ;;  %v3531_v6 = vadd.f32 %v3499_v48, %v3334_v33 }
 0x6a3   : > { %3677 = vperm.xlu1 %5725, %v3156_v8   ;;  %v5819_v8 = vmov 1966171168   ;;  %v3719_v49 = vadd.f32 %v3687_v12, %v3522_v40  ;;  %v3716_v11 = vadd.f32 %v3684_v1, %v3519_v44 }
 0x6a4   : > { %v3791_v55 = vunpack.c.l.s4 %v5819_v8  ;;  %v3717_v47 = vadd.f32 %v3685_v14, %v3520_v45  ;;  %v3525_v24 = vadd.f32 %v3493_v5, %v3328_v35  ;;  %v3692_v45 = vmul.f32 %v7412_v28, %v7343_v56 }
 0x6a5   : > { %v3753_v44 = vadd.f32 %v7538_v36, %v3716_v11  ;;  %v3329_v56 = vmul.f32 %v7395_v41, %v7454_v46 }
 0x6a6   : > { %v3792_v58 = vunpack.c.0.s8 %v3791_v55  ;;  %v3754_v55 = vadd.f32 %v7538_v36, %v3717_v47  ;;  %v3498_v47 = vmul.f32 %v7400_v15, %v7351_v27 }
 0x6a7   : > { %5726 = vset.pattern.permute.xlu1 %v8013_v13  ;;  %v3330_v13 = vmul.f32 %v7395_v41, %v7263_v60  ;;  %v3523_v60 = vadd.f32 %v3491_v30, %v3326_v43  ;;  %v3492_v30 = vmul.f32 %v7400_v15, %v7317_v16  ;;  %v3521_v16 = vadd.f32 %v3489_v0, %v3324_v17 }
 0x6a8   : > { %v7543_v43 = vsub.s32 %v3792_v58, %v7439_v7 }
 0x6a9   : > { %v3527_v26 = vadd.f32 %v3495_v18, %v3330_v13  ;;  %v3689_v13 = vmul.f32 %v7412_v28, %v7353_v22  ;;  %v3327_v18 = vmul.f32 %v7395_v41, %v7444_v23  ;;  %v3720_v53 = vadd.f32 %v3688_v63, %v3523_v60 }
 0x6aa   : > { %v3722_v22 = vadd.f32 %v3690_v52, %v3525_v24  ;;  %v3756_v23 = vadd.f32 %v7538_v36, %v3719_v49  ;;  %v3497_v60 = vmul.f32 %v7400_v15, %v7347_v32  ;;  %v3718_v1 = vadd.f32 %v3686_v4, %v3521_v16 }
 0x6ab   : > { %v3524_v14 = vadd.f32 %v3492_v30, %v3327_v18  ;;  %v3757_v58 = vadd.f32 %v7538_v36, %v3720_v53  ;;  %v7594_v4 = vsub.s32 0, %v7439_v7 }
 0x6ac   : > { %v7582_v40 = vadd.f32 %v7538_v36, %v3722_v22  ;;  %v3529_v46 = vadd.f32 %v3497_v60, %v3332_v37  ;;  %v3755_v17 = vadd.f32 %v7538_v36, %v3718_v1 }
 0x6ad   : > { %v3721_v0 = vadd.f32 %v3689_v13, %v3524_v14 }
 0x6ae   : > { %v3726_v1 = vadd.f32 %v7563_v51, %v3529_v46 }
 0x6af   : > { %v3758_v49 = vadd.f32 %v7538_v36, %v3721_v0 }
 0x73f   : > { %v5407_v39 = vpop.f32.mrb[18].mxu1 }
 0x740   : > { %v3017_v3 = vadd.f32 %v5407_v39, %v7362_v25  ;;  %v3011_v59 = vpop.f32.mrb[19].mxu1  ;;  %v3494_v39 = vmul.f32 %v7400_v15, %v7333_v2  ;;  %v3496_v2 = vmul.f32 %v7400_v15, %v7339_v42 }
 0x741   : > { %v3012_v31 = vadd.f32 %v7362_v25, %v3011_v59  ;;  %v3728_v59 = vadd.f32 %v3696_v29, %v3531_v6 }
 0x742   : > { %v3023_v34 = vmax.f32 %v3017_v3, 0.0  ;;  %v3691_v3 = vmul.f32 %v7412_v28, %v7336_v10  ;;  %v3526_v24 = vadd.f32 %v3494_v39, %v3329_v56  ;;  %v3331_v10 = vmul.f32 %v7395_v41, %v7458_v50 }
 0x743   : > { %v3022_v25 = vmax.f32 %v3012_v31, 0.0  ;;  %v3724_v31 = vadd.f32 %v3692_v45, %v3527_v26  ;;  %v3765_v26 = vadd.f32 %v7538_v36, %v3728_v59  ;;  %v8062_v59 = vld [vmem:[#allocation18_spill] sm:$0xff] }
 0x744   : > { %v3723_v16 = vadd.f32 %v3691_v3, %v3526_v24  ;;  %v8063_v24 = vld [vmem:[#allocation9_spill] sm:$0xff] }
 0x745   : > { %v5418_v8 = vpop.f32.mrb[20].mxu1  ;;  %5419 = vmatprep.mubr.msk.f32.mxu1 %vm1597_vm0, %v3022_v25 }
 0x746   : > { %v3106_v54 = vpop.f32.mrb[21].mxu1  ;;  %5420 = vmatmul.mubr.msk.f32.gmra.mrb[22].mxu1 %vm1597_vm0, %v3023_v34  ;;  %v3838_v57 = vcombine.high %v5418_v8, %v5418_v8  ;;  %v3845_v6 = vrot.slane %v5418_v8, %v7543_v43  ;;  %v3760_v3 = vadd.f32 %v7538_v36, %v3723_v16 }
 0x747   : > { %v3789_v33 = vcombine.high %v3106_v54, %v3106_v54  ;;  %v3796_v48 = vrot.slane %v3106_v54, %v7543_v43  ;;  %v3528_v54 = vadd.f32 %v3496_v2, %v3331_v10 }
 0x748   : > { %v7585_v19 = vrot.slane %v3838_v57, %v7543_v43  ;;  %v3333_v57 = vmul.f32 %v7395_v41, %v7461_v21  ;;  %v3695_v21 = vmul.f32 %v7412_v28, %v7355_v61 }
 0x749   : > { %v3803_v35 = vrot.slane %v3789_v33, %v7543_v43  ;;  %v3804_v5 = vcombine.high %v3796_v48, %v3796_v48  ;;  %v3812_v32 = vrot.slane %v3796_v48, %v7543_v43  ;;  %v3853_v33 = vcombine.high %v3845_v6, %v3845_v6 }
 0x74a   : > { %v7604_v42 = vrot.slane %v7585_v19, %v7543_v43  ;;  %v3725_v56 = vadd.f32 %v7555_v62, %v3528_v54  ;;  %v3530_v2 = vadd.f32 %v3498_v47, %v3333_v57  ;;  %v3501_v47 = vmul.f32 %v7400_v15, %v8063_v24  ;;  %v3441_v24 = vpop.permute.xlu1 %3440 }
 0x74b   : > { %v3826_v12 = vrot.slane %v3804_v5, %v7543_v43  ;;  %v3805_v63 = vcombine.high %v3803_v35, %v3803_v35  ;;  %v3819_v52 = vrot.slane %v3803_v35, %v7543_v43  ;;  %v3834_v7 = vcombine.high %v3812_v32, %v3812_v32 }
 0x74c   : > { %v3988_v27 = vrot.slane %v3812_v32, %v7594_v4  ;;  %v4036_v8 = vrot.slane %v7604_v42, %v7594_v4  ;;  %v3875_v61 = vrot.slane %v3853_v33, %v7543_v43  ;;  %v3533_v16 = vadd.f32 %v3501_v47, %v7547_v38 }
 0x74d   : > { %v3836_v37 = vcombine.high %v3826_v12, %v3826_v12  ;;  %v3992_v25 = vrot.slane %v3826_v12, %v7594_v4  ;;  %v3833_v11 = vrot.slane %v3805_v63, %v7543_v43  ;;  %v3996_v50 = vrot.slane %v3834_v7, %v7594_v4  ;;  %v8065_v7 = vld [vmem:[#allocation11_spill] sm:$0xff] }
 0x74e   : > { %v3835_v30 = vcombine.high %v3819_v52, %v3819_v52  ;;  %v4004_v13 = vrot.slane %v3819_v52, %v7594_v4  ;;  %v4145_v18 = vadd.f32 %v3988_v27, %v3753_v44  ;;  %v3761_v44 = vadd.f32 %v7538_v36, %v3724_v31  ;;  %v8064_v52 = vld [vmem:[#allocation10_spill] sm:$0xff]  ;;  %v3634_v47 = vpop.permute.xlu1 %3633 }
 0x74f   : > { %v4000_v34 = vrot.slane %v3836_v37, %v7594_v4  ;;  %v4146_v53 = vadd.f32 %v3992_v25, %v3754_v55  ;;  %v4147_v22 = vadd.f32 %v3996_v50, %v3755_v17  ;;  %v3837_v29 = vcombine.high %v3833_v11, %v3833_v11 }
 0x750   : > { %v4177_v45 = vmax.f32 %v4145_v18, 0.0  ;;  %v4008_v60 = vrot.slane %v3833_v11, %v7594_v4  ;;  %v3861_v55 = vrot.slane %v3845_v6, %v7543_v43  ;;  %v4012_v5 = vrot.slane %v3835_v30, %v7594_v4 }
 0x751   : > { %v4178_v48 = vmax.f32 %v4146_v53, 0.0  ;;  %v4179_v14 = vmax.f32 %v4147_v22, 0.0  ;;  %v4148_v35 = vadd.f32 %v4000_v34, %v3756_v23  ;;  %v4149_v39 = vadd.f32 %v4004_v13, %v3757_v58  ;;  %v8061_v23 = vld [vmem:[#allocation8_spill] sm:$0xff] }
 0x752   : > { %5430 = vmatprep.mubr.msk.f32.mxu1 %vm1597_vm0, %v4177_v45  ;;  %v7629_v32 = vadd.f32 %v4036_v8, %v3765_v26  ;;  %v3500_v12 = vmul.f32 %v7400_v15, %v8061_v23  ;;  %v3335_v58 = vmul.f32 %v7395_v41, %v8062_v59  ;;  %v4150_v46 = vadd.f32 %v4008_v60, %v3758_v49  ;;  %v8066_v49 = vld [vmem:[#allocation19_spill] sm:$0xff]  ;;  %v8068_v22 = vld [vmem:[#allocation12_spill] sm:$0xff] }
 0x753   : > { %5431 = vmatmul.mubr.msk.f32.vlgmr.msra.gmra.mrb[24].mxu1 %vm1597_vm0, %v4178_v48  ;;  %v4180_v51 = vmax.f32 %v4148_v35, 0.0  ;;  %v4016_v62 = vrot.slane %v3837_v29, %v7594_v4  ;;  %v3883_v31 = vcombine.high %v3861_v55, %v3861_v55  ;;  %v4020_v0 = vrot.slane %v3861_v55, %v7594_v4 }
 0x754   : > { %5433 = vmatprep.mubr.msk.f32.mxu1 %vm1597_vm0, %v4179_v14  ;;  %v4181_v63 = vmax.f32 %v4149_v39, 0.0  ;;  %v4151_v17 = vadd.f32 %v4012_v5, %v7582_v40  ;;  %v3502_v10 = vmul.f32 %v7400_v15, %v8064_v52  ;;  %v3697_v37 = vmul.f32 %v7412_v28, %v8065_v7  ;;  %v3445_v52 = vpop.permute.xlu1 %3444 }
 0x755   : > { %v3762_v26 = vadd.f32 %v7538_v36, %v3725_v56  ;;  %v3727_v6 = vadd.f32 %v3695_v21, %v3530_v2  ;;  %v3854_v27 = vcombine.high %v7585_v19, %v7585_v19  ;;  %v3532_v25 = vadd.f32 %v3500_v12, %v3335_v58  ;;  %v8067_v19 = vld [vmem:[#allocation13_spill] sm:$0xff] }
 0x756   : > { %v3337_v40 = vmul.f32 %v7395_v41, %v8066_v49  ;;  %v3885_v11 = vcombine.high %v3875_v61, %v3875_v61  ;;  %v4024_v50 = vrot.slane %v3875_v61, %v7594_v4  ;;  %v4182_v34 = vmax.f32 %v4150_v46, 0.0 }
 0x757   : > { %5434 = vmatmul.mubr.msk.f32.gmra.mrb[26].mxu1 %vm1597_vm0, %v4180_v51  ;;  %v4152_v30 = vadd.f32 %v4016_v62, %v3760_v3  ;;  %v4028_v13 = vrot.slane %v3883_v31, %v7594_v4  ;;  %v4153_v18 = vadd.f32 %v4020_v0, %v3761_v44  ;;  %v4183_v53 = vmax.f32 %v4151_v17, 0.0 }
 0x758   : > { %5436 = vmatprep.mubr.msk.f32.mxu1 %vm1597_vm0, %v4181_v63  ;;  %v3763_v54 = vadd.f32 %v7538_v36, %v3726_v1  ;;  %v3698_v8 = vmul.f32 %v7412_v28, %v8067_v19  ;;  %v3699_v57 = vmul.f32 %v7412_v28, %v8068_v22  ;;  %v3764_v33 = vadd.f32 %v7538_v36, %v3727_v6  ;;  %v8071_v22 = vld [vmem:[#allocation6_spill] sm:$0xff] }
 0x759   : > { %v3729_v48 = vadd.f32 %v3697_v37, %v3532_v25  ;;  %v3534_v45 = vadd.f32 %v3502_v10, %v3337_v40  ;;  %v3882_v29 = vrot.slane %v3854_v27, %v7543_v43  ;;  %v4032_v38 = vrot.slane %v3885_v11, %v7594_v4  ;;  %v3276_v10 = vpop.permute.xlu1 %3275  ;;  %v3266_v11 = vpop.permute.xlu0 %3265 }
 0x75a   : > { %v4184_v60 = vmax.f32 %v4152_v30, 0.0  ;;  %v4154_v14 = vadd.f32 %v4024_v50, %v3762_v26  ;;  %v3884_v35 = vcombine.high %v7604_v42, %v7604_v42  ;;  %v4185_v44 = vmax.f32 %v4153_v18, 0.0  ;;  %v8069_v18 = vld [vmem:[#allocation5_spill] sm:$0xff] }
 0x75b   : > { %5437 = vmatmul.mubr.msk.f32.gmra.mrb[28].mxu1 %vm1597_vm0, %v4182_v34  ;;  %v4155_v55 = vadd.f32 %v4028_v13, %v3763_v54  ;;  %v3730_v5 = vadd.f32 %v3698_v8, %v3533_v16  ;;  %v3766_v39 = vadd.f32 %v7538_v36, %v3729_v48  ;;  %v3731_v21 = vadd.f32 %v3699_v57, %v3534_v45  ;;  %v8070_v16 = vld [vmem:[#allocation7_spill] sm:$0xff] }
 0x75c   : > { %5439 = vmatprep.mubr.msk.f32.mxu1 %vm1597_vm0, %v4183_v53  ;;  %v3886_v1 = vcombine.high %v3882_v29, %v3882_v29  ;;  %v4040_v56 = vrot.slane %v3882_v29, %v7594_v4  ;;  %v4186_v23 = vmax.f32 %v4154_v14, 0.0  ;;  %v4156_v12 = vadd.f32 %v4032_v38, %v3764_v33 }
 0x75d   : > { %v4044_v3 = vrot.slane %v3884_v35, %v7594_v4  ;;  %v4187_v2 = vmax.f32 %v4155_v55, 0.0  ;;  %v3767_v42 = vadd.f32 %v7538_v36, %v3730_v5  ;;  %v3768_v59 = vadd.f32 %v7538_v36, %v3731_v21  ;;  %v3281_v34 = vpop.permute.xlu0 %3280 }
 0x75e   : > { %v4188_v58 = vmax.f32 %v4156_v12, 0.0  ;;  %v4158_v61 = vadd.f32 %v4040_v56, %v3766_v39  ;;  %v4048_v51 = vrot.slane %v3886_v1, %v7594_v4  ;;  %v4189_v46 = vmax.f32 %v7629_v32, 0.0  ;;  %v3642_v32 = vpop.permute.xlu1 %3641  ;;  %v8072_v1 = vld [vmem:[#allocation16_spill] sm:$0xff] }
 0x75f   : > { %5440 = vmatmul.mubr.msk.f32.gmra.mrb[30].mxu1 %vm1597_vm0, %v4184_v60  ;;  %v4159_v62 = vadd.f32 %v4044_v3, %v3767_v42  ;;  %v3342_v53 = vmul.f32 %v7395_v41, %v8069_v18  ;;  %v3507_v54 = vmul.f32 %v7400_v15, %v8070_v16  ;;  %v3344_v57 = vmul.f32 %v7395_v41, %v8071_v22  ;;  %v8073_v42 = vld [vmem:[#allocation14_spill] sm:$0xff] }
 0x760   : > { %5442 = vmatprep.mubr.msk.f32.mxu1 %vm1597_vm0, %v4185_v44  ;;  %v4190_v31 = vmax.f32 %v4158_v61, 0.0  ;;  %v4160_v0 = vadd.f32 %v4048_v51, %v3768_v59  ;;  %v3509_v33 = vmul.f32 %v7400_v15, %v3445_v52  ;;  %v3704_v45 = vmul.f32 %v7412_v28, %v3634_v47 }
 0x761   : > { %v4191_v63 = vmax.f32 %v4159_v62, 0.0  ;;  %v3291_v13 = vpop.permute.xlu0 %3290  ;;  %v3539_v48 = vadd.f32 %v3507_v54, %v3342_v53  ;;  %v3508_v29 = vmul.f32 %v7400_v15, %v3441_v24  ;;  %v3706_v60 = vmul.f32 %v7412_v28, %v3642_v32  ;;  %v8074_v62 = vld [vmem:[#allocation15_spill] sm:$0xff] }
 0x762   : > { %v4192_v17 = vmax.f32 %v4160_v0, 0.0  ;;  %v3646_v7 = vpop.permute.xlu1 %3645  ;;  %v3541_v38 = vadd.f32 %v3509_v33, %v3344_v57  ;;  %v3343_v14 = vmul.f32 %v7395_v41, %v3266_v11  ;;  %v3346_v44 = vmul.f32 %v7395_v41, %v3281_v34 }
 0x763   : > { %5443 = vmatmul.mubr.msk.f32.gmra.mrb[32].mxu1 %vm1597_vm0, %v4186_v23  ;;  %v3736_v39 = vadd.f32 %v3704_v45, %v3539_v48  ;;  %v3705_v56 = vmul.f32 %v7412_v28, %v8072_v1  ;;  %v3769_v59 = vadd.f32 %v7538_v36, %v8073_v42  ;;  %v3348_v61 = vmul.f32 %v7395_v41, %v3291_v13 }
 0x764   : > { %5445 = vmatprep.mubr.msk.f32.mxu1 %vm1597_vm0, %v4187_v2  ;;  %v3738_v21 = vadd.f32 %v3706_v60, %v3541_v38  ;;  %v3540_v23 = vadd.f32 %v3508_v29, %v3343_v14  ;;  %v3345_v47 = vmul.f32 %v7395_v41, %v3276_v10  ;;  %v7718_v32 = vmul.f32 %v7412_v28, %v3646_v7 }
 0x765   : > { %v3301_v8 = vpop.permute.xlu0 %3300 }
 0x766   : > { %v3453_v37 = vpop.permute.xlu1 %3452  ;;  %v7715_v52 = vadd.f32 %v7538_v36, %v3738_v21  ;;  %v3350_v10 = vmul.f32 %v7395_v41, %v3301_v8 }
 0x767   : > { %5446 = vmatmul.mubr.msk.f32.gmra.mrb[34].mxu1 %vm1597_vm0, %v4188_v58  ;;  %v3511_v35 = vmul.f32 %v7400_v15, %v3453_v37  ;;  %v3737_v37 = vadd.f32 %v3705_v56, %v3540_v23 }
 0x768   : > { %5448 = vmatprep.mubr.msk.f32.mxu1 %vm1597_vm0, %v4189_v46  ;;  %v3773_v46 = vadd.f32 %v7538_v36, %v3736_v39 }
 0x769   : > { %v3311_v5 = vpop.permute.xlu0 %3310  ;;  %v3543_v3 = vadd.f32 %v3511_v35, %v3346_v44  ;;  %v3774_v33 = vadd.f32 %v7538_v36, %v3737_v37 }
 0x76a   : > { %v3286_v26 = vpop.permute.xlu1 %3285  ;;  %v3352_v14 = vmul.f32 %v7395_v41, %v3311_v5 }
 0x76b   : > { %5449 = vmatmul.mubr.msk.f32.gmra.mrb[36].mxu1 %vm1597_vm0, %v4190_v31  ;;  %v3771_v31 = vadd.f32 %v7538_v36, %v8074_v62  ;;  %v3347_v16 = vmul.f32 %v7395_v41, %v3286_v26 }
 0x76c   : > { %5451 = vmatprep.mubr.msk.f32.mxu1 %vm1597_vm0, %v4191_v63 }
 0x76d   : > { %v3449_v63 = vpop.permute.xlu0 %3448 }
 0x76e   : > { %v3650_v6 = vpop.permute.xlu1 %3649 }
 0x76f   : > { %5452 = vmatmul.mubr.msk.f32.gmra.mrb[38].mxu1 %vm1597_vm0, %v4192_v17  ;;  %v3708_v12 = vmul.f32 %v7412_v28, %v3650_v6  ;;  %v3770_v6 = vadd.f32 %v7538_v36, %v7482_v9  ;;  %v3772_v9 = vadd.f32 %v7538_v36, %v7485_v20 }
 0x771   : > { %v3457_v54 = vpop.permute.xlu0 %3456 }
 0x772   : > { %v3654_v27 = vpop.permute.xlu1 %3653  ;;  %v3512_v62 = vmul.f32 %v7400_v15, %v3457_v54 }
 0x775   : > { %v3465_v35 = vpop.permute.xlu0 %3464 }
 0x776   : > { %v3461_v25 = vpop.permute.xlu1 %3460 }
 0x777   : > { %v3513_v58 = vmul.f32 %v7400_v15, %v3461_v25  ;;  %v3740_v25 = vadd.f32 %v3708_v12, %v3543_v3 }
 0x779   : > { %v3545_v53 = vadd.f32 %v3513_v58, %v3348_v61  ;;  %v7743_v48 = vadd.f32 %v7538_v36, %v3740_v25 }
 0x77a   : > { %v3296_v49 = vpop.permute.xlu1 %3295 }
 0x77b   : > { %v7737_v8 = vmul.f32 %v7395_v41, %v3296_v49  ;;  %v3510_v49 = vmul.f32 %v7400_v15, %v3449_v63  ;;  %v3473_v63 = vpop.permute.xlu0 %3472 }
 0x77d   : > { %v3542_v61 = vadd.f32 %v3510_v49, %v3345_v47 }
 0x77e   : > { %v3658_v40 = vpop.permute.xlu1 %3657 }
 0x77f   : > { %v3710_v13 = vmul.f32 %v7412_v28, %v3658_v40  ;;  %v7733_v40 = vmul.f32 %v7412_v28, %v3654_v27  ;;  %v3739_v54 = vadd.f32 %v7718_v32, %v3542_v61 }
 0x781   : > { %v3742_v38 = vadd.f32 %v3710_v13, %v3545_v53 }
 0x782   : > { %v3662_v50 = vpop.permute.xlu1 %3661 }
 0x783   : > { %v7740_v26 = vmul.f32 %v7412_v28, %v3662_v50  ;;  %v7772_v47 = vadd.f32 %v7538_v36, %v3742_v38  ;;  %v3481_v38 = vpop.permute.xlu0 %3480 }
 0x786   : > { %v3469_v30 = vpop.permute.xlu1 %3468 }
 0x787   : > { %v3515_v18 = vmul.f32 %v7400_v15, %v3469_v30 }
 0x789   : > { %v3547_v60 = vadd.f32 %v3515_v18, %v3350_v10 }
 0x78a   : > { %v3306_v19 = vpop.permute.xlu1 %3305 }
 0x78b   : > { %v7747_v20 = vmul.f32 %v7395_v41, %v3306_v19 }
 0x78e   : > { %v3666_v55 = vpop.permute.xlu1 %3665 }
 0x78f   : > { %v3712_v27 = vmul.f32 %v7412_v28, %v3666_v55 }
 0x792   : > { %v7710_v0 = vpop.permute.xlu1 %3669 }
 0x793   : > { %v3713_v18 = vmul.f32 %v7412_v28, %v7710_v0 }
 0x796   : > { %v3477_v45 = vpop.permute.xlu1 %3476 }
 0x797   : > { %v3517_v37 = vmul.f32 %v7400_v15, %v3477_v45 }
 0x819   : > { %v7701_v2 = vpop.f32.mrb[22].mxu1 }
 0x81a   : > { %v3116_v51 = vpop.f32.mrb[23].mxu1  ;;  %v3943_v56 = vrot.slane %v7701_v2, %v7543_v43  ;;  %v3936_v25 = vcombine.high %v7701_v2, %v7701_v2 }
 0x81b   : > { %v3887_v17 = vcombine.high %v3116_v51, %v3116_v51  ;;  %v3894_v24 = vrot.slane %v3116_v51, %v7543_v43  ;;  %v3316_v51 = vpop.permute.xlu1 %3315 }
 0x81c   : > { %v3959_v2 = vrot.slane %v3943_v56, %v7543_v43  ;;  %v3950_v0 = vrot.slane %v3936_v25, %v7543_v43  ;;  %v3353_v32 = vmul.f32 %v7395_v41, %v3316_v51 }
 0x81d   : > { %v3901_v11 = vrot.slane %v3887_v17, %v7543_v43  ;;  %v3902_v34 = vcombine.high %v3894_v24, %v3894_v24  ;;  %v3910_v22 = vrot.slane %v3894_v24, %v7543_v43 }
 0x81e   : > { %v4084_v49 = vrot.slane %v3959_v2, %v7594_v4 }
 0x81f   : > { %v3903_v7 = vcombine.high %v3901_v11, %v3901_v11  ;;  %v3924_v57 = vrot.slane %v3902_v34, %v7543_v43  ;;  %v3917_v30 = vrot.slane %v3901_v11, %v7543_v43  ;;  %v3932_v50 = vcombine.high %v3910_v22, %v3910_v22 }
 0x820   : > { %v4052_v39 = vrot.slane %v3910_v22, %v7594_v4  ;;  %v3514_v22 = vmul.f32 %v7400_v15, %v3465_v35  ;;  %v4169_v51 = vadd.f32 %v4084_v49, %v7743_v48 }
 0x821   : > { %v3931_v29 = vrot.slane %v3903_v7, %v7543_v43  ;;  %v3934_v44 = vcombine.high %v3924_v57, %v3924_v57  ;;  %v4056_v21 = vrot.slane %v3924_v57, %v7594_v4  ;;  %v4068_v1 = vrot.slane %v3917_v30, %v7594_v4 }
 0x822   : > { %v3933_v55 = vcombine.high %v3917_v30, %v3917_v30  ;;  %v4060_v23 = vrot.slane %v3932_v50, %v7594_v4  ;;  %v4161_v12 = vadd.f32 %v4052_v39, %v3769_v59  ;;  %v7769_v59 = vld [vmem:[%s7990_s3 + $0x7] ss:$0 sm:$0xff]  ;;  %v3544_v7 = vadd.f32 %v3512_v62, %v3347_v16  ;;  %v3674_v16 = vpop.permute.xlu1 %3673 }
 0x823   : > { %v4072_v19 = vrot.slane %v3931_v29, %v7594_v4  ;;  %v4064_v5 = vrot.slane %v3934_v44, %v7594_v4  ;;  %v4162_v3 = vadd.f32 %v4056_v21, %v3770_v6  ;;  %v4165_v42 = vadd.f32 %v4068_v1, %v3773_v46 }
 0x824   : > { %v4163_v17 = vadd.f32 %v4060_v23, %v3771_v31  ;;  %v4193_v11 = vmax.f32 %v4161_v12, 0.0  ;;  %v3951_v6 = vcombine.high %v3943_v56, %v3943_v56  ;;  %v3935_v34 = vcombine.high %v3931_v29, %v3931_v29 }
 0x825   : > { %v7760_v58 = vadd.f32 %v4072_v19, %v3774_v33  ;;  %v4164_v24 = vadd.f32 %v4064_v5, %v3772_v9  ;;  %v4194_v46 = vmax.f32 %v4162_v3, 0.0  ;;  %v7774_v31 = vadd.f32 %v3712_v27, %v3547_v60 }
 0x826   : > { %v4195_v13 = vmax.f32 %v4163_v17, 0.0  ;;  %v4076_v53 = vrot.slane %v3933_v55, %v7594_v4  ;;  %5454 = vmatprep.mubr.msk.f32.mxu1 %vm1597_vm0, %v4193_v11  ;;  %v5432_v10 = vpop.f32.mrb[24].mxu1  ;;  %v7785_v33 = vadd.f32 %v3517_v37, %v3352_v14  ;;  %v3516_v30 = vmul.f32 %v7400_v15, %v3473_v63 }
 0x827   : > { %v4386_v57 = vadd.f32 %v5432_v10, %v7769_v59  ;;  %v4380_v9 = vpop.f32.mrb[25].mxu1  ;;  %5455 = vmatmul.mubr.msk.f32.gmra.mrb[40].mxu1 %vm1597_vm0, %v4194_v46  ;;  %v3973_v29 = vrot.slane %v3951_v6, %v7543_v43  ;;  %v4196_v27 = vmax.f32 %v4164_v24, 0.0  ;;  %v4080_v60 = vrot.slane %v3935_v34, %v7594_v4 }
 0x828   : > { %v4381_v45 = vadd.f32 %v7769_v59, %v4380_v9  ;;  %5457 = vmatprep.mubr.msk.f32.mxu1 %vm1597_vm0, %v4195_v13  ;;  %v3981_v14 = vcombine.high %v3959_v2, %v3959_v2  ;;  %v4197_v50 = vmax.f32 %v4165_v42, 0.0  ;;  %v4167_v44 = vadd.f32 %v4076_v53, %v7715_v52 }
 0x829   : > { %4591 = vperm.xlu1 %5726, %v4386_v57   ;;  %v3776_v39 = vadd.f32 %v7538_v36, %v3739_v54  ;;  %v3741_v41 = vadd.f32 %v7733_v40, %v3544_v7  ;;  %v3546_v21 = vadd.f32 %v3514_v22, %v7737_v8  ;;  %v3952_v56 = vcombine.high %v3950_v0, %v3950_v0  ;;  %v3678_v40 = vpop.permute.xlu1 %3677 }
 0x82a   : > { %4588 = vperm.xlu0 %5727, %v4381_v45   ;;  %v5435_v35 = vpop.f32.mrb[26].mxu1  ;;  %v3548_v55 = vadd.f32 %v3516_v30, %v7747_v20  ;;  %v3518_v23 = vmul.f32 %v7400_v15, %v3481_v38  ;;  %v3983_v52 = vcombine.high %v3973_v29, %v3973_v29  ;;  %v4088_v12 = vrot.slane %v3973_v29, %v7594_v4 }
 0x82b   : > { %v4396_v1 = vadd.f32 %v5435_v35, %v7769_v59  ;;  %v4390_v19 = vpop.f32.mrb[27].mxu1  ;;  %5458 = vmatmul.mubr.msk.f32.gmra.mrb[42].mxu1 %vm1597_vm0, %v4196_v27  ;;  %v4198_v8 = vmax.f32 %v7760_v58, 0.0  ;;  %v4168_v3 = vadd.f32 %v4080_v60, %v3776_v39  ;;  %v3966_v42 = vrot.slane %v3950_v0, %v7543_v43 }
 0x82c   : > { %v4391_v5 = vadd.f32 %v7769_v59, %v4390_v19  ;;  %5460 = vmatprep.mubr.msk.f32.mxu1 %vm1597_vm0, %v4197_v50  ;;  %v4092_v61 = vrot.slane %v3981_v14, %v7594_v4  ;;  %v4199_v20 = vmax.f32 %v4167_v44, 0.0  ;;  %v3714_v62 = vmul.f32 %v7412_v28, %v3674_v16 }
 0x82d   : > { %v3778_v63 = vadd.f32 %v7538_v36, %v3741_v41  ;;  %v3743_v17 = vadd.f32 %v7740_v26, %v3546_v21  ;;  %v3745_v37 = vadd.f32 %v3713_v18, %v3548_v55  ;;  %v3550_v25 = vadd.f32 %v3518_v23, %v3353_v32 }
 0x82e   : > { %4597 = vperm.xlu0 %5727, %v4396_v1   ;;  %4594 = vperm.xlu1 %5726, %v4391_v5   ;;  %v5438_v15 = vpop.f32.mrb[28].mxu1  ;;  %v3715_v11 = vmul.f32 %v7412_v28, %v3678_v40  ;;  %v3980_v46 = vrot.slane %v3952_v56, %v7543_v43  ;;  %v4096_v6 = vrot.slane %v3983_v52, %v7594_v4  ;;  %v4200_v34 = vmax.f32 %v4168_v3, 0.0 }
 0x82f   : > { %v4406_v24 = vadd.f32 %v5438_v15, %v7769_v59  ;;  %v4400_v58 = vpop.f32.mrb[29].mxu1  ;;  %5461 = vmatmul.mubr.msk.f32.gmra.mrb[44].mxu1 %vm1597_vm0, %v4198_v8  ;;  %v4170_v13 = vadd.f32 %v4088_v12, %v3778_v63  ;;  %v3982_v26 = vcombine.high %v3966_v42, %v3966_v42  ;;  %v4100_v2 = vrot.slane %v3966_v42, %v7594_v4 }
 0x830   : > { %v4401_v48 = vadd.f32 %v7769_v59, %v4400_v58  ;;  %5463 = vmatprep.mubr.msk.f32.mxu1 %vm1597_vm0, %v4199_v20  ;;  %v4201_v18 = vmax.f32 %v4169_v51, 0.0  ;;  %v4171_v10 = vadd.f32 %v4092_v61, %v7772_v47  ;;  %v3781_v28 = vadd.f32 %v7538_v36, %v7774_v31  ;;  %v8075_v20 = vld [vmem:[#allocation17_spill] sm:$0xff] }
 0x831   : > { %v3780_v54 = vadd.f32 %v7538_v36, %v3743_v17  ;;  %v3746_v22 = vadd.f32 %v3714_v62, %v7785_v33  ;;  %v3782_v57 = vadd.f32 %v7538_v36, %v3745_v37  ;;  %v3747_v9 = vadd.f32 %v3715_v11, %v3550_v25 }
 0x832   : > { %4603 = vperm.xlu0 %5727, %v4406_v24   ;;  %4600 = vperm.xlu1 %5726, %v4401_v48   ;;  %v5441_v53 = vpop.f32.mrb[30].mxu1  ;;  %v3984_v47 = vcombine.high %v3980_v46, %v3980_v46  ;;  %v4104_v30 = vrot.slane %v3980_v46, %v7594_v4  ;;  %v4202_v31 = vmax.f32 %v4170_v13, 0.0  ;;  %v4108_v32 = vrot.slane %v3982_v26, %v7594_v4 }
 0x833   : > { %v4416_v43 = vadd.f32 %v5441_v53, %v7769_v59  ;;  %v4410_v7 = vpop.f32.mrb[31].mxu1  ;;  %5464 = vmatmul.mubr.msk.f32.gmra.mrb[46].mxu1 %vm1597_vm0, %v4200_v34  ;;  %v4172_v45 = vadd.f32 %v4096_v6, %v3780_v54  ;;  %v4203_v29 = vmax.f32 %v4171_v10, 0.0  ;;  %v4173_v38 = vadd.f32 %v4100_v2, %v3781_v28 }
 0x834   : > { %v4411_v0 = vadd.f32 %v7769_v59, %v4410_v7  ;;  %5466 = vmatprep.mubr.msk.f32.mxu1 %vm1597_vm0, %v4201_v18  ;;  %v3783_v60 = vadd.f32 %v7538_v36, %v3746_v22  ;;  %v3784_v49 = vadd.f32 %v7538_v36, %v3747_v9  ;;  %v4112_v35 = vrot.slane %v3984_v47, %v7594_v4 }
 0x835   : > { %v4204_v50 = vmax.f32 %v4172_v45, 0.0  ;;  %v4174_v44 = vadd.f32 %v4104_v30, %v3782_v57  ;;  %v4205_v41 = vmax.f32 %v4173_v38, 0.0 }
 0x836   : > { %4609 = vperm.xlu0 %5727, %v4416_v43   ;;  %4606 = vperm.xlu1 %5726, %v4411_v0   ;;  %v5444_v16 = vpop.f32.mrb[32].mxu1  ;;  %v4175_v21 = vadd.f32 %v4108_v32, %v3783_v60  ;;  %v4176_v55 = vadd.f32 %v4112_v35, %v3784_v49 }
 0x837   : > { %v4426_v33 = vadd.f32 %v5444_v16, %v7769_v59  ;;  %v4420_v27 = vpop.f32.mrb[33].mxu1  ;;  %5467 = vmatmul.mubr.msk.f32.gmra.mrb[48].mxu1 %vm1597_vm0, %v4202_v31  ;;  %v4206_v36 = vmax.f32 %v4174_v44, 0.0 }
 0x838   : > { %v4421_v14 = vadd.f32 %v7769_v59, %v4420_v27  ;;  %5469 = vmatprep.mubr.msk.f32.mxu1 %vm1597_vm0, %v4203_v29  ;;  %v4207_v23 = vmax.f32 %v4175_v21, 0.0  ;;  %v4208_v40 = vmax.f32 %v4176_v55, 0.0 }
 0x83a   : > { %4615 = vperm.xlu0 %5727, %v4426_v33   ;;  %4612 = vperm.xlu1 %5726, %v4421_v14   ;;  %v5447_v39 = vpop.f32.mrb[34].mxu1 }
 0x83b   : > { %v4436_v1 = vadd.f32 %v5447_v39, %v7769_v59  ;;  %v4430_v19 = vpop.f32.mrb[35].mxu1  ;;  %5470 = vmatmul.mubr.msk.f32.gmra.mrb[50].mxu1 %vm1597_vm0, %v4204_v50 }
 0x83c   : > { %v4431_v56 = vadd.f32 %v7769_v59, %v4430_v19  ;;  %5472 = vmatprep.mubr.msk.f32.mxu1 %vm1597_vm0, %v4205_v41 }
 0x83e   : > { %4621 = vperm.xlu0 %5727, %v4436_v1   ;;  %4618 = vperm.xlu1 %5726, %v4431_v56   ;;  %v5450_v4 = vpop.f32.mrb[36].mxu1 }
 0x83f   : > { %v4446_v5 = vadd.f32 %v5450_v4, %v7769_v59  ;;  %v4440_v52 = vpop.f32.mrb[37].mxu1  ;;  %5473 = vmatmul.mubr.msk.f32.gmra.mrb[52].mxu1 %vm1597_vm0, %v4206_v36 }
 0x840   : > { %v4441_v12 = vadd.f32 %v7769_v59, %v4440_v52  ;;  %5475 = vmatprep.mubr.msk.f32.mxu1 %vm1597_vm0, %v4207_v23 }
 0x842   : > { %4627 = vperm.xlu0 %5727, %v4446_v5   ;;  %4624 = vperm.xlu1 %5726, %v4441_v12   ;;  %v5453_v8 = vpop.f32.mrb[38].mxu1 }
 0x843   : > { %v4456_v3 = vadd.f32 %v5453_v8, %v7769_v59  ;;  %v4450_v42 = vpop.f32.mrb[39].mxu1  ;;  %5476 = vmatmul.mubr.msk.f32.gmra.mrb[54].mxu1 %vm1597_vm0, %v4208_v40 }
 0x844   : > { %v4451_v61 = vadd.f32 %v7769_v59, %v4450_v42 }
 0x846   : > { %4633 = vperm.xlu0 %5727, %v4456_v3   ;;  %4630 = vperm.xlu1 %5726, %v4451_v61  }
 0x8a8   : > { %v4592_v51 = vpop.permute.xlu1 %4591 }
 0x8a9   : > { %v4589_v15 = vpop.permute.xlu0 %4588  ;;  %v4692_v62 = vrot.slane %v4592_v51, %v8075_v20 }
 0x8aa   : > { %v4688_v63 = vrot.slane %v4589_v15, %v8075_v20 }
 0x8ac   : > { %v4813_v37 = vsel %vm2568_vm1, %v4692_v62, %v4688_v63 }
 0x8ad   : > { %v4595_v17 = vpop.permute.xlu1 %4594  ;;  %v4598_v24 = vpop.permute.xlu0 %4597 }
 0x8ae   : > { %v4696_v58 = vrot.slane %v4595_v17, %v8075_v20  ;;  %v4700_v25 = vrot.slane %v4598_v24, %v8075_v20 }
 0x8b0   : > { %v4814_v11 = vsel %vm2570_vm2, %v4696_v58, %v4813_v37 }
 0x8b1   : > { %v4601_v48 = vpop.permute.xlu1 %4600  ;;  %v4604_v46 = vpop.permute.xlu0 %4603  ;;  %v4815_v34 = vsel %vm2572_vm3, %v4700_v25, %v4814_v11 }
 0x8b2   : > { %v4704_v6 = vrot.slane %v4601_v48, %v8075_v20  ;;  %v4708_v13 = vrot.slane %v4604_v46, %v8075_v20 }
 0x8b4   : > { %v4816_v26 = vsel %vm2574_vm4, %v4704_v6, %v4815_v34 }
 0x8b5   : > { %v4607_v2 = vpop.permute.xlu1 %4606  ;;  %v4610_v53 = vpop.permute.xlu0 %4609  ;;  %v4817_v28 = vsel %vm2576_vm5, %v4708_v13, %v4816_v26 }
 0x8b6   : > { %v4712_v18 = vrot.slane %v4607_v2, %v8075_v20  ;;  %v4716_v10 = vrot.slane %v4610_v53, %v8075_v20 }
 0x8b8   : > { %v4818_v54 = vsel %vm2578_vm6, %v4712_v18, %v4817_v28 }
 0x8b9   : > { %v4819_v43 = vsel %vm2580_vm7, %v4716_v10, %v4818_v54  ;;  %v4613_v7 = vpop.permute.xlu1 %4612  ;;  %v4616_v22 = vpop.permute.xlu0 %4615 }
 0x8ba   : > { %4846 = vst.msk [vmem:[%s6553_s9] sm:$0xff] %vm4845_vm10, %v4819_v43  ;;  %v4720_v57 = vrot.slane %v4613_v7, %v8075_v20  ;;  %v4724_v9 = vrot.slane %v4616_v22, %v8075_v20 }
 0x8bc   : > { %v4820_v31 = vsel %vm2568_vm1, %v4724_v9, %v4720_v57 }
 0x8bd   : > { %v4619_v0 = vpop.permute.xlu1 %4618  ;;  %v4622_v47 = vpop.permute.xlu0 %4621 }
 0x8be   : > { %v4728_v30 = vrot.slane %v4619_v0, %v8075_v20  ;;  %v4732_v45 = vrot.slane %v4622_v47, %v8075_v20 }
 0x8c0   : > { %v4821_v32 = vsel %vm2570_vm2, %v4728_v30, %v4820_v31 }
 0x8c1   : > { %v4625_v16 = vpop.permute.xlu1 %4624  ;;  %v4628_v29 = vpop.permute.xlu0 %4627  ;;  %v4822_v33 = vsel %vm2572_vm3, %v4732_v45, %v4821_v32 }
 0x8c2   : > { %v4736_v38 = vrot.slane %v4625_v16, %v8075_v20  ;;  %v4740_v27 = vrot.slane %v4628_v29, %v8075_v20 }
 0x8c4   : > { %v4823_v60 = vsel %vm2574_vm4, %v4736_v38, %v4822_v33 }
 0x8c5   : > { %v4631_v14 = vpop.permute.xlu1 %4630  ;;  %v4634_v49 = vpop.permute.xlu0 %4633  ;;  %v4824_v44 = vsel %vm2576_vm5, %v4740_v27, %v4823_v60 }
 0x8c6   : > { %v4744_v35 = vrot.slane %v4631_v14, %v8075_v20  ;;  %v4748_v50 = vrot.slane %v4634_v49, %v8075_v20 }
 0x8c8   : > { %v4825_v39 = vsel %vm2578_vm6, %v4744_v35, %v4824_v44 }
 0x8c9   : > { %v4826_v41 = vsel %vm2580_vm7, %v4748_v50, %v4825_v39 }
 0x8ca   : > { %4847 = vst.msk [vmem:[%s6553_s9 + $0x20] sm:$0xff] %vm4845_vm10, %v4826_v41 }
 0x8fa   : > { %v5456_v21 = vpop.f32.mrb[40].mxu1 }
 0x8fb   : > { %v4466_v1 = vadd.f32 %v5456_v21, %v7769_v59  ;;  %v4460_v19 = vpop.f32.mrb[41].mxu1 }
 0x8fc   : > { %v4461_v56 = vadd.f32 %v7769_v59, %v4460_v19 }
 0x8fd   : > { %4639 = vperm.xlu0 %5727, %v4466_v1  }
 0x8fe   : > { %4636 = vperm.xlu1 %5726, %v4461_v56   ;;  %v5459_v55 = vpop.f32.mrb[42].mxu1 }
 0x8ff   : > { %v4476_v36 = vadd.f32 %v5459_v55, %v7769_v59  ;;  %v4470_v4 = vpop.f32.mrb[43].mxu1 }
 0x900   : > { %v4471_v52 = vadd.f32 %v7769_v59, %v4470_v4 }
 0x902   : > { %4645 = vperm.xlu1 %5726, %v4476_v36   ;;  %v5462_v23 = vpop.f32.mrb[44].mxu1 }
 0x903   : > { %v4480_v5 = vpop.f32.mrb[45].mxu1  ;;  %v4486_v8 = vadd.f32 %v5462_v23, %v7769_v59 }
 0x904   : > { %v4481_v15 = vadd.f32 %v7769_v59, %v4480_v5 }
 0x906   : > { %4642 = vperm.xlu1 %5726, %v4471_v52   ;;  %v5465_v12 = vpop.f32.mrb[46].mxu1 }
 0x907   : > { %v4490_v40 = vpop.f32.mrb[47].mxu1  ;;  %v4496_v34 = vadd.f32 %v5465_v12, %v7769_v59 }
 0x908   : > { %v4491_v3 = vadd.f32 %v7769_v59, %v4490_v40 }
 0x90a   : > { %4651 = vperm.xlu1 %5726, %v4486_v8   ;;  %4654 = vperm.xlu0 %5727, %v4491_v3   ;;  %v5468_v42 = vpop.f32.mrb[48].mxu1 }
 0x90b   : > { %v4506_v61 = vadd.f32 %v5468_v42, %v7769_v59  ;;  %v4500_v51 = vpop.f32.mrb[49].mxu1 }
 0x90c   : > { %v4501_v24 = vadd.f32 %v7769_v59, %v4500_v51 }
 0x90e   : > { %4648 = vperm.xlu1 %5726, %v4481_v15   ;;  %4663 = vperm.xlu0 %5727, %v4506_v61   ;;  %v5471_v62 = vpop.f32.mrb[50].mxu1 }
 0x90f   : > { %v4516_v63 = vadd.f32 %v5471_v62, %v7769_v59  ;;  %v4510_v17 = vpop.f32.mrb[51].mxu1 }
 0x910   : > { %v4511_v25 = vadd.f32 %v7769_v59, %v4510_v17 }
 0x912   : > { %4660 = vperm.xlu1 %5726, %v4501_v24   ;;  %4669 = vperm.xlu0 %5727, %v4516_v63   ;;  %v5474_v58 = vpop.f32.mrb[52].mxu1 }
 0x913   : > { %v4520_v37 = vpop.f32.mrb[53].mxu1  ;;  %v4526_v46 = vadd.f32 %v5474_v58, %v7769_v59 }
 0x914   : > { %v4521_v13 = vadd.f32 %v7769_v59, %v4520_v37 }
 0x916   : > { %4666 = vperm.xlu0 %5727, %v4511_v25   ;;  %v5477_v11 = vpop.f32.mrb[54].mxu1 }
 0x917   : > { %v4530_v48 = vpop.f32.mrb[55].mxu1  ;;  %v4536_v26 = vadd.f32 %v5477_v11, %v7769_v59 }
 0x918   : > { %v4531_v6 = vadd.f32 %v7769_v59, %v4530_v48 }
 0x91a   : > { %4675 = vperm.xlu0 %5727, %v4526_v46   ;;  %4678 = vperm.xlu1 %5726, %v4531_v6  }
 0x91e   : > { %4672 = vperm.xlu0 %5727, %v4521_v13   ;;  %4657 = vperm.xlu1 %5726, %v4496_v34  }
 0x922   : > { %4681 = vperm.xlu0 %5727, %v4536_v26  }
 0x97c   : > { %v4640_v18 = vpop.permute.xlu0 %4639 }
 0x97d   : > { %v4637_v2 = vpop.permute.xlu1 %4636  ;;  %v4756_v22 = vrot.slane %v4640_v18, %v8075_v20 }
 0x97e   : > { %v4752_v57 = vrot.slane %v4637_v2, %v8075_v20 }
 0x980   : > { %v4827_v47 = vsel %vm2568_vm1, %v4756_v22, %v4752_v57 }
 0x981   : > { %v4646_v53 = vpop.permute.xlu1 %4645 }
 0x982   : > { %v4764_v32 = vrot.slane %v4646_v53, %v8075_v20 }
 0x985   : > { %v4643_v10 = vpop.permute.xlu1 %4642 }
 0x986   : > { %v4760_v9 = vrot.slane %v4643_v10, %v8075_v20 }
 0x988   : > { %v4828_v59 = vsel %vm2570_vm2, %v4760_v9, %v4827_v47 }
 0x989   : > { %v4652_v28 = vpop.permute.xlu1 %4651  ;;  %v4655_v54 = vpop.permute.xlu0 %4654  ;;  %v4829_v29 = vsel %vm2572_vm3, %v4764_v32, %v4828_v59 }
 0x98a   : > { %v4772_v49 = vrot.slane %v4652_v28, %v8075_v20  ;;  %v4776_v39 = vrot.slane %v4655_v54, %v8075_v20 }
 0x98d   : > { %v4664_v43 = vpop.permute.xlu0 %4663  ;;  %v4649_v7 = vpop.permute.xlu1 %4648 }
 0x98e   : > { %v4768_v31 = vrot.slane %v4649_v7, %v8075_v20  ;;  %v4788_v27 = vrot.slane %v4664_v43, %v8075_v20 }
 0x990   : > { %v4830_v33 = vsel %vm2574_vm4, %v4768_v31, %v4829_v29 }
 0x991   : > { %v4670_v0 = vpop.permute.xlu0 %4669  ;;  %v4661_v30 = vpop.permute.xlu1 %4660  ;;  %v4831_v50 = vsel %vm2576_vm5, %v4772_v49, %v4830_v33 }
 0x992   : > { %v4784_v16 = vrot.slane %v4661_v30, %v8075_v20  ;;  %v4796_v41 = vrot.slane %v4670_v0, %v8075_v20  ;;  %v4832_v36 = vsel %vm2578_vm6, %v4776_v39, %v4831_v50 }
 0x994   : > { %v4834_v35 = vsel %vm2568_vm1, %v4788_v27, %v4784_v16 }
 0x995   : > { %v4667_v45 = vpop.permute.xlu0 %4666 }
 0x996   : > { %v4792_v38 = vrot.slane %v4667_v45, %v8075_v20 }
 0x998   : > { %v4835_v44 = vsel %vm2570_vm2, %v4792_v38, %v4834_v35 }
 0x999   : > { %v4679_v60 = vpop.permute.xlu1 %4678  ;;  %v4676_v14 = vpop.permute.xlu0 %4675  ;;  %v4836_v4 = vsel %vm2572_vm3, %v4796_v41, %v4835_v44 }
 0x99a   : > { %v4804_v55 = vrot.slane %v4676_v14, %v8075_v20  ;;  %v4808_v23 = vrot.slane %v4679_v60, %v8075_v20 }
 0x99d   : > { %v4658_v21 = vpop.permute.xlu1 %4657  ;;  %v4673_v1 = vpop.permute.xlu0 %4672 }
 0x99e   : > { %v4780_v19 = vrot.slane %v4658_v21, %v8075_v20  ;;  %v4800_v56 = vrot.slane %v4673_v1, %v8075_v20 }
 0x9a0   : > { %v4833_v5 = vsel %vm2580_vm7, %v4780_v19, %v4832_v36  ;;  %v4837_v52 = vsel %vm2574_vm4, %v4800_v56, %v4836_v4 }
 0x9a1   : > { %4848 = vst.msk [vmem:[%s6553_s9 + $0x40] sm:$0xff] %vm4845_vm10, %v4833_v5  ;;  %v4838_v12 = vsel %vm2576_vm5, %v4804_v55, %v4837_v52  ;;  %v4682_v40 = vpop.permute.xlu0 %4681 }
 0x9a2   : > { %v4839_v8 = vsel %vm2578_vm6, %v4808_v23, %v4838_v12  ;;  %v4812_v3 = vrot.slane %v4682_v40, %v8075_v20 }
 0x9a4   : > { %v4840_v42 = vsel %vm2580_vm7, %v4812_v3, %v4839_v8 }
 0x9a5   : > { %4849 = vst.msk [vmem:[%s6553_s9 + $0x60] sm:$0xff] %vm4845_vm10, %v4840_v42 }
 0x9a6   : > { %5764 = shalt.err (!%p5761_p3)
}
 0x9a7   : > { %s5765_s7 = scalar_lea.hbm %s7937_s19, 2048  ;;  %s5769_s10 = scalar_lea.hbm %s7991_s4, 4096 }
 0x9a8   : > { %p5766_p4 = scmp.ne.s32.totalorder %s7937_s19, %s5765_s7  ;;  %p5770_p9 = scmp.lt.u32.totalorder %s7937_s19, %s7991_s4 }
 0x9a9   : > { %p5771_p10 = scmp.lt.u32.totalorder %s5769_s10, %s5765_s7  ;;  %p5773_p12 = scmp.lt.u32.totalorder %s5765_s7, %s7937_s19 }
 0x9aa   : > { %p5767_p7 = pnand %p5766_p4, %p5886_p5 }
 0x9ab   : > { %p5772_p11 = por %p5771_p10, %p5770_p9 }
 0x9ac   : > { %p5768_p8 = pneg %p5767_p7 }
 0x9ad   : > { %p5774_p13 = por %p5773_p12, %p5772_p11 }
 0x9af   : > { %p5775_p0 = pnand %p5774_p13, %p5768_p8 }
 0x9b1   : > { %5778 = shalt.err (!%p5775_p0)
}
 0x9b2   : > { %s5821_s12 = smov 512   ;;  %s5822_s27 = smov 32  }
 0x9b3   : > { %5538 = dma.vmem_to_hbm [thread:$0]  (%p5886_p5), %s7939_s20, 2048, %s7937_s19, %s7946_s28, %s5821_s12, %s5821_s12, %s5822_s27  }
 0x9b4 PF: > { %p5544_p1 = scmp.ge.s32.totalorder %s5813_s18, 2  ;;  %s4896_s14 = sand.u32 1, %s5801_s15  }
 0x9b5   : > { %s4897_s22 = scalar_lea.sflag [#allocation3], %s4896_s14 }
 0x9b6   : > { %p5541_p2 = pnand %p5544_p1, %p5890_p6 }
 0x9b8   : > { %5796 = dma.done.wait (!%p5541_p2), %s4897_s22, 2048  }
 0x9b9   : > { %5798 = vsyncadd (!%p5541_p2), %s4897_s22, 4294965248  ;;  %p14_p3 = scmp.ge.s32.totalorder %s5873_s21, 4   ;;  %s8076_s15 = smov %s5805_s16 }
 0x9ba   : > { %s8077_s16 = smov %s5809_s17  ;;  %s8078_s17 = smov %s5884_s24 }
 0x9bb   : > { %s8079_s18 = smov %s5873_s21  ;;  %16 = sbr.rel (!%p14_p3) target bundleno = 3 (0x3), region = 74 }
 0x9c2   :  { %4902 = vsyncpa [#allocation3], 1 }
 0x9c3   :  { %4904 = vsyncpa [#allocation3 + $0x1], 1 }

</bundles_post_ra>
